<compile_context>
chip_gen: v7x
topology: tpu7x:2x2x1
jax: 0.10.0
libtpu: 0.0.40
codegen_flags: <defaults>
</compile_context>

<pallas_src>
import jax
import jax.numpy as jnp
from jax.experimental import pallas as pl
from jax.experimental.pallas import tpu as pltpu

C = 512          # nn.BatchNorm2d(512) / nn.Linear(512, 3)
OUT = 3
EPS = 1e-5


def _emotion_kernel(x_ref, w_ref, b_ref, o_ref, acc_ref):
    # x_ref:   (nb, tk)   lane-dense slab of the flattened (C*H*W) features
    # w_ref:   (tk, OUT)  BN + pooling + Linear folded into one matrix (K-tile)
    # b_ref:   (1, OUT)   folded bias (constant block index -> fetched once)
    # o_ref:   (nb, OUT)
    # acc_ref: (nb, OUT)  f32 accumulator, resident across the K axis
    k = pl.program_id(1)

    @pl.when(k == 0)
    def _init():
        acc_ref[...] = jnp.broadcast_to(b_ref[...], acc_ref.shape)

    acc_ref[...] += jnp.dot(x_ref[...], w_ref[...],
                            preferred_element_type=jnp.float32)

    @pl.when(k == pl.num_programs(1) - 1)
    def _finalize():
        o_ref[...] = acc_ref[...].astype(o_ref.dtype)


def _choose_tiles(N, K, *, x_budget_bytes=12 * 1024 * 1024):
    """Pick (nb, tk).

    nb: full batch when it fits (block dim equal to the full array dim is always legal),
        otherwise the largest multiple of 8 (<=256) dividing N, falling back to 8 with a
        partial (OOB-clipped) final block.
    tk: the whole contraction dim if the double-buffered x + w blocks fit the budget,
        otherwise the largest multiple of 128 dividing K that does (K = 512*HW is always
        128-aligned, so tk=128 is a guaranteed fallback divisor).
    """
    if N <= 256:
        nb = N
    else:
        nb = 8
        for cand in range(256, 7, -8):
            if N % cand == 0:
                nb = cand
                break

    # bytes per K element across the double-buffered x block and folded-weight block
    per_k_bytes = 2 * 4 * (nb + OUT)
    max_tk = max(128, x_budget_bytes // per_k_bytes)
    if K <= max_tk:
        tk = K
    else:
        tk = 128
        d = 256
        while d <= max_tk:
            if K % d == 0:
                tk = d
            d += 128
    return nb, tk


def emotion_detect_forward(x_nchw, gamma, beta, running_mean, running_var, w, b):
    """x_nchw: (N, 512, H, W).  Returns (N, 3) — EmotionDetectModule.forward (eval BN)."""
    N, Cc, H, W = x_nchw.shape
    assert Cc == C, f"module is hard-wired to 512 channels, got {Cc}"
    hw = H * W
    K = Cc * hw

    # Free metadata reshape of contiguous NCHW -> lane-dense last dim.
    x_flat = x_nchw.reshape(N, K).astype(jnp.float32)

    # Fold BN (eval) + average pool + Linear into one (K, OUT) matrix, in f32 on the host.
    scale = (gamma.astype(jnp.float32) /
             jnp.sqrt(running_var.astype(jnp.float32) + EPS))                 # (C,)
    shift = beta.astype(jnp.float32) - running_mean.astype(jnp.float32) * scale
    w_t = w.T.astype(jnp.float32)                                             # (C, OUT)
    w_fold = (scale[:, None] * w_t) * (1.0 / float(hw))                       # (C, OUT)
    w_exp = jnp.repeat(w_fold, hw, axis=0)                                    # (K, OUT)
    b_fold = (shift @ w_t + b.astype(jnp.float32)).reshape(1, OUT)            # (1, OUT)

    nb, tk = _choose_tiles(N, K)
    grid = (pl.cdiv(N, nb), K // tk)

    return pl.pallas_call(
        _emotion_kernel,
        out_shape=jax.ShapeDtypeStruct((N, OUT), jnp.float32),
        grid_spec=pltpu.PrefetchScalarGridSpec(
            num_scalar_prefetch=0,
            grid=grid,
            in_specs=[
                pl.BlockSpec((nb, tk), lambda n, k: (n, k)),
                pl.BlockSpec((tk, OUT), lambda n, k: (k, 0)),
                pl.BlockSpec((1, OUT), lambda n, k: (0, 0)),
            ],
            out_specs=pl.BlockSpec((nb, OUT), lambda n, k: (n, 0)),
            scratch_shapes=[pltpu.VMEM((nb, OUT), jnp.float32)],
        ),
        compiler_params=pltpu.CompilerParams(
            dimension_semantics=("parallel", "arbitrary"),
            vmem_limit_bytes=32 * 1024 * 1024,
        ),
    )(x_flat, w_exp, b_fold)


def _reference(x_nchw, gamma, beta, running_mean, running_var, w, b):
    xn = (x_nchw - running_mean[None, :, None, None]) / jnp.sqrt(
        running_var[None, :, None, None] + EPS)
    xn = xn * gamma[None, :, None, None] + beta[None, :, None, None]
    pooled = jnp.mean(xn, axis=(2, 3))          # (N, C)
    return pooled @ w.T + b


if __name__ == "__main__":
    key = jax.random.PRNGKey(0)
    k_x, k_g, k_b, k_m, k_v, k_w, k_bias = jax.random.split(key, 7)

    N, H, W = 2, 4, 4
    x = jax.random.normal(k_x, (N, C, H, W), dtype=jnp.float32)

    # Deterministic synthetic parameters (shapes per nn.BatchNorm2d(512) / nn.Linear(512, 3)).
    gamma = 1.0 + 0.1 * jax.random.normal(k_g, (C,), dtype=jnp.float32)
    beta = 0.1 * jax.random.normal(k_b, (C,), dtype=jnp.float32)
    running_mean = 0.1 * jax.random.normal(k_m, (C,), dtype=jnp.float32)
    running_var = jnp.abs(1.0 + 0.1 * jax.random.normal(k_v, (C,), dtype=jnp.float32))
    w = jax.random.normal(k_w, (OUT, C), dtype=jnp.float32) * (1.0 / jnp.sqrt(C))
    b = jax.random.normal(k_bias, (OUT,), dtype=jnp.float32) * 0.01

    out = emotion_detect_forward(x, gamma, beta, running_mean, running_var, w, b)
    out = jax.block_until_ready(out)

    ref = _reference(x, gamma, beta, running_mean, running_var, w, b)
    assert out.shape == (N, OUT)
    assert jnp.allclose(out, ref, atol=2e-4, rtol=2e-4), (out, ref)

    print("KERNEL_OK")
</pallas_src>

<mosaic_0001>
module attributes {stable_mosaic.version = 11 : i64} {
  func.func @_emotion_kernel(%arg0: i32, %arg1: i32, %arg2: memref<2x8192xf32, #tpu.memory_space<vmem>>, %arg3: memref<8192x3xf32, #tpu.memory_space<vmem>>, %arg4: memref<1x3xf32, #tpu.memory_space<vmem>>, %arg5: memref<2x3xf32, #tpu.memory_space<vmem>>, %arg6: memref<2x3xf32, #tpu.memory_space<vmem>>) attributes {dimension_semantics = [#tpu.dimension_semantics<parallel>, #tpu.dimension_semantics<arbitrary>], iteration_bounds = array<i64: 1, 1>, scalar_prefetch = 0 : i64, scratch_operands = 1 : i64, tpu.core_type = #tpu.core_type<tc>, window_params = [{transform_indices = @transform_0, window_bounds = array<i64: 2, 8192>}, {transform_indices = @transform_1, window_bounds = array<i64: 8192, 3>}, {pipeline_mode = #tpu.pipeline_mode<synchronous>, transform_indices = @transform_2, window_bounds = array<i64: 1, 3>}, {transform_indices = @transform_3, window_bounds = array<i64: 2, 3>}]} {
    %c0_i32 = arith.constant 0 : i32
    %0 = arith.cmpi eq, %arg1, %c0_i32 : i32
    %1 = arith.extui %0 : i1 to i32
    %c0_i32_0 = arith.constant 0 : i32
    %2 = arith.cmpi ne, %1, %c0_i32_0 : i32
    scf.if %2 {
      %c0_10 = arith.constant 0 : index
      %c0_11 = arith.constant 0 : index
      %12 = vector.load %arg4[%c0_10, %c0_11] : memref<1x3xf32, #tpu.memory_space<vmem>>, vector<1x3xf32>
      %13 = vector.shape_cast %12 : vector<1x3xf32> to vector<1x3xf32>
      %14 = vector.broadcast %13 : vector<1x3xf32> to vector<2x3xf32>
      %c0_12 = arith.constant 0 : index
      %c0_13 = arith.constant 0 : index
      %15 = vector.load %arg6[%c0_12, %c0_13] : memref<2x3xf32, #tpu.memory_space<vmem>>, vector<2x3xf32>
      tpu.vector_store %arg6[%c0_12, %c0_13], %14 {strides = array<i32>} : memref<2x3xf32, #tpu.memory_space<vmem>>, vector<2x3xf32>,
    } else {
    }
    %c0 = arith.constant 0 : index
    %c0_1 = arith.constant 0 : index
    %3 = vector.load %arg6[%c0, %c0_1] : memref<2x3xf32, #tpu.memory_space<vmem>>, vector<2x3xf32>
    %c0_2 = arith.constant 0 : index
    %c0_3 = arith.constant 0 : index
    %4 = vector.load %arg2[%c0_2, %c0_3] : memref<2x8192xf32, #tpu.memory_space<vmem>>, vector<2x8192xf32>
    %c0_4 = arith.constant 0 : index
    %c0_5 = arith.constant 0 : index
    %5 = vector.load %arg3[%c0_4, %c0_5] : memref<8192x3xf32, #tpu.memory_space<vmem>>, vector<8192x3xf32>
    %cst = arith.constant dense<0.000000e+00> : vector<2x3xf32>
    %6 = tpu.matmul %4, %5, %cst {dimension_numbers = #tpu.dot_dimension_numbers<[1], [0], [0], [1], [0, 0, 1, 1], [], []>} : vector<2x8192xf32>, vector<8192x3xf32>, vector<2x3xf32> -> vector<2x3xf32>
    %7 = arith.addf %3, %6 : vector<2x3xf32>
    %c0_6 = arith.constant 0 : index
    %c0_7 = arith.constant 0 : index
    %8 = vector.load %arg6[%c0_6, %c0_7] : memref<2x3xf32, #tpu.memory_space<vmem>>, vector<2x3xf32>
    tpu.vector_store %arg6[%c0_6, %c0_7], %7 {strides = array<i32>} : memref<2x3xf32, #tpu.memory_space<vmem>>, vector<2x3xf32>,
    %c0_i32_8 = arith.constant 0 : i32
    %9 = arith.cmpi eq, %arg1, %c0_i32_8 : i32
    %10 = arith.extui %9 : i1 to i32
    %c0_i32_9 = arith.constant 0 : i32
    %11 = arith.cmpi ne, %10, %c0_i32_9 : i32
    scf.if %11 {
      %c0_10 = arith.constant 0 : index
      %c0_11 = arith.constant 0 : index
      %12 = vector.load %arg6[%c0_10, %c0_11] : memref<2x3xf32, #tpu.memory_space<vmem>>, vector<2x3xf32>
      %c0_12 = arith.constant 0 : index
      %c0_13 = arith.constant 0 : index
      %13 = vector.load %arg5[%c0_12, %c0_13] : memref<2x3xf32, #tpu.memory_space<vmem>>, vector<2x3xf32>
      tpu.vector_store %arg5[%c0_12, %c0_13], %12 {strides = array<i32>} : memref<2x3xf32, #tpu.memory_space<vmem>>, vector<2x3xf32>,
    } else {
    }
    return
  }
  func.func @transform_0(%arg0: i32, %arg1: i32) -> (i32, i32) {
    %c0_i32 = arith.constant 0 : i32
    return %arg0, %arg1 : i32, i32
  }
  func.func @transform_1(%arg0: i32, %arg1: i32) -> (i32, i32) {
    %c0_i32 = arith.constant 0 : i32
    %c0_i32_0 = arith.constant 0 : i32
    return %arg1, %c0_i32 : i32, i32
  }
  func.func @transform_2(%arg0: i32, %arg1: i32) -> (i32, i32) {
    %c0_i32 = arith.constant 0 : i32
    %c0_i32_0 = arith.constant 0 : i32
    %c0_i32_1 = arith.constant 0 : i32
    return %c0_i32, %c0_i32_0 : i32, i32
  }
  func.func @transform_3(%arg0: i32, %arg1: i32) -> (i32, i32) {
    %c0_i32 = arith.constant 0 : i32
    %c0_i32_0 = arith.constant 0 : i32
    return %arg0, %c0_i32 : i32, i32
  }
}

</mosaic_0001>

<bundles_post_ra>
// kernel: tpu_custom_call.1
= control target key start
LH: loop header
LB: loop body
LE: loop exit
PB: predicated region body
PF: predicated region fallthrough
CT: control target
= control target key end

     0   :  { %v5870_v47 = vmov 1983009808   ;;  %v1089_v49 = vlaneseq  ;;  %s9238_s0 = inlined_call_operand.vmem [shape: f32[2,8192], index: 0, kind: input, shape index: {}]   ;;  %s9239_s1 = inlined_call_operand.vmem [shape: f32[8192,3], index: 1, kind: input, shape index: {}]   ;;  %s9240_s2 = inlined_call_operand.vmem [shape: f32[1,3], index: 2, kind: input, shape index: {}]   ;;  %s9241_s3 = inlined_call_operand.hbm [shape: f32[2,3], index: 3, kind: output, shape index: {}]  }
   0x1   :  { %v61_v0 = vld [vmem:[%s9239_s1 + $0x80] sm:$0xff]  ;;  %v62_v1 = vld [vmem:[%s9239_s1 + $0x88] sm:$0xff]  ;;  %v63_v11 = vld [vmem:[%s9239_s1 + $0x90] sm:$0xff]  ;;  %v1087_v48 = vunpack.c.l.s4 %v5870_v47 }
   0x2   :  { %v93_v2 = vld [vmem:[%s9239_s1 + $0x180] sm:$0xff]  ;;  %v4804_v3 = vpack.c.bf16 %v62_v1, %v61_v0  ;;  %v94_v4 = vld [vmem:[%s9239_s1 + $0x188] sm:$0xff]  ;;  %v64_v13 = vld [vmem:[%s9239_s1 + $0x98] sm:$0xff]  ;;  %v1090_v0 = vshrl.u32 %v1089_v49, 7 }
   0x3   :  { %v45_v5 = vld [vmem:[%s9239_s1] sm:$0xff]  ;;  %v46_v6 = vld [vmem:[%s9239_s1 + $0x8] sm:$0xff]  ;;  %v4836_v7 = vpack.c.bf16 %v94_v4, %v93_v2  ;;  %v95_v14 = vld [vmem:[%s9239_s1 + $0x190] sm:$0xff]  ;;  %v4808_v16 = vpack.c.bf16 %v64_v13, %v63_v11  ;;  %v1088_v63 = vunpack.c.0.s8 %v1087_v48 }
   0x4   :  { %v4806_v8 = vpack.c.bf16 %v46_v6, %v45_v5  ;;  %v77_v9 = vld [vmem:[%s9239_s1 + $0x100] sm:$0xff]  ;;  %v78_v10 = vld [vmem:[%s9239_s1 + $0x108] sm:$0xff]  ;;  %4805 = vmatprep.subr.bf16.mxu0 %v4804_v3  ;;  %v96_v15 = vld [vmem:[%s9239_s1 + $0x198] sm:$0xff] }
   0x5   :  { %v4838_v12 = vpack.c.bf16 %v78_v10, %v77_v9  ;;  %4837 = vmatprep.subr.bf16.mxu1 %v4836_v7  ;;  %v4840_v17 = vpack.c.bf16 %v96_v15, %v95_v14  ;;  %v47_v18 = vld [vmem:[%s9239_s1 + $0x10] sm:$0xff]  ;;  %v48_v19 = vld [vmem:[%s9239_s1 + $0x18] sm:$0xff]  ;;  %v65_v23 = vld [vmem:[%s9239_s1 + $0xa0] sm:$0xff]  ;;  %v6042_v13 = vsub.s32 %v1088_v63, %v1090_v0 }
   0x6   :  { %4807 = vmatpush3.bf16.msra.mxu0 %v4806_v8  ;;  %v79_v20 = vld [vmem:[%s9239_s1 + $0x110] sm:$0xff]  ;;  %v4810_v21 = vpack.c.bf16 %v48_v19, %v47_v18  ;;  %v80_v22 = vld [vmem:[%s9239_s1 + $0x118] sm:$0xff]  ;;  %v66_v24 = vld [vmem:[%s9239_s1 + $0xa8] sm:$0xff] }
   0x7   :  { %4839 = vmatpush3.bf16.msra.mxu1 %v4838_v12  ;;  %4809 = vmatprep.subr.bf16.mxu0 %v4808_v16  ;;  %v4842_v25 = vpack.c.bf16 %v80_v22, %v79_v20  ;;  %v4812_v26 = vpack.c.bf16 %v66_v24, %v65_v23  ;;  %v97_v27 = vld [vmem:[%s9239_s1 + $0x1a0] sm:$0xff]  ;;  %v98_v28 = vld [vmem:[%s9239_s1 + $0x1a8] sm:$0xff]  ;;  %v67_v35 = vld [vmem:[%s9239_s1 + $0xb0] sm:$0xff] }
   0x8   :  { %4841 = vmatprep.subr.bf16.mxu1 %v4840_v17  ;;  %v49_v29 = vld [vmem:[%s9239_s1 + $0x20] sm:$0xff]  ;;  %v4844_v30 = vpack.c.bf16 %v98_v28, %v97_v27  ;;  %v50_v31 = vld [vmem:[%s9239_s1 + $0x28] sm:$0xff]  ;;  %v68_v36 = vld [vmem:[%s9239_s1 + $0xb8] sm:$0xff] }
   0x9   :  { %v81_v32 = vld [vmem:[%s9239_s1 + $0x120] sm:$0xff]  ;;  %v82_v33 = vld [vmem:[%s9239_s1 + $0x128] sm:$0xff]  ;;  %v4814_v34 = vpack.c.bf16 %v50_v31, %v49_v29  ;;  %v99_v37 = vld [vmem:[%s9239_s1 + $0x1b0] sm:$0xff]  ;;  %v4816_v39 = vpack.c.bf16 %v68_v36, %v67_v35 }
   0xa   :  { %4811 = vmatpush3.bf16.msra.mxu0 %v4810_v21  ;;  %v4846_v38 = vpack.c.bf16 %v82_v33, %v81_v32  ;;  %v100_v40 = vld [vmem:[%s9239_s1 + $0x1b8] sm:$0xff]  ;;  %v51_v41 = vld [vmem:[%s9239_s1 + $0x30] sm:$0xff]  ;;  %v69_v46 = vld [vmem:[%s9239_s1 + $0xc0] sm:$0xff] }
   0xb   :  { %4843 = vmatpush3.bf16.msra.mxu1 %v4842_v25  ;;  %4813 = vmatprep.subr.bf16.mxu0 %v4812_v26  ;;  %v52_v42 = vld [vmem:[%s9239_s1 + $0x38] sm:$0xff]  ;;  %v4848_v43 = vpack.c.bf16 %v100_v40, %v99_v37  ;;  %v83_v44 = vld [vmem:[%s9239_s1 + $0x130] sm:$0xff]  ;;  %v70_v50 = vld [vmem:[%s9239_s1 + $0xc8] sm:$0xff] }
   0xc   :  { %4845 = vmatprep.subr.bf16.mxu1 %v4844_v30  ;;  %v84_v45 = vld [vmem:[%s9239_s1 + $0x138] sm:$0xff]  ;;  %v101_v51 = vld [vmem:[%s9239_s1 + $0x1c0] sm:$0xff]  ;;  %v102_v52 = vld [vmem:[%s9239_s1 + $0x1c8] sm:$0xff]  ;;  %v4818_v53 = vpack.c.bf16 %v52_v42, %v51_v41  ;;  %v4820_v55 = vpack.c.bf16 %v70_v50, %v69_v46 }
   0xd   :  { %v4850_v54 = vpack.c.bf16 %v84_v45, %v83_v44  ;;  %v53_v56 = vld [vmem:[%s9239_s1 + $0x40] sm:$0xff]  ;;  %v54_v57 = vld [vmem:[%s9239_s1 + $0x48] sm:$0xff]  ;;  %v4852_v59 = vpack.c.bf16 %v102_v52, %v101_v51  ;;  %v71_v61 = vld [vmem:[%s9239_s1 + $0xd0] sm:$0xff] }
   0xe   :  { %4815 = vmatpush3.bf16.msra.mxu0 %v4814_v34  ;;  %v85_v58 = vld [vmem:[%s9239_s1 + $0x140] sm:$0xff]  ;;  %v86_v60 = vld [vmem:[%s9239_s1 + $0x148] sm:$0xff]  ;;  %v72_v62 = vld [vmem:[%s9239_s1 + $0xd8] sm:$0xff]  ;;  %v4822_v3 = vpack.c.bf16 %v54_v57, %v53_v56 }
   0xf   :  { %4847 = vmatpush3.bf16.msra.mxu1 %v4846_v38  ;;  %4817 = vmatprep.subr.bf16.mxu0 %v4816_v39  ;;  %v103_v1 = vld [vmem:[%s9239_s1 + $0x1d0] sm:$0xff]  ;;  %v104_v2 = vld [vmem:[%s9239_s1 + $0x1d8] sm:$0xff]  ;;  %v4854_v4 = vpack.c.bf16 %v86_v60, %v85_v58  ;;  %v4824_v5 = vpack.c.bf16 %v72_v62, %v71_v61  ;;  %v73_v11 = vld [vmem:[%s9239_s1 + $0xe0] sm:$0xff] }
  0x10   :  { %4849 = vmatprep.subr.bf16.mxu1 %v4848_v43  ;;  %v55_v6 = vld [vmem:[%s9239_s1 + $0x50] sm:$0xff]  ;;  %v56_v7 = vld [vmem:[%s9239_s1 + $0x58] sm:$0xff]  ;;  %v4856_v9 = vpack.c.bf16 %v104_v2, %v103_v1  ;;  %v74_v12 = vld [vmem:[%s9239_s1 + $0xe8] sm:$0xff] }
  0x11   :  { %v87_v8 = vld [vmem:[%s9239_s1 + $0x150] sm:$0xff]  ;;  %v88_v10 = vld [vmem:[%s9239_s1 + $0x158] sm:$0xff]  ;;  %v105_v14 = vld [vmem:[%s9239_s1 + $0x1e0] sm:$0xff]  ;;  %v4826_v16 = vpack.c.bf16 %v56_v7, %v55_v6  ;;  %v4828_v19 = vpack.c.bf16 %v74_v12, %v73_v11 }
  0x12   :  { %4819 = vmatpush3.bf16.msra.mxu0 %v4818_v53  ;;  %v106_v15 = vld [vmem:[%s9239_s1 + $0x1e8] sm:$0xff]  ;;  %v57_v17 = vld [vmem:[%s9239_s1 + $0x60] sm:$0xff]  ;;  %v4858_v18 = vpack.c.bf16 %v88_v10, %v87_v8  ;;  %v75_v25 = vld [vmem:[%s9239_s1 + $0xf0] sm:$0xff] }
  0x13   :  { %4851 = vmatpush3.bf16.msra.mxu1 %v4850_v54  ;;  %4821 = vmatprep.subr.bf16.mxu0 %v4820_v55  ;;  %v58_v20 = vld [vmem:[%s9239_s1 + $0x68] sm:$0xff]  ;;  %v89_v21 = vld [vmem:[%s9239_s1 + $0x160] sm:$0xff]  ;;  %v4860_v23 = vpack.c.bf16 %v106_v15, %v105_v14  ;;  %v76_v26 = vld [vmem:[%s9239_s1 + $0xf8] sm:$0xff] }
  0x14   :  { %4853 = vmatprep.subr.bf16.mxu1 %v4852_v59  ;;  %v29_v22 = vld [vmem:[%s9238_s0] sm:$0xff]  ;;  %v90_v24 = vld [vmem:[%s9239_s1 + $0x168] sm:$0xff]  ;;  %v107_v29 = vld [vmem:[%s9239_s1 + $0x1f0] sm:$0xff]  ;;  %v4830_v31 = vpack.c.bf16 %v58_v20, %v57_v17  ;;  %v4832_v35 = vpack.c.bf16 %v76_v26, %v75_v25 }
  0x15   :  { %v1092_v27 = vrot.slane %v29_v22, %v6042_v13  ;;  %v1085_v28 = vcombine.high %v29_v22, %v29_v22  ;;  %v108_v30 = vld [vmem:[%s9239_s1 + $0x1f8] sm:$0xff]  ;;  %v4862_v34 = vpack.c.bf16 %v90_v24, %v89_v21  ;;  %v59_v36 = vld [vmem:[%s9239_s1 + $0x70] sm:$0xff]  ;;  %v125_v42 = vld [vmem:[%s9239_s1 + $0x280] sm:$0xff] }
  0x16   :  { %4823 = vmatpush3.bf16.msra.mxu0 %v4822_v3  ;;  %v60_v37 = vld [vmem:[%s9239_s1 + $0x78] sm:$0xff]  ;;  %v91_v38 = vld [vmem:[%s9239_s1 + $0x170] sm:$0xff]  ;;  %v4864_v39 = vpack.c.bf16 %v108_v30, %v107_v29  ;;  %v126_v43 = vld [vmem:[%s9239_s1 + $0x288] sm:$0xff] }
  0x17   :  { %4855 = vmatpush3.bf16.msra.mxu1 %v4854_v4  ;;  %4825 = vmatprep.subr.bf16.mxu0 %v4824_v5  ;;  %v1100_v32 = vcombine.high %v1092_v27, %v1092_v27  ;;  %v1099_v33 = vrot.slane %v1085_v28, %v6042_v13  ;;  %v92_v40 = vld [vmem:[%s9239_s1 + $0x178] sm:$0xff]  ;;  %v157_v44 = vld [vmem:[%s9239_s1 + $0x380] sm:$0xff]  ;;  %v158_v45 = vld [vmem:[%s9239_s1 + $0x388] sm:$0xff]  ;;  %v4834_v46 = vpack.c.bf16 %v60_v37, %v59_v36 }
  0x18   :  { %4857 = vmatprep.subr.bf16.mxu1 %v4856_v9  ;;  %v4866_v47 = vpack.c.bf16 %v92_v40, %v91_v38  ;;  %v4868_v48 = vpack.c.bf16 %v126_v43, %v125_v42  ;;  %v109_v49 = vld [vmem:[%s9239_s1 + $0x200] sm:$0xff]  ;;  %v110_v50 = vld [vmem:[%s9239_s1 + $0x208] sm:$0xff]  ;;  %v4900_v52 = vpack.c.bf16 %v158_v45, %v157_v44  ;;  %v127_v54 = vld [vmem:[%s9239_s1 + $0x290] sm:$0xff] }
  0x19   :  { %1485 = vmatprep.mubr.f32.mxu0 %v1100_v32  ;;  %v1101_v41 = vcombine.high %v1099_v33, %v1099_v33  ;;  %v141_v51 = vld [vmem:[%s9239_s1 + $0x300] sm:$0xff]  ;;  %v142_v53 = vld [vmem:[%s9239_s1 + $0x308] sm:$0xff]  ;;  %v128_v55 = vld [vmem:[%s9239_s1 + $0x298] sm:$0xff]  ;;  %v4870_v58 = vpack.c.bf16 %v110_v50, %v109_v49 }
  0x1a   :  { %4827 = vmatpush3.bf16.msra.mxu0 %v4826_v16  ;;  %v159_v56 = vld [vmem:[%s9239_s1 + $0x390] sm:$0xff]  ;;  %v160_v57 = vld [vmem:[%s9239_s1 + $0x398] sm:$0xff]  ;;  %v4902_v59 = vpack.c.bf16 %v142_v53, %v141_v51  ;;  %v4872_v60 = vpack.c.bf16 %v128_v55, %v127_v54  ;;  %v129_v2 = vld [vmem:[%s9239_s1 + $0x2a0] sm:$0xff] }
  0x1b   :  { %4859 = vmatpush3.bf16.msra.mxu1 %v4858_v18  ;;  %4829 = vmatprep.subr.bf16.mxu0 %v4828_v19  ;;  %v111_v61 = vld [vmem:[%s9239_s1 + $0x210] sm:$0xff]  ;;  %v112_v62 = vld [vmem:[%s9239_s1 + $0x218] sm:$0xff]  ;;  %v4904_v0 = vpack.c.bf16 %v160_v57, %v159_v56  ;;  %v130_v3 = vld [vmem:[%s9239_s1 + $0x2a8] sm:$0xff] }
  0x1c   :  { %4861 = vmatprep.subr.bf16.mxu1 %v4860_v23  ;;  %1555 = vmatprep.mubr.f32.mxu1 %v1101_v41  ;;  %v143_v63 = vld [vmem:[%s9239_s1 + $0x310] sm:$0xff]  ;;  %v144_v1 = vld [vmem:[%s9239_s1 + $0x318] sm:$0xff]  ;;  %v161_v4 = vld [vmem:[%s9239_s1 + $0x3a0] sm:$0xff]  ;;  %v4874_v6 = vpack.c.bf16 %v112_v62, %v111_v61  ;;  %v4876_v8 = vpack.c.bf16 %v130_v3, %v129_v2 }
  0x1d   :  { %v162_v5 = vld [vmem:[%s9239_s1 + $0x3a8] sm:$0xff]  ;;  %v4906_v7 = vpack.c.bf16 %v144_v1, %v143_v63  ;;  %v113_v9 = vld [vmem:[%s9239_s1 + $0x220] sm:$0xff]  ;;  %v131_v15 = vld [vmem:[%s9239_s1 + $0x2b0] sm:$0xff] }
  0x1e   :  { %4831 = vmatpush3.bf16.msra.mxu0 %v4830_v31  ;;  %v114_v10 = vld [vmem:[%s9239_s1 + $0x228] sm:$0xff]  ;;  %v145_v11 = vld [vmem:[%s9239_s1 + $0x320] sm:$0xff]  ;;  %v4908_v12 = vpack.c.bf16 %v162_v5, %v161_v4  ;;  %v132_v16 = vld [vmem:[%s9239_s1 + $0x2b8] sm:$0xff] }
  0x1f   :  { %4863 = vmatpush3.bf16.msra.mxu1 %v4862_v34  ;;  %4833 = vmatprep.subr.bf16.mxu0 %v4832_v35  ;;  %v146_v14 = vld [vmem:[%s9239_s1 + $0x328] sm:$0xff]  ;;  %v163_v17 = vld [vmem:[%s9239_s1 + $0x3b0] sm:$0xff]  ;;  %v164_v18 = vld [vmem:[%s9239_s1 + $0x3b8] sm:$0xff]  ;;  %v4878_v19 = vpack.c.bf16 %v114_v10, %v113_v9  ;;  %v4880_v21 = vpack.c.bf16 %v132_v16, %v131_v15 }
  0x20   :  { %4865 = vmatprep.subr.bf16.mxu1 %v4864_v39  ;;  %v4910_v20 = vpack.c.bf16 %v146_v14, %v145_v11  ;;  %v115_v22 = vld [vmem:[%s9239_s1 + $0x230] sm:$0xff]  ;;  %v116_v23 = vld [vmem:[%s9239_s1 + $0x238] sm:$0xff]  ;;  %v4912_v25 = vpack.c.bf16 %v164_v18, %v163_v17  ;;  %v134_v28 = vld [vmem:[%s9239_s1 + $0x2c8] sm:$0xff] }
  0x21   :  { %v147_v24 = vld [vmem:[%s9239_s1 + $0x330] sm:$0xff]  ;;  %v148_v26 = vld [vmem:[%s9239_s1 + $0x338] sm:$0xff]  ;;  %v165_v29 = vld [vmem:[%s9239_s1 + $0x3c0] sm:$0xff]  ;;  %v4882_v32 = vpack.c.bf16 %v116_v23, %v115_v22 }
  0x22   :  { %4835 = vmatpush3.bf16.msra.mxu0 %v4834_v46  ;;  %v166_v30 = vld [vmem:[%s9239_s1 + $0x3c8] sm:$0xff]  ;;  %v4914_v35 = vpack.c.bf16 %v148_v26, %v147_v24  ;;  %v117_v37 = vld [vmem:[%s9239_s1 + $0x240] sm:$0xff]  ;;  %v135_v42 = vld [vmem:[%s9239_s1 + $0x2d0] sm:$0xff] }
  0x23   :  { %4867 = vmatpush3.bf16.msra.mxu1 %v4866_v47  ;;  %4869 = vmatprep.subr.bf16.mxu0 %v4868_v48  ;;  %v30_v31 = vld [vmem:[%s9238_s0 + $0x8] sm:$0xff]  ;;  %v149_v39 = vld [vmem:[%s9239_s1 + $0x340] sm:$0xff]  ;;  %v4916_v40 = vpack.c.bf16 %v166_v30, %v165_v29  ;;  %v136_v43 = vld [vmem:[%s9239_s1 + $0x2d8] sm:$0xff] }
  0x24   :  { %4901 = vmatprep.subr.bf16.mxu1 %v4900_v52  ;;  %v1102_v34 = vcombine.high %v30_v31, %v30_v31  ;;  %v118_v38 = vld [vmem:[%s9239_s1 + $0x248] sm:$0xff]  ;;  %v167_v46 = vld [vmem:[%s9239_s1 + $0x3d0] sm:$0xff]  ;;  %v168_v47 = vld [vmem:[%s9239_s1 + $0x3d8] sm:$0xff]  ;;  %v4888_v51 = vpack.c.bf16 %v136_v43, %v135_v42 }
  0x25   :  { %1486 = vmatmul.mubr.f32.vlgmr.msra.gmra.mrb[0].mxu0 %v1092_v27  ;;  %v133_v27 = vld [vmem:[%s9239_s1 + $0x2c0] sm:$0xff]  ;;  %v150_v41 = vld [vmem:[%s9239_s1 + $0x348] sm:$0xff]  ;;  %v4886_v48 = vpack.c.bf16 %v118_v38, %v117_v37  ;;  %v119_v52 = vld [vmem:[%s9239_s1 + $0x250] sm:$0xff]  ;;  %v4920_v55 = vpack.c.bf16 %v168_v47, %v167_v46 }
  0x26   :  { %1556 = vmatmul.mubr.f32.vlgmr.msra.gmra.mrb[0].mxu1 %v1099_v33  ;;  %4871 = vmatpush3.bf16.msra.mxu0 %v4870_v58  ;;  %v6203_v33 = vrot.slane %v30_v31, %v6042_v13  ;;  %v4884_v36 = vpack.c.bf16 %v134_v28, %v133_v27  ;;  %v6226_v45 = vrot.slane %v1102_v34, %v6042_v13  ;;  %v120_v53 = vld [vmem:[%s9239_s1 + $0x258] sm:$0xff]  ;;  %v151_v54 = vld [vmem:[%s9239_s1 + $0x350] sm:$0xff]  ;;  %v137_v57 = vld [vmem:[%s9239_s1 + $0x2e0] sm:$0xff] }
  0x27   :  { %4903 = vmatpush3.bf16.msra.mxu1 %v4902_v59  ;;  %4873 = vmatprep.subr.bf16.mxu0 %v4872_v60  ;;  %v4918_v50 = vpack.c.bf16 %v150_v41, %v149_v39  ;;  %v152_v56 = vld [vmem:[%s9239_s1 + $0x358] sm:$0xff]  ;;  %v138_v58 = vld [vmem:[%s9239_s1 + $0x2e8] sm:$0xff]  ;;  %v169_v59 = vld [vmem:[%s9239_s1 + $0x3e0] sm:$0xff]  ;;  %v4890_v61 = vpack.c.bf16 %v120_v53, %v119_v52 }
  0x28   :  { %4905 = vmatprep.subr.bf16.mxu1 %v4904_v0  ;;  %v1117_v44 = vcombine.high %v6203_v33, %v6203_v33  ;;  %v1118_v49 = vcombine.high %v6226_v45, %v6226_v45  ;;  %v170_v60 = vld [vmem:[%s9239_s1 + $0x3e8] sm:$0xff]  ;;  %v4922_v62 = vpack.c.bf16 %v152_v56, %v151_v54  ;;  %v4892_v63 = vpack.c.bf16 %v138_v58, %v137_v57  ;;  %v121_v0 = vld [vmem:[%s9239_s1 + $0x260] sm:$0xff]  ;;  %v139_v5 = vld [vmem:[%s9239_s1 + $0x2f0] sm:$0xff] }
  0x29   :  { %v122_v1 = vld [vmem:[%s9239_s1 + $0x268] sm:$0xff]  ;;  %v153_v2 = vld [vmem:[%s9239_s1 + $0x360] sm:$0xff]  ;;  %v4924_v3 = vpack.c.bf16 %v170_v60, %v169_v59  ;;  %v124_v14 = vld [vmem:[%s9239_s1 + $0x278] sm:$0xff] }
  0x2a   :  { %4875 = vmatpush3.bf16.msra.mxu0 %v4874_v6  ;;  %1625 = vmatprep.mubr.f32.mxu0 %v1117_v44  ;;  %v154_v4 = vld [vmem:[%s9239_s1 + $0x368] sm:$0xff]  ;;  %v140_v6 = vld [vmem:[%s9239_s1 + $0x2f8] sm:$0xff]  ;;  %v4894_v9 = vpack.c.bf16 %v122_v1, %v121_v0  ;;  %v155_v15 = vld [vmem:[%s9239_s1 + $0x370] sm:$0xff] }
  0x2b   :  { %4907 = vmatpush3.bf16.msra.mxu1 %v4906_v7  ;;  %4877 = vmatprep.subr.bf16.mxu0 %v4876_v8  ;;  %v171_v7 = vld [vmem:[%s9239_s1 + $0x3f0] sm:$0xff]  ;;  %v172_v8 = vld [vmem:[%s9239_s1 + $0x3f8] sm:$0xff]  ;;  %v4926_v10 = vpack.c.bf16 %v154_v4, %v153_v2  ;;  %v4896_v11 = vpack.c.bf16 %v140_v6, %v139_v5  ;;  %v189_v18 = vld [vmem:[%s9239_s1 + $0x480] sm:$0xff] }
  0x2c   :  { %4909 = vmatprep.subr.bf16.mxu1 %v4908_v12  ;;  %1695 = vmatprep.mubr.f32.mxu1 %v1118_v49  ;;  %v123_v12 = vld [vmem:[%s9239_s1 + $0x270] sm:$0xff]  ;;  %v4928_v16 = vpack.c.bf16 %v172_v8, %v171_v7  ;;  %v156_v17 = vld [vmem:[%s9239_s1 + $0x378] sm:$0xff]  ;;  %v173_v23 = vld [vmem:[%s9239_s1 + $0x400] sm:$0xff] }
  0x2d   :  { %v4898_v22 = vpack.c.bf16 %v124_v14, %v123_v12  ;;  %v4930_v24 = vpack.c.bf16 %v156_v17, %v155_v15  ;;  %v174_v26 = vld [vmem:[%s9239_s1 + $0x408] sm:$0xff]  ;;  %v205_v27 = vld [vmem:[%s9239_s1 + $0x500] sm:$0xff]  ;;  %v191_v30 = vld [vmem:[%s9239_s1 + $0x490] sm:$0xff] }
  0x2e   :  { %4879 = vmatpush3.bf16.msra.mxu0 %v4878_v19  ;;  %v190_v19 = vld [vmem:[%s9239_s1 + $0x488] sm:$0xff]  ;;  %v192_v31 = vld [vmem:[%s9239_s1 + $0x498] sm:$0xff]  ;;  %v31_v37 = vld [vmem:[%s9238_s0 + $0x10] sm:$0xff] }
  0x2f   :  { %4911 = vmatpush3.bf16.msra.mxu1 %v4910_v20  ;;  %4881 = vmatprep.subr.bf16.mxu0 %v4880_v21  ;;  %v221_v20 = vld [vmem:[%s9239_s1 + $0x580] sm:$0xff]  ;;  %v222_v21 = vld [vmem:[%s9239_s1 + $0x588] sm:$0xff]  ;;  %v224_v34 = vld [vmem:[%s9239_s1 + $0x598] sm:$0xff]  ;;  %v4936_v38 = vpack.c.bf16 %v192_v31, %v191_v30  ;;  %v6345_v42 = vrot.slane %v31_v37, %v6042_v13  ;;  %v1119_v43 = vcombine.high %v31_v37, %v31_v37 }
  0x30   :  { %4913 = vmatprep.subr.bf16.mxu1 %v4912_v25  ;;  %v4932_v25 = vpack.c.bf16 %v190_v19, %v189_v18  ;;  %v206_v28 = vld [vmem:[%s9239_s1 + $0x508] sm:$0xff]  ;;  %v4964_v29 = vpack.c.bf16 %v222_v21, %v221_v20  ;;  %v175_v39 = vld [vmem:[%s9239_s1 + $0x410] sm:$0xff]  ;;  %v208_v46 = vld [vmem:[%s9239_s1 + $0x518] sm:$0xff] }
  0x31   :  { %v207_v41 = vld [vmem:[%s9239_s1 + $0x510] sm:$0xff]  ;;  %v193_v47 = vld [vmem:[%s9239_s1 + $0x4a0] sm:$0xff]  ;;  %v6366_v52 = vrot.slane %v1119_v43, %v6042_v13  ;;  %v178_v56 = vld [vmem:[%s9239_s1 + $0x428] sm:$0xff] }
  0x32   :  { %4883 = vmatpush3.bf16.msra.mxu0 %v4882_v32  ;;  %v223_v32 = vld [vmem:[%s9239_s1 + $0x590] sm:$0xff]  ;;  %v225_v49 = vld [vmem:[%s9239_s1 + $0x5a0] sm:$0xff]  ;;  %v210_v59 = vld [vmem:[%s9239_s1 + $0x528] sm:$0xff] }
  0x33   :  { %4915 = vmatpush3.bf16.msra.mxu1 %v4914_v35  ;;  %4885 = vmatprep.subr.bf16.mxu0 %v4884_v36  ;;  %v4934_v35 = vpack.c.bf16 %v174_v26, %v173_v23  ;;  %v4966_v36 = vpack.c.bf16 %v206_v28, %v205_v27  ;;  %v4968_v44 = vpack.c.bf16 %v224_v34, %v223_v32  ;;  %v209_v57 = vld [vmem:[%s9239_s1 + $0x520] sm:$0xff]  ;;  %v195_v60 = vld [vmem:[%s9239_s1 + $0x4b0] sm:$0xff]  ;;  %v180_v4 = vld [vmem:[%s9239_s1 + $0x438] sm:$0xff] }
  0x34   :  { %4917 = vmatprep.subr.bf16.mxu1 %v4916_v40  ;;  %v176_v40 = vld [vmem:[%s9239_s1 + $0x418] sm:$0xff]  ;;  %v4974_v1 = vpack.c.bf16 %v210_v59, %v209_v57  ;;  %v211_v5 = vld [vmem:[%s9239_s1 + $0x530] sm:$0xff]  ;;  %v197_v8 = vld [vmem:[%s9239_s1 + $0x4c0] sm:$0xff] }
  0x35   :  { %v4938_v53 = vpack.c.bf16 %v176_v40, %v175_v39  ;;  %v212_v7 = vld [vmem:[%s9239_s1 + $0x538] sm:$0xff]  ;;  %v182_v17 = vld [vmem:[%s9239_s1 + $0x448] sm:$0xff]  ;;  %v213_v18 = vld [vmem:[%s9239_s1 + $0x540] sm:$0xff] }
  0x36   :  { %4887 = vmatpush3.bf16.msra.mxu0 %v4886_v48  ;;  %v194_v48 = vld [vmem:[%s9239_s1 + $0x4a8] sm:$0xff]  ;;  %v4978_v14 = vpack.c.bf16 %v212_v7, %v211_v5  ;;  %v199_v21 = vld [vmem:[%s9239_s1 + $0x4d0] sm:$0xff]  ;;  %v216_v32 = vld [vmem:[%s9239_s1 + $0x558] sm:$0xff] }
  0x37   :  { %4919 = vmatpush3.bf16.msra.mxu1 %v4918_v50  ;;  %4889 = vmatprep.subr.bf16.mxu0 %v4888_v51  ;;  %v226_v50 = vld [vmem:[%s9239_s1 + $0x5a8] sm:$0xff]  ;;  %v1134_v51 = vcombine.high %v6345_v42, %v6345_v42  ;;  %v4940_v54 = vpack.c.bf16 %v194_v48, %v193_v47  ;;  %v231_v23 = vld [vmem:[%s9239_s1 + $0x5d0] sm:$0xff]  ;;  %v201_v34 = vld [vmem:[%s9239_s1 + $0x4e0] sm:$0xff] }
  0x38   :  { %4921 = vmatprep.subr.bf16.mxu1 %v4920_v55  ;;  %v177_v55 = vld [vmem:[%s9239_s1 + $0x420] sm:$0xff]  ;;  %v4972_v58 = vpack.c.bf16 %v226_v50, %v225_v49  ;;  %v214_v20 = vld [vmem:[%s9239_s1 + $0x548] sm:$0xff]  ;;  %v183_v28 = vld [vmem:[%s9239_s1 + $0x450] sm:$0xff] }
  0x39   :  { %v4942_v0 = vpack.c.bf16 %v178_v56, %v177_v55  ;;  %v4982_v26 = vpack.c.bf16 %v214_v20, %v213_v18  ;;  %v215_v30 = vld [vmem:[%s9239_s1 + $0x550] sm:$0xff]  ;;  %v234_v37 = vld [vmem:[%s9239_s1 + $0x5e8] sm:$0xff]  ;;  %v204_v49 = vld [vmem:[%s9239_s1 + $0x4f8] sm:$0xff] }
  0x3a   :  { %4891 = vmatpush3.bf16.msra.mxu0 %v4890_v61  ;;  %v196_v61 = vld [vmem:[%s9239_s1 + $0x4b8] sm:$0xff]  ;;  %v4986_v39 = vpack.c.bf16 %v216_v32, %v215_v30  ;;  %v186_v43 = vld [vmem:[%s9239_s1 + $0x468] sm:$0xff]  ;;  %v203_v48 = vld [vmem:[%s9239_s1 + $0x4f0] sm:$0xff] }
  0x3b   :  { %4923 = vmatpush3.bf16.msra.mxu1 %v4922_v62  ;;  %4893 = vmatprep.subr.bf16.mxu0 %v4892_v63  ;;  %v227_v62 = vld [vmem:[%s9239_s1 + $0x5b0] sm:$0xff]  ;;  %v228_v63 = vld [vmem:[%s9239_s1 + $0x5b8] sm:$0xff]  ;;  %v4944_v2 = vpack.c.bf16 %v196_v61, %v195_v60  ;;  %v218_v47 = vld [vmem:[%s9239_s1 + $0x568] sm:$0xff]  ;;  %v4960_v55 = vpack.c.bf16 %v204_v49, %v203_v48 }
  0x3c   :  { %4925 = vmatprep.subr.bf16.mxu1 %v4924_v3  ;;  %v179_v3 = vld [vmem:[%s9239_s1 + $0x430] sm:$0xff]  ;;  %v4976_v6 = vpack.c.bf16 %v228_v63, %v227_v62  ;;  %v188_v57 = vld [vmem:[%s9239_s1 + $0x478] sm:$0xff]  ;;  %v253_v60 = vld [vmem:[%s9239_s1 + $0x680] sm:$0xff] }
  0x3d   :  { %v4946_v12 = vpack.c.bf16 %v180_v4, %v179_v3  ;;  %v235_v50 = vld [vmem:[%s9239_s1 + $0x5f0] sm:$0xff]  ;;  %v220_v59 = vld [vmem:[%s9239_s1 + $0x578] sm:$0xff]  ;;  %v254_v61 = vld [vmem:[%s9239_s1 + $0x688] sm:$0xff] }
  0x3e   :  { %4895 = vmatpush3.bf16.msra.mxu0 %v4894_v9  ;;  %v198_v9 = vld [vmem:[%s9239_s1 + $0x4c8] sm:$0xff]  ;;  %v187_v56 = vld [vmem:[%s9239_s1 + $0x470] sm:$0xff]  ;;  %v285_v62 = vld [vmem:[%s9239_s1 + $0x780] sm:$0xff]  ;;  %v4996_v3 = vpack.c.bf16 %v254_v61, %v253_v60 }
  0x3f   :  { %4927 = vmatpush3.bf16.msra.mxu1 %v4926_v10  ;;  %4897 = vmatprep.subr.bf16.mxu0 %v4896_v11  ;;  %v229_v10 = vld [vmem:[%s9239_s1 + $0x5c0] sm:$0xff]  ;;  %v230_v11 = vld [vmem:[%s9239_s1 + $0x5c8] sm:$0xff]  ;;  %v4948_v15 = vpack.c.bf16 %v198_v9, %v197_v8  ;;  %v255_v9 = vld [vmem:[%s9239_s1 + $0x690] sm:$0xff] }
  0x40   :  { %4929 = vmatprep.subr.bf16.mxu1 %v4928_v16  ;;  %v181_v16 = vld [vmem:[%s9239_s1 + $0x440] sm:$0xff]  ;;  %v4980_v19 = vpack.c.bf16 %v230_v11, %v229_v10  ;;  %v286_v63 = vld [vmem:[%s9239_s1 + $0x788] sm:$0xff]  ;;  %v256_v10 = vld [vmem:[%s9239_s1 + $0x698] sm:$0xff] }
  0x41   :  { %v237_v4 = vld [vmem:[%s9239_s1 + $0x600] sm:$0xff]  ;;  %v238_v5 = vld [vmem:[%s9239_s1 + $0x608] sm:$0xff]  ;;  %v5028_v7 = vpack.c.bf16 %v286_v63, %v285_v62  ;;  %v5000_v18 = vpack.c.bf16 %v256_v10, %v255_v9  ;;  %v240_v20 = vld [vmem:[%s9239_s1 + $0x618] sm:$0xff] }
  0x42   :  { %4899 = vmatpush3.bf16.msra.mxu0 %v4898_v22  ;;  %v200_v22 = vld [vmem:[%s9239_s1 + $0x4d8] sm:$0xff]  ;;  %v270_v8 = vld [vmem:[%s9239_s1 + $0x708] sm:$0xff]  ;;  %v275_v48 = vld [vmem:[%s9239_s1 + $0x730] sm:$0xff] }
  0x43   :  { %4931 = vmatpush3.bf16.msra.mxu1 %v4930_v24  ;;  %4933 = vmatprep.subr.bf16.mxu0 %v4932_v25  ;;  %v232_v24 = vld [vmem:[%s9239_s1 + $0x5d8] sm:$0xff]  ;;  %v4950_v25 = vpack.c.bf16 %v182_v17, %v181_v16  ;;  %v4952_v27 = vpack.c.bf16 %v200_v22, %v199_v21  ;;  %v4998_v16 = vpack.c.bf16 %v238_v5, %v237_v4  ;;  %v271_v21 = vld [vmem:[%s9239_s1 + $0x710] sm:$0xff]  ;;  %v278_v61 = vld [vmem:[%s9239_s1 + $0x748] sm:$0xff] }
  0x44   :  { %4965 = vmatprep.subr.bf16.mxu1 %v4964_v29  ;;  %v184_v29 = vld [vmem:[%s9239_s1 + $0x458] sm:$0xff]  ;;  %v4984_v31 = vpack.c.bf16 %v232_v24, %v231_v23  ;;  %v257_v24 = vld [vmem:[%s9239_s1 + $0x6a0] sm:$0xff]  ;;  %v263_v62 = vld [vmem:[%s9239_s1 + $0x6d0] sm:$0xff] }
  0x45   :  { %1626 = vmatmul.mubr.f32.vlgmr.msra.gmra.mrb[2].mxu0 %v6203_v33  ;;  %v4970_v33 = vpack.c.bf16 %v208_v46, %v207_v41  ;;  %v185_v41 = vld [vmem:[%s9239_s1 + $0x460] sm:$0xff]  ;;  %v272_v23 = vld [vmem:[%s9239_s1 + $0x718] sm:$0xff]  ;;  %v247_v5 = vld [vmem:[%s9239_s1 + $0x650] sm:$0xff] }
  0x46   :  { %4935 = vmatpush3.bf16.msra.mxu0 %v4934_v35  ;;  %1696 = vmatmul.mubr.f32.vlgmr.msra.gmra.mrb[2].mxu1 %v6226_v45  ;;  %v1135_v45 = vcombine.high %v6366_v52, %v6366_v52  ;;  %v202_v35 = vld [vmem:[%s9239_s1 + $0x4e8] sm:$0xff]  ;;  %v264_v63 = vld [vmem:[%s9239_s1 + $0x6d8] sm:$0xff]  ;;  %v265_v10 = vld [vmem:[%s9239_s1 + $0x6e0] sm:$0xff] }
  0x47   :  { %4967 = vmatpush3.bf16.msra.mxu1 %v4966_v36  ;;  %4937 = vmatprep.subr.bf16.mxu0 %v4936_v38  ;;  %v233_v36 = vld [vmem:[%s9239_s1 + $0x5e0] sm:$0xff]  ;;  %v4954_v38 = vpack.c.bf16 %v184_v29, %v183_v28  ;;  %v4956_v40 = vpack.c.bf16 %v202_v35, %v201_v34  ;;  %v290_v28 = vld [vmem:[%s9239_s1 + $0x7a8] sm:$0xff]  ;;  %v5016_v4 = vpack.c.bf16 %v264_v63, %v263_v62  ;;  %v280_v9 = vld [vmem:[%s9239_s1 + $0x758] sm:$0xff] }
  0x48   :  { %4969 = vmatprep.subr.bf16.mxu1 %v4968_v44  ;;  %1765 = vmatprep.mubr.f32.mxu0 %v1134_v51  ;;  %v217_v44 = vld [vmem:[%s9239_s1 + $0x560] sm:$0xff]  ;;  %v4988_v46 = vpack.c.bf16 %v234_v37, %v233_v36  ;;  %v236_v51 = vld [vmem:[%s9239_s1 + $0x5f8] sm:$0xff]  ;;  %v242_v34 = vld [vmem:[%s9239_s1 + $0x628] sm:$0xff] }
  0x49   :  { %1835 = vmatprep.mubr.f32.mxu1 %v1135_v45  ;;  %v219_v45 = vld [vmem:[%s9239_s1 + $0x570] sm:$0xff]  ;;  %v273_v35 = vld [vmem:[%s9239_s1 + $0x720] sm:$0xff] }
  0x4a   :  { %4939 = vmatpush3.bf16.msra.mxu0 %v4938_v53  ;;  %v4958_v53 = vpack.c.bf16 %v186_v43, %v185_v41  ;;  %v259_v37 = vld [vmem:[%s9239_s1 + $0x6b0] sm:$0xff] }
  0x4b   :  { %4971 = vmatpush3.bf16.msra.mxu1 %v4970_v33  ;;  %4941 = vmatprep.subr.bf16.mxu0 %v4940_v54  ;;  %v32_v33 = vld [vmem:[%s9238_s0 + $0x18] sm:$0xff]  ;;  %v4990_v54 = vpack.c.bf16 %v218_v47, %v217_v44  ;;  %v335_v62 = vld [vmem:[%s9239_s1 + $0x910] sm:$0xff] }
  0x4c   :  { %4973 = vmatprep.subr.bf16.mxu1 %v4972_v58  ;;  %v4992_v58 = vpack.c.bf16 %v236_v51, %v235_v50  ;;  %v6537_v11 = vrot.slane %v32_v33, %v6042_v13  ;;  %v244_v47 = vld [vmem:[%s9239_s1 + $0x638] sm:$0xff]  ;;  %v261_v51 = vld [vmem:[%s9239_s1 + $0x6c0] sm:$0xff] }
  0x4d   :  { %v276_v50 = vld [vmem:[%s9239_s1 + $0x738] sm:$0xff] }
  0x4e   :  { %4943 = vmatpush3.bf16.msra.mxu0 %v4942_v0  ;;  %v1136_v0 = vcombine.high %v32_v33, %v32_v33  ;;  %v293_v33 = vld [vmem:[%s9239_s1 + $0x7c0] sm:$0xff] }
  0x4f   :  { %4975 = vmatpush3.bf16.msra.mxu1 %v4974_v1  ;;  %4945 = vmatprep.subr.bf16.mxu0 %v4944_v2  ;;  %v4962_v1 = vpack.c.bf16 %v188_v57, %v187_v56  ;;  %v4994_v2 = vpack.c.bf16 %v220_v59, %v219_v45  ;;  %v5042_v56 = vpack.c.bf16 %v276_v50, %v275_v48  ;;  %v245_v45 = vld [vmem:[%s9239_s1 + $0x640] sm:$0xff]  ;;  %v302_v48 = vld [vmem:[%s9239_s1 + $0x808] sm:$0xff] }
  0x50   :  { %4977 = vmatprep.subr.bf16.mxu1 %v4976_v6  ;;  %v269_v6 = vld [vmem:[%s9239_s1 + $0x700] sm:$0xff] }
  0x51   :  { %v5030_v17 = vpack.c.bf16 %v270_v8, %v269_v6  ;;  %v277_v59 = vld [vmem:[%s9239_s1 + $0x740] sm:$0xff]  ;;  %v248_v6 = vld [vmem:[%s9239_s1 + $0x658] sm:$0xff] }
  0x52   :  { %4947 = vmatpush3.bf16.msra.mxu0 %v4946_v12  ;;  %v287_v12 = vld [vmem:[%s9239_s1 + $0x790] sm:$0xff] }
  0x53   :  { %4979 = vmatpush3.bf16.msra.mxu1 %v4978_v14  ;;  %4949 = vmatprep.subr.bf16.mxu0 %v4948_v15  ;;  %v288_v14 = vld [vmem:[%s9239_s1 + $0x798] sm:$0xff]  ;;  %v6546_v15 = vrot.slane %v1136_v0, %v6042_v13  ;;  %v295_v0 = vld [vmem:[%s9239_s1 + $0x7d0] sm:$0xff] }
  0x54   :  { %4981 = vmatprep.subr.bf16.mxu1 %v4980_v19  ;;  %v239_v19 = vld [vmem:[%s9239_s1 + $0x610] sm:$0xff]  ;;  %v5032_v22 = vpack.c.bf16 %v288_v14, %v287_v12  ;;  %v266_v12 = vld [vmem:[%s9239_s1 + $0x6e8] sm:$0xff]  ;;  %v297_v14 = vld [vmem:[%s9239_s1 + $0x7e0] sm:$0xff] }
  0x55   :  { %v1152_v29 = vcombine.high %v6546_v15, %v6546_v15  ;;  %v5002_v30 = vpack.c.bf16 %v240_v20, %v239_v19  ;;  %v5020_v19 = vpack.c.bf16 %v266_v12, %v265_v10  ;;  %v249_v20 = vld [vmem:[%s9239_s1 + $0x660] sm:$0xff]  ;;  %v306_v10 = vld [vmem:[%s9239_s1 + $0x828] sm:$0xff] }
  0x56   :  { %4951 = vmatpush3.bf16.msra.mxu0 %v4950_v25  ;;  %v258_v25 = vld [vmem:[%s9239_s1 + $0x6a8] sm:$0xff]  ;;  %v337_v12 = vld [vmem:[%s9239_s1 + $0x920] sm:$0xff] }
  0x57   :  { %4983 = vmatpush3.bf16.msra.mxu1 %v4982_v26  ;;  %4953 = vmatprep.subr.bf16.mxu0 %v4952_v27  ;;  %v1151_v26 = vcombine.high %v6537_v11, %v6537_v11  ;;  %v289_v27 = vld [vmem:[%s9239_s1 + $0x7a0] sm:$0xff]  ;;  %v5004_v32 = vpack.c.bf16 %v258_v25, %v257_v24  ;;  %v282_v24 = vld [vmem:[%s9239_s1 + $0x768] sm:$0xff]  ;;  %v267_v25 = vld [vmem:[%s9239_s1 + $0x6f0] sm:$0xff] }
  0x58   :  { %4985 = vmatprep.subr.bf16.mxu1 %v4984_v31  ;;  %v5034_v31 = vpack.c.bf16 %v272_v23, %v271_v21  ;;  %v5036_v36 = vpack.c.bf16 %v290_v28, %v289_v27  ;;  %v250_v21 = vld [vmem:[%s9239_s1 + $0x668] sm:$0xff]  ;;  %v299_v27 = vld [vmem:[%s9239_s1 + $0x7f0] sm:$0xff]  ;;  %v300_v28 = vld [vmem:[%s9239_s1 + $0x7f8] sm:$0xff] }
  0x5a   :  { %4955 = vmatpush3.bf16.msra.mxu0 %v4954_v38  ;;  %v260_v38 = vld [vmem:[%s9239_s1 + $0x6b8] sm:$0xff] }
  0x5b   :  { %4987 = vmatpush3.bf16.msra.mxu1 %v4986_v39  ;;  %4957 = vmatprep.subr.bf16.mxu0 %v4956_v40  ;;  %v291_v39 = vld [vmem:[%s9239_s1 + $0x7b0] sm:$0xff]  ;;  %v292_v40 = vld [vmem:[%s9239_s1 + $0x7b8] sm:$0xff]  ;;  %v5008_v44 = vpack.c.bf16 %v260_v38, %v259_v37  ;;  %v317_v37 = vld [vmem:[%s9239_s1 + $0x880] sm:$0xff] }
  0x5c   :  { %4989 = vmatprep.subr.bf16.mxu1 %v4988_v46  ;;  %v243_v46 = vld [vmem:[%s9239_s1 + $0x630] sm:$0xff]  ;;  %v5040_v49 = vpack.c.bf16 %v292_v40, %v291_v39  ;;  %v318_v38 = vld [vmem:[%s9239_s1 + $0x888] sm:$0xff]  ;;  %v349_v39 = vld [vmem:[%s9239_s1 + $0x980] sm:$0xff] }
  0x5d   :  { %v350_v40 = vld [vmem:[%s9239_s1 + $0x988] sm:$0xff] }
  0x5e   :  { %4959 = vmatpush3.bf16.msra.mxu0 %v4958_v53  ;;  %v262_v53 = vld [vmem:[%s9239_s1 + $0x6c8] sm:$0xff]  ;;  %v5092_v50 = vpack.c.bf16 %v350_v40, %v349_v39  ;;  %v327_v39 = vld [vmem:[%s9239_s1 + $0x8d0] sm:$0xff]  ;;  %v328_v40 = vld [vmem:[%s9239_s1 + $0x8d8] sm:$0xff] }
  0x5f   :  { %4991 = vmatpush3.bf16.msra.mxu1 %v4990_v54  ;;  %4961 = vmatprep.subr.bf16.mxu0 %v4960_v55  ;;  %v294_v54 = vld [vmem:[%s9239_s1 + $0x7c8] sm:$0xff]  ;;  %v5010_v55 = vpack.c.bf16 %v244_v47, %v243_v46  ;;  %v5012_v57 = vpack.c.bf16 %v262_v53, %v261_v51  ;;  %v5060_v46 = vpack.c.bf16 %v318_v38, %v317_v37  ;;  %v301_v47 = vld [vmem:[%s9239_s1 + $0x800] sm:$0xff]  ;;  %v319_v53 = vld [vmem:[%s9239_s1 + $0x890] sm:$0xff] }
  0x60   :  { %4993 = vmatprep.subr.bf16.mxu1 %v4992_v58  ;;  %v246_v58 = vld [vmem:[%s9239_s1 + $0x648] sm:$0xff]  ;;  %v5044_v60 = vpack.c.bf16 %v294_v54, %v293_v33  ;;  %v320_v33 = vld [vmem:[%s9239_s1 + $0x898] sm:$0xff] }
  0x61   :  { %v334_v51 = vld [vmem:[%s9239_s1 + $0x908] sm:$0xff] }
  0x62   :  { %4963 = vmatpush3.bf16.msra.mxu0 %v4962_v1  ;;  %v296_v1 = vld [vmem:[%s9239_s1 + $0x7d8] sm:$0xff]  ;;  %v342_v38 = vld [vmem:[%s9239_s1 + $0x948] sm:$0xff] }
  0x63   :  { %4995 = vmatpush3.bf16.msra.mxu1 %v4994_v2  ;;  %4997 = vmatprep.subr.bf16.mxu0 %v4996_v3  ;;  %v5014_v2 = vpack.c.bf16 %v246_v58, %v245_v45  ;;  %v5046_v3 = vpack.c.bf16 %v278_v61, %v277_v59  ;;  %v5048_v8 = vpack.c.bf16 %v296_v1, %v295_v0  ;;  %v304_v61 = vld [vmem:[%s9239_s1 + $0x818] sm:$0xff]  ;;  %v321_v1 = vld [vmem:[%s9239_s1 + $0x8a0] sm:$0xff] }
  0x64   :  { %5029 = vmatprep.subr.bf16.mxu1 %v5028_v7  ;;  %v279_v7 = vld [vmem:[%s9239_s1 + $0x750] sm:$0xff]  ;;  %v5062_v45 = vpack.c.bf16 %v302_v48, %v301_v47  ;;  %v5064_v59 = vpack.c.bf16 %v320_v33, %v319_v53  ;;  %v336_v0 = vld [vmem:[%s9239_s1 + $0x918] sm:$0xff]  ;;  %v5080_v47 = vpack.c.bf16 %v328_v40, %v327_v39  ;;  %v329_v33 = vld [vmem:[%s9239_s1 + $0x8e0] sm:$0xff] }
  0x65   :  { %1766 = vmatmul.mubr.f32.vlgmr.msra.gmra.mrb[4].mxu0 %v6345_v42  ;;  %v241_v42 = vld [vmem:[%s9239_s1 + $0x620] sm:$0xff]  ;;  %v311_v48 = vld [vmem:[%s9239_s1 + $0x850] sm:$0xff]  ;;  %v344_v53 = vld [vmem:[%s9239_s1 + $0x958] sm:$0xff] }
  0x66   :  { %4999 = vmatpush3.bf16.msra.mxu0 %v4998_v16  ;;  %1836 = vmatmul.mubr.f32.vlgmr.msra.gmra.mrb[4].mxu1 %v6366_v52  ;;  %v274_v52 = vld [vmem:[%s9239_s1 + $0x728] sm:$0xff]  ;;  %v5006_v41 = vpack.c.bf16 %v242_v34, %v241_v42  ;;  %v251_v42 = vld [vmem:[%s9239_s1 + $0x670] sm:$0xff]  ;;  %v252_v34 = vld [vmem:[%s9239_s1 + $0x678] sm:$0xff] }
  0x67   :  { %5031 = vmatpush3.bf16.msra.mxu1 %v5030_v17  ;;  %5001 = vmatprep.subr.bf16.mxu0 %v5000_v18  ;;  %v5038_v43 = vpack.c.bf16 %v274_v52, %v273_v35  ;;  %v298_v16 = vld [vmem:[%s9239_s1 + $0x7e8] sm:$0xff]  ;;  %v5018_v17 = vpack.c.bf16 %v248_v6, %v247_v5  ;;  %v5050_v18 = vpack.c.bf16 %v280_v9, %v279_v7  ;;  %v283_v35 = vld [vmem:[%s9239_s1 + $0x770] sm:$0xff]  ;;  %v284_v52 = vld [vmem:[%s9239_s1 + $0x778] sm:$0xff] }
  0x68   :  { %5033 = vmatprep.subr.bf16.mxu1 %v5032_v22  ;;  %1905 = vmatprep.mubr.f32.mxu0 %v1151_v26  ;;  %v281_v22 = vld [vmem:[%s9239_s1 + $0x760] sm:$0xff]  ;;  %v5052_v23 = vpack.c.bf16 %v298_v16, %v297_v14  ;;  %v268_v26 = vld [vmem:[%s9239_s1 + $0x6f8] sm:$0xff]  ;;  %v354_v5 = vld [vmem:[%s9239_s1 + $0x9a8] sm:$0xff] }
  0x69   :  { %1975 = vmatprep.mubr.f32.mxu1 %v1152_v29  ;;  %v5022_v29 = vpack.c.bf16 %v250_v21, %v249_v20  ;;  %v323_v16 = vld [vmem:[%s9239_s1 + $0x8b0] sm:$0xff] }
  0x6a   :  { %5003 = vmatpush3.bf16.msra.mxu0 %v5002_v30  ;;  %v33_v30 = vld [vmem:[%s9238_s0 + $0x20] sm:$0xff]  ;;  %v399_v39 = vld [vmem:[%s9239_s1 + $0xb10] sm:$0xff] }
  0x6b   :  { %5035 = vmatpush3.bf16.msra.mxu1 %v5034_v31  ;;  %5005 = vmatprep.subr.bf16.mxu0 %v5004_v32  ;;  %v5054_v31 = vpack.c.bf16 %v282_v24, %v281_v22  ;;  %v5024_v32 = vpack.c.bf16 %v268_v26, %v267_v25  ;;  %v6744_v54 = vrot.slane %v33_v30, %v6042_v13  ;;  %v308_v24 = vld [vmem:[%s9239_s1 + $0x838] sm:$0xff]  ;;  %v339_v25 = vld [vmem:[%s9239_s1 + $0x930] sm:$0xff] }
  0x6c   :  { %5037 = vmatprep.subr.bf16.mxu1 %v5036_v36  ;;  %v5056_v36 = vpack.c.bf16 %v300_v28, %v299_v27  ;;  %v340_v27 = vld [vmem:[%s9239_s1 + $0x938] sm:$0xff]  ;;  %v325_v28 = vld [vmem:[%s9239_s1 + $0x8c0] sm:$0xff] }
  0x6e   :  { %5007 = vmatpush3.bf16.msra.mxu0 %v5006_v41  ;;  %v1153_v41 = vcombine.high %v33_v30, %v33_v30  ;;  %v357_v30 = vld [vmem:[%s9239_s1 + $0x9c0] sm:$0xff] }
  0x6f   :  { %5039 = vmatpush3.bf16.msra.mxu1 %v5038_v43  ;;  %5009 = vmatprep.subr.bf16.mxu0 %v5008_v44  ;;  %v5026_v43 = vpack.c.bf16 %v252_v34, %v251_v42  ;;  %v5058_v44 = vpack.c.bf16 %v284_v52, %v283_v35  ;;  %v5106_v42 = vpack.c.bf16 %v340_v27, %v339_v25  ;;  %v309_v35 = vld [vmem:[%s9239_s1 + $0x840] sm:$0xff]  ;;  %v366_v25 = vld [vmem:[%s9239_s1 + $0xa08] sm:$0xff] }
  0x70   :  { %5041 = vmatprep.subr.bf16.mxu1 %v5040_v49  ;;  %v333_v49 = vld [vmem:[%s9239_s1 + $0x900] sm:$0xff] }
  0x71   :  { %v5094_v58 = vpack.c.bf16 %v334_v51, %v333_v49  ;;  %v341_v52 = vld [vmem:[%s9239_s1 + $0x940] sm:$0xff]  ;;  %v312_v49 = vld [vmem:[%s9239_s1 + $0x858] sm:$0xff] }
  0x72   :  { %5011 = vmatpush3.bf16.msra.mxu0 %v5010_v55  ;;  %v351_v55 = vld [vmem:[%s9239_s1 + $0x990] sm:$0xff] }
  0x73   :  { %5043 = vmatpush3.bf16.msra.mxu1 %v5042_v56  ;;  %5013 = vmatprep.subr.bf16.mxu0 %v5012_v57  ;;  %v352_v56 = vld [vmem:[%s9239_s1 + $0x998] sm:$0xff]  ;;  %v6753_v57 = vrot.slane %v1153_v41, %v6042_v13  ;;  %v359_v41 = vld [vmem:[%s9239_s1 + $0x9d0] sm:$0xff] }
  0x74   :  { %5045 = vmatprep.subr.bf16.mxu1 %v5044_v60  ;;  %v303_v60 = vld [vmem:[%s9239_s1 + $0x810] sm:$0xff]  ;;  %v5096_v63 = vpack.c.bf16 %v352_v56, %v351_v55  ;;  %v330_v55 = vld [vmem:[%s9239_s1 + $0x8e8] sm:$0xff]  ;;  %v361_v56 = vld [vmem:[%s9239_s1 + $0x9e0] sm:$0xff] }
  0x75   :  { %v1169_v6 = vcombine.high %v6753_v57, %v6753_v57  ;;  %v5066_v7 = vpack.c.bf16 %v304_v61, %v303_v60  ;;  %v5084_v60 = vpack.c.bf16 %v330_v55, %v329_v33  ;;  %v313_v61 = vld [vmem:[%s9239_s1 + $0x860] sm:$0xff]  ;;  %v370_v33 = vld [vmem:[%s9239_s1 + $0xa28] sm:$0xff] }
  0x76   :  { %5015 = vmatpush3.bf16.msra.mxu0 %v5014_v2  ;;  %v322_v2 = vld [vmem:[%s9239_s1 + $0x8a8] sm:$0xff]  ;;  %v401_v55 = vld [vmem:[%s9239_s1 + $0xb20] sm:$0xff] }
  0x77   :  { %5047 = vmatpush3.bf16.msra.mxu1 %v5046_v3  ;;  %5017 = vmatprep.subr.bf16.mxu0 %v5016_v4  ;;  %v1168_v3 = vcombine.high %v6744_v54, %v6744_v54  ;;  %v353_v4 = vld [vmem:[%s9239_s1 + $0x9a0] sm:$0xff]  ;;  %v5068_v9 = vpack.c.bf16 %v322_v2, %v321_v1  ;;  %v346_v1 = vld [vmem:[%s9239_s1 + $0x968] sm:$0xff]  ;;  %v331_v2 = vld [vmem:[%s9239_s1 + $0x8f0] sm:$0xff] }
  0x78   :  { %5049 = vmatprep.subr.bf16.mxu1 %v5048_v8  ;;  %v5098_v8 = vpack.c.bf16 %v336_v0, %v335_v62  ;;  %v5100_v14 = vpack.c.bf16 %v354_v5, %v353_v4  ;;  %v314_v62 = vld [vmem:[%s9239_s1 + $0x868] sm:$0xff]  ;;  %v363_v4 = vld [vmem:[%s9239_s1 + $0x9f0] sm:$0xff]  ;;  %v364_v5 = vld [vmem:[%s9239_s1 + $0x9f8] sm:$0xff] }
  0x7a   :  { %5019 = vmatpush3.bf16.msra.mxu0 %v5018_v17  ;;  %v324_v17 = vld [vmem:[%s9239_s1 + $0x8b8] sm:$0xff] }
  0x7b   :  { %5051 = vmatpush3.bf16.msra.mxu1 %v5050_v18  ;;  %5021 = vmatprep.subr.bf16.mxu0 %v5020_v19  ;;  %v355_v18 = vld [vmem:[%s9239_s1 + $0x9b0] sm:$0xff]  ;;  %v356_v19 = vld [vmem:[%s9239_s1 + $0x9b8] sm:$0xff]  ;;  %v5072_v22 = vpack.c.bf16 %v324_v17, %v323_v16  ;;  %v381_v16 = vld [vmem:[%s9239_s1 + $0xa80] sm:$0xff] }
  0x7c   :  { %5053 = vmatprep.subr.bf16.mxu1 %v5052_v23  ;;  %v307_v23 = vld [vmem:[%s9239_s1 + $0x830] sm:$0xff]  ;;  %v5104_v26 = vpack.c.bf16 %v356_v19, %v355_v18  ;;  %v382_v17 = vld [vmem:[%s9239_s1 + $0xa88] sm:$0xff]  ;;  %v413_v18 = vld [vmem:[%s9239_s1 + $0xb80] sm:$0xff] }
  0x7d   :  { %v414_v19 = vld [vmem:[%s9239_s1 + $0xb88] sm:$0xff] }
  0x7e   :  { %5023 = vmatpush3.bf16.msra.mxu0 %v5022_v29  ;;  %v326_v29 = vld [vmem:[%s9239_s1 + $0x8c8] sm:$0xff]  ;;  %v5156_v27 = vpack.c.bf16 %v414_v19, %v413_v18  ;;  %v391_v18 = vld [vmem:[%s9239_s1 + $0xad0] sm:$0xff]  ;;  %v392_v19 = vld [vmem:[%s9239_s1 + $0xad8] sm:$0xff] }
  0x7f   :  { %5055 = vmatpush3.bf16.msra.mxu1 %v5054_v31  ;;  %5025 = vmatprep.subr.bf16.mxu0 %v5024_v32  ;;  %v358_v31 = vld [vmem:[%s9239_s1 + $0x9c8] sm:$0xff]  ;;  %v5074_v32 = vpack.c.bf16 %v308_v24, %v307_v23  ;;  %v5076_v34 = vpack.c.bf16 %v326_v29, %v325_v28  ;;  %v5124_v23 = vpack.c.bf16 %v382_v17, %v381_v16  ;;  %v365_v24 = vld [vmem:[%s9239_s1 + $0xa00] sm:$0xff]  ;;  %v383_v29 = vld [vmem:[%s9239_s1 + $0xa90] sm:$0xff] }
  0x80   :  { %5057 = vmatprep.subr.bf16.mxu1 %v5056_v36  ;;  %v310_v36 = vld [vmem:[%s9239_s1 + $0x848] sm:$0xff]  ;;  %v5108_v37 = vpack.c.bf16 %v358_v31, %v357_v30  ;;  %v384_v30 = vld [vmem:[%s9239_s1 + $0xa98] sm:$0xff] }
  0x81   :  { %v398_v28 = vld [vmem:[%s9239_s1 + $0xb08] sm:$0xff] }
  0x82   :  { %5027 = vmatpush3.bf16.msra.mxu0 %v5026_v43  ;;  %v360_v43 = vld [vmem:[%s9239_s1 + $0x9d8] sm:$0xff]  ;;  %v406_v17 = vld [vmem:[%s9239_s1 + $0xb48] sm:$0xff] }
  0x83   :  { %5059 = vmatpush3.bf16.msra.mxu1 %v5058_v44  ;;  %5061 = vmatprep.subr.bf16.mxu0 %v5060_v46  ;;  %v5078_v44 = vpack.c.bf16 %v310_v36, %v309_v35  ;;  %v5110_v46 = vpack.c.bf16 %v342_v38, %v341_v52  ;;  %v5112_v51 = vpack.c.bf16 %v360_v43, %v359_v41  ;;  %v368_v38 = vld [vmem:[%s9239_s1 + $0xa18] sm:$0xff]  ;;  %v385_v43 = vld [vmem:[%s9239_s1 + $0xaa0] sm:$0xff] }
  0x84   :  { %5093 = vmatprep.subr.bf16.mxu1 %v5092_v50  ;;  %v343_v50 = vld [vmem:[%s9239_s1 + $0x950] sm:$0xff]  ;;  %v5126_v35 = vpack.c.bf16 %v366_v25, %v365_v24  ;;  %v5128_v52 = vpack.c.bf16 %v384_v30, %v383_v29  ;;  %v400_v41 = vld [vmem:[%s9239_s1 + $0xb18] sm:$0xff]  ;;  %v5144_v24 = vpack.c.bf16 %v392_v19, %v391_v18  ;;  %v393_v30 = vld [vmem:[%s9239_s1 + $0xae0] sm:$0xff] }
  0x85   :  { %1906 = vmatmul.mubr.f32.vlgmr.msra.gmra.mrb[6].mxu0 %v6537_v11  ;;  %v305_v11 = vld [vmem:[%s9239_s1 + $0x820] sm:$0xff]  ;;  %v375_v25 = vld [vmem:[%s9239_s1 + $0xa50] sm:$0xff]  ;;  %v408_v29 = vld [vmem:[%s9239_s1 + $0xb58] sm:$0xff] }
  0x86   :  { %5063 = vmatpush3.bf16.msra.mxu0 %v5062_v45  ;;  %1976 = vmatmul.mubr.f32.vlgmr.msra.gmra.mrb[6].mxu1 %v6546_v15  ;;  %v338_v15 = vld [vmem:[%s9239_s1 + $0x928] sm:$0xff]  ;;  %v5070_v20 = vpack.c.bf16 %v306_v10, %v305_v11  ;;  %v315_v11 = vld [vmem:[%s9239_s1 + $0x870] sm:$0xff]  ;;  %v316_v10 = vld [vmem:[%s9239_s1 + $0x878] sm:$0xff] }
  0x87   :  { %5095 = vmatpush3.bf16.msra.mxu1 %v5094_v58  ;;  %5065 = vmatprep.subr.bf16.mxu0 %v5064_v59  ;;  %v5102_v21 = vpack.c.bf16 %v338_v15, %v337_v12  ;;  %v362_v45 = vld [vmem:[%s9239_s1 + $0x9e8] sm:$0xff]  ;;  %v5082_v58 = vpack.c.bf16 %v312_v49, %v311_v48  ;;  %v5114_v59 = vpack.c.bf16 %v344_v53, %v343_v50  ;;  %v347_v12 = vld [vmem:[%s9239_s1 + $0x970] sm:$0xff]  ;;  %v348_v15 = vld [vmem:[%s9239_s1 + $0x978] sm:$0xff] }
  0x88   :  { %5097 = vmatprep.subr.bf16.mxu1 %v5096_v63  ;;  %2045 = vmatprep.mubr.f32.mxu0 %v1168_v3  ;;  %v345_v63 = vld [vmem:[%s9239_s1 + $0x960] sm:$0xff]  ;;  %v5116_v0 = vpack.c.bf16 %v362_v45, %v361_v56  ;;  %v332_v3 = vld [vmem:[%s9239_s1 + $0x8f8] sm:$0xff]  ;;  %v418_v48 = vld [vmem:[%s9239_s1 + $0xba8] sm:$0xff] }
  0x89   :  { %2115 = vmatprep.mubr.f32.mxu1 %v1169_v6  ;;  %v5086_v6 = vpack.c.bf16 %v314_v62, %v313_v61  ;;  %v387_v45 = vld [vmem:[%s9239_s1 + $0xab0] sm:$0xff] }
  0x8a   :  { %5067 = vmatpush3.bf16.msra.mxu0 %v5066_v7  ;;  %v34_v7 = vld [vmem:[%s9238_s0 + $0x28] sm:$0xff]  ;;  %v463_v18 = vld [vmem:[%s9239_s1 + $0xd10] sm:$0xff] }
  0x8b   :  { %5099 = vmatpush3.bf16.msra.mxu1 %v5098_v8  ;;  %5069 = vmatprep.subr.bf16.mxu0 %v5068_v9  ;;  %v5118_v8 = vpack.c.bf16 %v346_v1, %v345_v63  ;;  %v5088_v9 = vpack.c.bf16 %v332_v3, %v331_v2  ;;  %v6951_v31 = vrot.slane %v34_v7, %v6042_v13  ;;  %v372_v1 = vld [vmem:[%s9239_s1 + $0xa38] sm:$0xff]  ;;  %v403_v2 = vld [vmem:[%s9239_s1 + $0xb30] sm:$0xff] }
  0x8c   :  { %5101 = vmatprep.subr.bf16.mxu1 %v5100_v14  ;;  %v5120_v14 = vpack.c.bf16 %v364_v5, %v363_v4  ;;  %v404_v4 = vld [vmem:[%s9239_s1 + $0xb38] sm:$0xff]  ;;  %v389_v5 = vld [vmem:[%s9239_s1 + $0xac0] sm:$0xff] }
  0x8e   :  { %5071 = vmatpush3.bf16.msra.mxu0 %v5070_v20  ;;  %v1170_v20 = vcombine.high %v34_v7, %v34_v7  ;;  %v421_v7 = vld [vmem:[%s9239_s1 + $0xbc0] sm:$0xff] }
  0x8f   :  { %5103 = vmatpush3.bf16.msra.mxu1 %v5102_v21  ;;  %5073 = vmatprep.subr.bf16.mxu0 %v5072_v22  ;;  %v5090_v21 = vpack.c.bf16 %v316_v10, %v315_v11  ;;  %v5122_v22 = vpack.c.bf16 %v348_v15, %v347_v12  ;;  %v5170_v11 = vpack.c.bf16 %v404_v4, %v403_v2  ;;  %v373_v12 = vld [vmem:[%s9239_s1 + $0xa40] sm:$0xff]  ;;  %v430_v2 = vld [vmem:[%s9239_s1 + $0xc08] sm:$0xff] }
  0x90   :  { %5105 = vmatprep.subr.bf16.mxu1 %v5104_v26  ;;  %v397_v26 = vld [vmem:[%s9239_s1 + $0xb00] sm:$0xff] }
  0x91   :  { %v5158_v36 = vpack.c.bf16 %v398_v28, %v397_v26  ;;  %v405_v15 = vld [vmem:[%s9239_s1 + $0xb40] sm:$0xff]  ;;  %v376_v26 = vld [vmem:[%s9239_s1 + $0xa58] sm:$0xff] }
  0x92   :  { %5075 = vmatpush3.bf16.msra.mxu0 %v5074_v32  ;;  %v415_v32 = vld [vmem:[%s9239_s1 + $0xb90] sm:$0xff] }
  0x93   :  { %5107 = vmatpush3.bf16.msra.mxu1 %v5106_v42  ;;  %5077 = vmatprep.subr.bf16.mxu0 %v5076_v34  ;;  %v416_v42 = vld [vmem:[%s9239_s1 + $0xb98] sm:$0xff]  ;;  %v6960_v34 = vrot.slane %v1170_v20, %v6042_v13  ;;  %v423_v20 = vld [vmem:[%s9239_s1 + $0xbd0] sm:$0xff] }
  0x94   :  { %5109 = vmatprep.subr.bf16.mxu1 %v5108_v37  ;;  %v367_v37 = vld [vmem:[%s9239_s1 + $0xa10] sm:$0xff]  ;;  %v5160_v40 = vpack.c.bf16 %v416_v42, %v415_v32  ;;  %v394_v32 = vld [vmem:[%s9239_s1 + $0xae8] sm:$0xff]  ;;  %v425_v42 = vld [vmem:[%s9239_s1 + $0xbe0] sm:$0xff] }
  0x95   :  { %v1186_v49 = vcombine.high %v6960_v34, %v6960_v34  ;;  %v5130_v50 = vpack.c.bf16 %v368_v38, %v367_v37  ;;  %v5148_v37 = vpack.c.bf16 %v394_v32, %v393_v30  ;;  %v377_v38 = vld [vmem:[%s9239_s1 + $0xa60] sm:$0xff]  ;;  %v434_v30 = vld [vmem:[%s9239_s1 + $0xc28] sm:$0xff] }
  0x96   :  { %5079 = vmatpush3.bf16.msra.mxu0 %v5078_v44  ;;  %v386_v44 = vld [vmem:[%s9239_s1 + $0xaa8] sm:$0xff]  ;;  %v465_v32 = vld [vmem:[%s9239_s1 + $0xd20] sm:$0xff] }
  0x97   :  { %5111 = vmatpush3.bf16.msra.mxu1 %v5110_v46  ;;  %5081 = vmatprep.subr.bf16.mxu0 %v5080_v47  ;;  %v1185_v46 = vcombine.high %v6951_v31, %v6951_v31  ;;  %v417_v47 = vld [vmem:[%s9239_s1 + $0xba0] sm:$0xff]  ;;  %v5132_v53 = vpack.c.bf16 %v386_v44, %v385_v43  ;;  %v410_v43 = vld [vmem:[%s9239_s1 + $0xb68] sm:$0xff]  ;;  %v395_v44 = vld [vmem:[%s9239_s1 + $0xaf0] sm:$0xff] }
  0x98   :  { %5113 = vmatprep.subr.bf16.mxu1 %v5112_v51  ;;  %v5162_v51 = vpack.c.bf16 %v400_v41, %v399_v39  ;;  %v5164_v56 = vpack.c.bf16 %v418_v48, %v417_v47  ;;  %v378_v39 = vld [vmem:[%s9239_s1 + $0xa68] sm:$0xff]  ;;  %v427_v47 = vld [vmem:[%s9239_s1 + $0xbf0] sm:$0xff]  ;;  %v428_v48 = vld [vmem:[%s9239_s1 + $0xbf8] sm:$0xff] }
  0x9a   :  { %5083 = vmatpush3.bf16.msra.mxu0 %v5082_v58  ;;  %v388_v58 = vld [vmem:[%s9239_s1 + $0xab8] sm:$0xff] }
  0x9b   :  { %5115 = vmatpush3.bf16.msra.mxu1 %v5114_v59  ;;  %5085 = vmatprep.subr.bf16.mxu0 %v5084_v60  ;;  %v419_v59 = vld [vmem:[%s9239_s1 + $0xbb0] sm:$0xff]  ;;  %v420_v60 = vld [vmem:[%s9239_s1 + $0xbb8] sm:$0xff]  ;;  %v5136_v63 = vpack.c.bf16 %v388_v58, %v387_v45  ;;  %v445_v45 = vld [vmem:[%s9239_s1 + $0xc80] sm:$0xff] }
  0x9c   :  { %5117 = vmatprep.subr.bf16.mxu1 %v5116_v0  ;;  %v371_v0 = vld [vmem:[%s9239_s1 + $0xa30] sm:$0xff]  ;;  %v5168_v3 = vpack.c.bf16 %v420_v60, %v419_v59  ;;  %v446_v58 = vld [vmem:[%s9239_s1 + $0xc88] sm:$0xff]  ;;  %v477_v59 = vld [vmem:[%s9239_s1 + $0xd80] sm:$0xff] }
  0x9d   :  { %v478_v60 = vld [vmem:[%s9239_s1 + $0xd88] sm:$0xff] }
  0x9e   :  { %5087 = vmatpush3.bf16.msra.mxu0 %v5086_v6  ;;  %v390_v6 = vld [vmem:[%s9239_s1 + $0xac8] sm:$0xff]  ;;  %v5220_v4 = vpack.c.bf16 %v478_v60, %v477_v59  ;;  %v455_v59 = vld [vmem:[%s9239_s1 + $0xcd0] sm:$0xff]  ;;  %v456_v60 = vld [vmem:[%s9239_s1 + $0xcd8] sm:$0xff] }
  0x9f   :  { %5119 = vmatpush3.bf16.msra.mxu1 %v5118_v8  ;;  %5089 = vmatprep.subr.bf16.mxu0 %v5088_v9  ;;  %v422_v8 = vld [vmem:[%s9239_s1 + $0xbc8] sm:$0xff]  ;;  %v5138_v9 = vpack.c.bf16 %v372_v1, %v371_v0  ;;  %v5140_v10 = vpack.c.bf16 %v390_v6, %v389_v5  ;;  %v5188_v0 = vpack.c.bf16 %v446_v58, %v445_v45  ;;  %v429_v1 = vld [vmem:[%s9239_s1 + $0xc00] sm:$0xff]  ;;  %v447_v6 = vld [vmem:[%s9239_s1 + $0xc90] sm:$0xff] }
  0xa0   :  { %5121 = vmatprep.subr.bf16.mxu1 %v5120_v14  ;;  %v374_v14 = vld [vmem:[%s9239_s1 + $0xa48] sm:$0xff]  ;;  %v5172_v16 = vpack.c.bf16 %v422_v8, %v421_v7  ;;  %v448_v7 = vld [vmem:[%s9239_s1 + $0xc98] sm:$0xff] }
  0xa1   :  { %v462_v5 = vld [vmem:[%s9239_s1 + $0xd08] sm:$0xff] }
  0xa2   :  { %5091 = vmatpush3.bf16.msra.mxu0 %v5090_v21  ;;  %v424_v21 = vld [vmem:[%s9239_s1 + $0xbd8] sm:$0xff]  ;;  %v470_v58 = vld [vmem:[%s9239_s1 + $0xd48] sm:$0xff] }
  0xa3   :  { %5123 = vmatpush3.bf16.msra.mxu1 %v5122_v22  ;;  %5125 = vmatprep.subr.bf16.mxu0 %v5124_v23  ;;  %v5142_v22 = vpack.c.bf16 %v374_v14, %v373_v12  ;;  %v5174_v23 = vpack.c.bf16 %v406_v17, %v405_v15  ;;  %v5176_v28 = vpack.c.bf16 %v424_v21, %v423_v20  ;;  %v432_v17 = vld [vmem:[%s9239_s1 + $0xc18] sm:$0xff]  ;;  %v449_v21 = vld [vmem:[%s9239_s1 + $0xca0] sm:$0xff] }
  0xa4   :  { %5157 = vmatprep.subr.bf16.mxu1 %v5156_v27  ;;  %v407_v27 = vld [vmem:[%s9239_s1 + $0xb50] sm:$0xff]  ;;  %v5190_v12 = vpack.c.bf16 %v430_v2, %v429_v1  ;;  %v5192_v15 = vpack.c.bf16 %v448_v7, %v447_v6  ;;  %v464_v20 = vld [vmem:[%s9239_s1 + $0xd18] sm:$0xff]  ;;  %v5208_v1 = vpack.c.bf16 %v456_v60, %v455_v59  ;;  %v457_v7 = vld [vmem:[%s9239_s1 + $0xce0] sm:$0xff] }
  0xa5   :  { %2046 = vmatmul.mubr.f32.vlgmr.msra.gmra.mrb[8].mxu0 %v6744_v54  ;;  %v369_v54 = vld [vmem:[%s9239_s1 + $0xa20] sm:$0xff]  ;;  %v439_v2 = vld [vmem:[%s9239_s1 + $0xc50] sm:$0xff]  ;;  %v472_v6 = vld [vmem:[%s9239_s1 + $0xd58] sm:$0xff] }
  0xa6   :  { %5127 = vmatpush3.bf16.msra.mxu0 %v5126_v35  ;;  %2116 = vmatmul.mubr.f32.vlgmr.msra.gmra.mrb[8].mxu1 %v6753_v57  ;;  %v402_v57 = vld [vmem:[%s9239_s1 + $0xb28] sm:$0xff]  ;;  %v5134_v61 = vpack.c.bf16 %v370_v33, %v369_v54  ;;  %v379_v54 = vld [vmem:[%s9239_s1 + $0xa70] sm:$0xff]  ;;  %v380_v33 = vld [vmem:[%s9239_s1 + $0xa78] sm:$0xff] }
  0xa7   :  { %5159 = vmatpush3.bf16.msra.mxu1 %v5158_v36  ;;  %5129 = vmatprep.subr.bf16.mxu0 %v5128_v52  ;;  %v5166_v62 = vpack.c.bf16 %v402_v57, %v401_v55  ;;  %v426_v35 = vld [vmem:[%s9239_s1 + $0xbe8] sm:$0xff]  ;;  %v5146_v36 = vpack.c.bf16 %v376_v26, %v375_v25  ;;  %v5178_v52 = vpack.c.bf16 %v408_v29, %v407_v27  ;;  %v411_v55 = vld [vmem:[%s9239_s1 + $0xb70] sm:$0xff]  ;;  %v412_v57 = vld [vmem:[%s9239_s1 + $0xb78] sm:$0xff] }
  0xa8   :  { %5161 = vmatprep.subr.bf16.mxu1 %v5160_v40  ;;  %2185 = vmatprep.mubr.f32.mxu0 %v1185_v46  ;;  %v409_v40 = vld [vmem:[%s9239_s1 + $0xb60] sm:$0xff]  ;;  %v5180_v41 = vpack.c.bf16 %v426_v35, %v425_v42  ;;  %v396_v46 = vld [vmem:[%s9239_s1 + $0xaf8] sm:$0xff]  ;;  %v482_v25 = vld [vmem:[%s9239_s1 + $0xda8] sm:$0xff] }
  0xa9   :  { %2255 = vmatprep.mubr.f32.mxu1 %v1186_v49  ;;  %v5150_v49 = vpack.c.bf16 %v378_v39, %v377_v38  ;;  %v451_v35 = vld [vmem:[%s9239_s1 + $0xcb0] sm:$0xff] }
  0xaa   :  { %5131 = vmatpush3.bf16.msra.mxu0 %v5130_v50  ;;  %v35_v50 = vld [vmem:[%s9238_s0 + $0x30] sm:$0xff] }
  0xab   :  { %5163 = vmatpush3.bf16.msra.mxu1 %v5162_v51  ;;  %5133 = vmatprep.subr.bf16.mxu0 %v5132_v53  ;;  %v5182_v51 = vpack.c.bf16 %v410_v43, %v409_v40  ;;  %v5152_v53 = vpack.c.bf16 %v396_v46, %v395_v44  ;;  %v7158_v8 = vrot.slane %v35_v50, %v6042_v13  ;;  %v436_v43 = vld [vmem:[%s9239_s1 + $0xc38] sm:$0xff]  ;;  %v467_v44 = vld [vmem:[%s9239_s1 + $0xd30] sm:$0xff] }
  0xac   :  { %5165 = vmatprep.subr.bf16.mxu1 %v5164_v56  ;;  %v5184_v56 = vpack.c.bf16 %v428_v48, %v427_v47  ;;  %v468_v47 = vld [vmem:[%s9239_s1 + $0xd38] sm:$0xff]  ;;  %v453_v48 = vld [vmem:[%s9239_s1 + $0xcc0] sm:$0xff]  ;;  %v527_v59 = vld [vmem:[%s9239_s1 + $0xf10] sm:$0xff] }
  0xae   :  { %5135 = vmatpush3.bf16.msra.mxu0 %v5134_v61  ;;  %v1187_v61 = vcombine.high %v35_v50, %v35_v50  ;;  %v485_v50 = vld [vmem:[%s9239_s1 + $0xdc0] sm:$0xff] }
  0xaf   :  { %5167 = vmatpush3.bf16.msra.mxu1 %v5166_v62  ;;  %5137 = vmatprep.subr.bf16.mxu0 %v5136_v63  ;;  %v5154_v62 = vpack.c.bf16 %v380_v33, %v379_v54  ;;  %v5186_v63 = vpack.c.bf16 %v412_v57, %v411_v55  ;;  %v5234_v54 = vpack.c.bf16 %v468_v47, %v467_v44  ;;  %v437_v55 = vld [vmem:[%s9239_s1 + $0xc40] sm:$0xff]  ;;  %v494_v44 = vld [vmem:[%s9239_s1 + $0xe08] sm:$0xff] }
  0xb0   :  { %5169 = vmatprep.subr.bf16.mxu1 %v5168_v3  ;;  %v461_v3 = vld [vmem:[%s9239_s1 + $0xd00] sm:$0xff] }
  0xb1   :  { %v5222_v14 = vpack.c.bf16 %v462_v5, %v461_v3  ;;  %v469_v57 = vld [vmem:[%s9239_s1 + $0xd40] sm:$0xff]  ;;  %v440_v3 = vld [vmem:[%s9239_s1 + $0xc58] sm:$0xff] }
  0xb2   :  { %5139 = vmatpush3.bf16.msra.mxu0 %v5138_v9  ;;  %v479_v9 = vld [vmem:[%s9239_s1 + $0xd90] sm:$0xff] }
  0xb3   :  { %5171 = vmatpush3.bf16.msra.mxu1 %v5170_v11  ;;  %5141 = vmatprep.subr.bf16.mxu0 %v5140_v10  ;;  %v480_v11 = vld [vmem:[%s9239_s1 + $0xd98] sm:$0xff]  ;;  %v7167_v10 = vrot.slane %v1187_v61, %v6042_v13  ;;  %v487_v61 = vld [vmem:[%s9239_s1 + $0xdd0] sm:$0xff] }
  0xb4   :  { %5173 = vmatprep.subr.bf16.mxu1 %v5172_v16  ;;  %v431_v16 = vld [vmem:[%s9239_s1 + $0xc10] sm:$0xff]  ;;  %v5224_v19 = vpack.c.bf16 %v480_v11, %v479_v9  ;;  %v458_v9 = vld [vmem:[%s9239_s1 + $0xce8] sm:$0xff]  ;;  %v489_v11 = vld [vmem:[%s9239_s1 + $0xde0] sm:$0xff] }
  0xb5   :  { %v1203_v26 = vcombine.high %v7167_v10, %v7167_v10  ;;  %v5194_v27 = vpack.c.bf16 %v432_v17, %v431_v16  ;;  %v5212_v16 = vpack.c.bf16 %v458_v9, %v457_v7  ;;  %v441_v17 = vld [vmem:[%s9239_s1 + $0xc60] sm:$0xff]  ;;  %v498_v7 = vld [vmem:[%s9239_s1 + $0xe28] sm:$0xff] }
  0xb6   :  { %5143 = vmatpush3.bf16.msra.mxu0 %v5142_v22  ;;  %v450_v22 = vld [vmem:[%s9239_s1 + $0xca8] sm:$0xff]  ;;  %v529_v9 = vld [vmem:[%s9239_s1 + $0xf20] sm:$0xff] }
  0xb7   :  { %5175 = vmatpush3.bf16.msra.mxu1 %v5174_v23  ;;  %5145 = vmatprep.subr.bf16.mxu0 %v5144_v24  ;;  %v1202_v23 = vcombine.high %v7158_v8, %v7158_v8  ;;  %v481_v24 = vld [vmem:[%s9239_s1 + $0xda0] sm:$0xff]  ;;  %v5196_v29 = vpack.c.bf16 %v450_v22, %v449_v21  ;;  %v474_v21 = vld [vmem:[%s9239_s1 + $0xd68] sm:$0xff]  ;;  %v459_v22 = vld [vmem:[%s9239_s1 + $0xcf0] sm:$0xff] }
  0xb8   :  { %5177 = vmatprep.subr.bf16.mxu1 %v5176_v28  ;;  %v5226_v28 = vpack.c.bf16 %v464_v20, %v463_v18  ;;  %v5228_v42 = vpack.c.bf16 %v482_v25, %v481_v24  ;;  %v442_v18 = vld [vmem:[%s9239_s1 + $0xc68] sm:$0xff]  ;;  %v491_v24 = vld [vmem:[%s9239_s1 + $0xdf0] sm:$0xff]  ;;  %v492_v25 = vld [vmem:[%s9239_s1 + $0xdf8] sm:$0xff] }
  0xba   :  { %5147 = vmatpush3.bf16.msra.mxu0 %v5146_v36  ;;  %v452_v36 = vld [vmem:[%s9239_s1 + $0xcb8] sm:$0xff] }
  0xbb   :  { %5179 = vmatpush3.bf16.msra.mxu1 %v5178_v52  ;;  %5149 = vmatprep.subr.bf16.mxu0 %v5148_v37  ;;  %v483_v52 = vld [vmem:[%s9239_s1 + $0xdb0] sm:$0xff]  ;;  %v484_v37 = vld [vmem:[%s9239_s1 + $0xdb8] sm:$0xff]  ;;  %v5200_v40 = vpack.c.bf16 %v452_v36, %v451_v35  ;;  %v509_v35 = vld [vmem:[%s9239_s1 + $0xe80] sm:$0xff] }
  0xbc   :  { %5181 = vmatprep.subr.bf16.mxu1 %v5180_v41  ;;  %v435_v41 = vld [vmem:[%s9239_s1 + $0xc30] sm:$0xff]  ;;  %v5232_v46 = vpack.c.bf16 %v484_v37, %v483_v52  ;;  %v510_v36 = vld [vmem:[%s9239_s1 + $0xe88] sm:$0xff]  ;;  %v541_v52 = vld [vmem:[%s9239_s1 + $0xf80] sm:$0xff] }
  0xbd   :  { %v542_v37 = vld [vmem:[%s9239_s1 + $0xf88] sm:$0xff] }
  0xbe   :  { %5151 = vmatpush3.bf16.msra.mxu0 %v5150_v49  ;;  %v454_v49 = vld [vmem:[%s9239_s1 + $0xcc8] sm:$0xff]  ;;  %v5284_v47 = vpack.c.bf16 %v542_v37, %v541_v52  ;;  %v519_v52 = vld [vmem:[%s9239_s1 + $0xed0] sm:$0xff]  ;;  %v520_v37 = vld [vmem:[%s9239_s1 + $0xed8] sm:$0xff] }
  0xbf   :  { %5183 = vmatpush3.bf16.msra.mxu1 %v5182_v51  ;;  %5153 = vmatprep.subr.bf16.mxu0 %v5152_v53  ;;  %v486_v51 = vld [vmem:[%s9239_s1 + $0xdc8] sm:$0xff]  ;;  %v5202_v53 = vpack.c.bf16 %v436_v43, %v435_v41  ;;  %v5204_v33 = vpack.c.bf16 %v454_v49, %v453_v48  ;;  %v5252_v41 = vpack.c.bf16 %v510_v36, %v509_v35  ;;  %v493_v43 = vld [vmem:[%s9239_s1 + $0xe00] sm:$0xff]  ;;  %v511_v49 = vld [vmem:[%s9239_s1 + $0xe90] sm:$0xff] }
  0xc0   :  { %5185 = vmatprep.subr.bf16.mxu1 %v5184_v56  ;;  %v438_v56 = vld [vmem:[%s9239_s1 + $0xc48] sm:$0xff]  ;;  %v5236_v45 = vpack.c.bf16 %v486_v51, %v485_v50  ;;  %v512_v50 = vld [vmem:[%s9239_s1 + $0xe98] sm:$0xff] }
  0xc1   :  { %v526_v48 = vld [vmem:[%s9239_s1 + $0xf08] sm:$0xff] }
  0xc2   :  { %5155 = vmatpush3.bf16.msra.mxu0 %v5154_v62  ;;  %v488_v62 = vld [vmem:[%s9239_s1 + $0xdd8] sm:$0xff]  ;;  %v534_v36 = vld [vmem:[%s9239_s1 + $0xf48] sm:$0xff] }
  0xc3   :  { %5187 = vmatpush3.bf16.msra.mxu1 %v5186_v63  ;;  %5189 = vmatprep.subr.bf16.mxu0 %v5188_v0  ;;  %v5206_v63 = vpack.c.bf16 %v438_v56, %v437_v55  ;;  %v5238_v0 = vpack.c.bf16 %v470_v58, %v469_v57  ;;  %v5240_v5 = vpack.c.bf16 %v488_v62, %v487_v61  ;;  %v496_v58 = vld [vmem:[%s9239_s1 + $0xe18] sm:$0xff]  ;;  %v513_v62 = vld [vmem:[%s9239_s1 + $0xea0] sm:$0xff] }
  0xc4   :  { %5221 = vmatprep.subr.bf16.mxu1 %v5220_v4  ;;  %v471_v4 = vld [vmem:[%s9239_s1 + $0xd50] sm:$0xff]  ;;  %v5254_v55 = vpack.c.bf16 %v494_v44, %v493_v43  ;;  %v5256_v57 = vpack.c.bf16 %v512_v50, %v511_v49  ;;  %v528_v61 = vld [vmem:[%s9239_s1 + $0xf18] sm:$0xff]  ;;  %v5272_v43 = vpack.c.bf16 %v520_v37, %v519_v52  ;;  %v521_v50 = vld [vmem:[%s9239_s1 + $0xee0] sm:$0xff] }
  0xc5   :  { %2186 = vmatmul.mubr.f32.vlgmr.msra.gmra.mrb[10].mxu0 %v6951_v31  ;;  %v433_v31 = vld [vmem:[%s9239_s1 + $0xc20] sm:$0xff]  ;;  %v503_v44 = vld [vmem:[%s9239_s1 + $0xe50] sm:$0xff]  ;;  %v536_v49 = vld [vmem:[%s9239_s1 + $0xf58] sm:$0xff] }
  0xc6   :  { %5191 = vmatpush3.bf16.msra.mxu0 %v5190_v12  ;;  %2256 = vmatmul.mubr.f32.vlgmr.msra.gmra.mrb[10].mxu1 %v6960_v34  ;;  %v466_v34 = vld [vmem:[%s9239_s1 + $0xd28] sm:$0xff]  ;;  %v5198_v38 = vpack.c.bf16 %v434_v30, %v433_v31  ;;  %v443_v31 = vld [vmem:[%s9239_s1 + $0xc70] sm:$0xff]  ;;  %v444_v30 = vld [vmem:[%s9239_s1 + $0xc78] sm:$0xff] }
  0xc7   :  { %5223 = vmatpush3.bf16.msra.mxu1 %v5222_v14  ;;  %5193 = vmatprep.subr.bf16.mxu0 %v5192_v15  ;;  %v5230_v39 = vpack.c.bf16 %v466_v34, %v465_v32  ;;  %v490_v12 = vld [vmem:[%s9239_s1 + $0xde8] sm:$0xff]  ;;  %v5210_v14 = vpack.c.bf16 %v440_v3, %v439_v2  ;;  %v5242_v15 = vpack.c.bf16 %v472_v6, %v471_v4  ;;  %v475_v32 = vld [vmem:[%s9239_s1 + $0xd70] sm:$0xff]  ;;  %v476_v34 = vld [vmem:[%s9239_s1 + $0xd78] sm:$0xff] }
  0xc8   :  { %5225 = vmatprep.subr.bf16.mxu1 %v5224_v19  ;;  %2325 = vmatprep.mubr.f32.mxu0 %v1202_v23  ;;  %v473_v19 = vld [vmem:[%s9239_s1 + $0xd60] sm:$0xff]  ;;  %v5244_v20 = vpack.c.bf16 %v490_v12, %v489_v11  ;;  %v460_v23 = vld [vmem:[%s9239_s1 + $0xcf8] sm:$0xff]  ;;  %v546_v2 = vld [vmem:[%s9239_s1 + $0xfa8] sm:$0xff] }
  0xc9   :  { %2395 = vmatprep.mubr.f32.mxu1 %v1203_v26  ;;  %v5214_v26 = vpack.c.bf16 %v442_v18, %v441_v17  ;;  %v515_v12 = vld [vmem:[%s9239_s1 + $0xeb0] sm:$0xff]  ;;  %v608_v52 = vld [vmem:[%s9239_s1 + $0x1198] sm:$0xff] }
  0xca   :  { %5195 = vmatpush3.bf16.msra.mxu0 %v5194_v27  ;;  %v36_v27 = vld [vmem:[%s9238_s0 + $0x38] sm:$0xff] }
  0xcb   :  { %5227 = vmatpush3.bf16.msra.mxu1 %v5226_v28  ;;  %5197 = vmatprep.subr.bf16.mxu0 %v5196_v29  ;;  %v5246_v28 = vpack.c.bf16 %v474_v21, %v473_v19  ;;  %v5216_v29 = vpack.c.bf16 %v460_v23, %v459_v22  ;;  %v7365_v51 = vrot.slane %v36_v27, %v6042_v13  ;;  %v500_v21 = vld [vmem:[%s9239_s1 + $0xe38] sm:$0xff]  ;;  %v531_v22 = vld [vmem:[%s9239_s1 + $0xf30] sm:$0xff] }
  0xcc   :  { %5229 = vmatprep.subr.bf16.mxu1 %v5228_v42  ;;  %v5248_v42 = vpack.c.bf16 %v492_v25, %v491_v24  ;;  %v532_v24 = vld [vmem:[%s9239_s1 + $0xf38] sm:$0xff]  ;;  %v517_v25 = vld [vmem:[%s9239_s1 + $0xec0] sm:$0xff] }
  0xce   :  { %5199 = vmatpush3.bf16.msra.mxu0 %v5198_v38  ;;  %v1204_v38 = vcombine.high %v36_v27, %v36_v27  ;;  %v549_v27 = vld [vmem:[%s9239_s1 + $0xfc0] sm:$0xff] }
  0xcf   :  { %5231 = vmatpush3.bf16.msra.mxu1 %v5230_v39  ;;  %5201 = vmatprep.subr.bf16.mxu0 %v5200_v40  ;;  %v5218_v39 = vpack.c.bf16 %v444_v30, %v443_v31  ;;  %v5250_v40 = vpack.c.bf16 %v476_v34, %v475_v32  ;;  %v5298_v31 = vpack.c.bf16 %v532_v24, %v531_v22  ;;  %v501_v32 = vld [vmem:[%s9239_s1 + $0xe40] sm:$0xff] }
  0xd0   :  { %5233 = vmatprep.subr.bf16.mxu1 %v5232_v46  ;;  %v525_v46 = vld [vmem:[%s9239_s1 + $0xf00] sm:$0xff] }
  0xd1   :  { %v5286_v56 = vpack.c.bf16 %v526_v48, %v525_v46  ;;  %v533_v34 = vld [vmem:[%s9239_s1 + $0xf40] sm:$0xff]  ;;  %v504_v46 = vld [vmem:[%s9239_s1 + $0xe58] sm:$0xff] }
  0xd2   :  { %5203 = vmatpush3.bf16.msra.mxu0 %v5202_v53  ;;  %v543_v53 = vld [vmem:[%s9239_s1 + $0xf90] sm:$0xff]  ;;  %v605_v22 = vld [vmem:[%s9239_s1 + $0x1180] sm:$0xff] }
  0xd3   :  { %5235 = vmatpush3.bf16.msra.mxu1 %v5234_v54  ;;  %5205 = vmatprep.subr.bf16.mxu0 %v5204_v33  ;;  %v544_v54 = vld [vmem:[%s9239_s1 + $0xf98] sm:$0xff]  ;;  %v7374_v33 = vrot.slane %v1204_v38, %v6042_v13  ;;  %v551_v38 = vld [vmem:[%s9239_s1 + $0xfd0] sm:$0xff] }
  0xd4   :  { %5237 = vmatprep.subr.bf16.mxu1 %v5236_v45  ;;  %v495_v45 = vld [vmem:[%s9239_s1 + $0xe10] sm:$0xff]  ;;  %v5288_v60 = vpack.c.bf16 %v544_v54, %v543_v53  ;;  %v522_v53 = vld [vmem:[%s9239_s1 + $0xee8] sm:$0xff]  ;;  %v553_v54 = vld [vmem:[%s9239_s1 + $0xfe0] sm:$0xff] }
  0xd5   :  { %v1220_v3 = vcombine.high %v7374_v33, %v7374_v33  ;;  %v5258_v4 = vpack.c.bf16 %v496_v58, %v495_v45  ;;  %v5276_v45 = vpack.c.bf16 %v522_v53, %v521_v50  ;;  %v505_v58 = vld [vmem:[%s9239_s1 + $0xe60] sm:$0xff] }
  0xd6   :  { %5207 = vmatpush3.bf16.msra.mxu0 %v5206_v63  ;;  %v514_v63 = vld [vmem:[%s9239_s1 + $0xea8] sm:$0xff]  ;;  %v609_v53 = vld [vmem:[%s9239_s1 + $0x11a0] sm:$0xff] }
  0xd7   :  { %5239 = vmatpush3.bf16.msra.mxu1 %v5238_v0  ;;  %5209 = vmatprep.subr.bf16.mxu0 %v5208_v1  ;;  %v1219_v0 = vcombine.high %v7365_v51, %v7365_v51  ;;  %v545_v1 = vld [vmem:[%s9239_s1 + $0xfa0] sm:$0xff]  ;;  %v5260_v6 = vpack.c.bf16 %v514_v63, %v513_v62  ;;  %v538_v63 = vld [vmem:[%s9239_s1 + $0xf68] sm:$0xff] }
  0xd8   :  { %5241 = vmatprep.subr.bf16.mxu1 %v5240_v5  ;;  %v5290_v5 = vpack.c.bf16 %v528_v61, %v527_v59  ;;  %v5292_v11 = vpack.c.bf16 %v546_v2, %v545_v1  ;;  %v506_v59 = vld [vmem:[%s9239_s1 + $0xe68] sm:$0xff]  ;;  %v524_v1 = vld [vmem:[%s9239_s1 + $0xef8] sm:$0xff] }
  0xda   :  { %5211 = vmatpush3.bf16.msra.mxu0 %v5210_v14  ;;  %v516_v14 = vld [vmem:[%s9239_s1 + $0xeb8] sm:$0xff] }
  0xdb   :  { %5243 = vmatpush3.bf16.msra.mxu1 %v5242_v15  ;;  %5213 = vmatprep.subr.bf16.mxu0 %v5212_v16  ;;  %v547_v15 = vld [vmem:[%s9239_s1 + $0xfb0] sm:$0xff]  ;;  %v548_v16 = vld [vmem:[%s9239_s1 + $0xfb8] sm:$0xff]  ;;  %v5264_v19 = vpack.c.bf16 %v516_v14, %v515_v12 }
  0xdc   :  { %5245 = vmatprep.subr.bf16.mxu1 %v5244_v20  ;;  %v499_v20 = vld [vmem:[%s9239_s1 + $0xe30] sm:$0xff]  ;;  %v5296_v23 = vpack.c.bf16 %v548_v16, %v547_v15  ;;  %v508_v15 = vld [vmem:[%s9239_s1 + $0xe78] sm:$0xff] }
  0xdd   :  { %v507_v14 = vld [vmem:[%s9239_s1 + $0xe70] sm:$0xff] }
  0xde   :  { %5215 = vmatpush3.bf16.msra.mxu0 %v5214_v26  ;;  %v518_v26 = vld [vmem:[%s9239_s1 + $0xec8] sm:$0xff]  ;;  %v539_v16 = vld [vmem:[%s9239_s1 + $0xf70] sm:$0xff] }
  0xdf   :  { %5247 = vmatpush3.bf16.msra.mxu1 %v5246_v28  ;;  %5217 = vmatprep.subr.bf16.mxu0 %v5216_v29  ;;  %v550_v28 = vld [vmem:[%s9239_s1 + $0xfc8] sm:$0xff]  ;;  %v5266_v29 = vpack.c.bf16 %v500_v21, %v499_v20  ;;  %v5268_v30 = vpack.c.bf16 %v518_v26, %v517_v25  ;;  %v5282_v25 = vpack.c.bf16 %v508_v15, %v507_v14 }
  0xe0   :  { %5249 = vmatprep.subr.bf16.mxu1 %v5248_v42  ;;  %v502_v42 = vld [vmem:[%s9239_s1 + $0xe48] sm:$0xff]  ;;  %v5300_v35 = vpack.c.bf16 %v550_v28, %v549_v27  ;;  %v557_v28 = vld [vmem:[%s9239_s1 + $0x1000] sm:$0xff] }
  0xe1   :  { %v574_v20 = vld [vmem:[%s9239_s1 + $0x1088] sm:$0xff] }
  0xe2   :  { %5219 = vmatpush3.bf16.msra.mxu0 %v5218_v39  ;;  %v552_v39 = vld [vmem:[%s9239_s1 + $0xfd8] sm:$0xff] }
  0xe3   :  { %5251 = vmatpush3.bf16.msra.mxu1 %v5250_v40  ;;  %5253 = vmatprep.subr.bf16.mxu0 %v5252_v41  ;;  %v5270_v40 = vpack.c.bf16 %v502_v42, %v501_v32  ;;  %v5302_v41 = vpack.c.bf16 %v534_v36, %v533_v34  ;;  %v5304_v48 = vpack.c.bf16 %v552_v39, %v551_v38  ;;  %v590_v32 = vld [vmem:[%s9239_s1 + $0x1108] sm:$0xff]  ;;  %v575_v42 = vld [vmem:[%s9239_s1 + $0x1090] sm:$0xff]  ;;  %v576_v34 = vld [vmem:[%s9239_s1 + $0x1098] sm:$0xff] }
  0xe4   :  { %5285 = vmatprep.subr.bf16.mxu1 %v5284_v47  ;;  %v535_v47 = vld [vmem:[%s9239_s1 + $0xf50] sm:$0xff] }
  0xe5   :  { %2326 = vmatmul.mubr.f32.vlgmr.msra.gmra.mrb[12].mxu0 %v7158_v8  ;;  %v497_v8 = vld [vmem:[%s9239_s1 + $0xe20] sm:$0xff]  ;;  %v607_v36 = vld [vmem:[%s9239_s1 + $0x1190] sm:$0xff] }
  0xe6   :  { %5255 = vmatpush3.bf16.msra.mxu0 %v5254_v55  ;;  %2396 = vmatmul.mubr.f32.vlgmr.msra.gmra.mrb[12].mxu1 %v7167_v10  ;;  %v530_v10 = vld [vmem:[%s9239_s1 + $0xf28] sm:$0xff]  ;;  %v5262_v17 = vpack.c.bf16 %v498_v7, %v497_v8  ;;  %v5278_v7 = vpack.c.bf16 %v506_v59, %v505_v58  ;;  %v593_v59 = vld [vmem:[%s9239_s1 + $0x1120] sm:$0xff] }
  0xe7   :  { %5287 = vmatpush3.bf16.msra.mxu1 %v5286_v56  ;;  %5257 = vmatprep.subr.bf16.mxu0 %v5256_v57  ;;  %v5294_v18 = vpack.c.bf16 %v530_v10, %v529_v9  ;;  %v554_v55 = vld [vmem:[%s9239_s1 + $0xfe8] sm:$0xff]  ;;  %v5274_v56 = vpack.c.bf16 %v504_v46, %v503_v44  ;;  %v5306_v57 = vpack.c.bf16 %v536_v49, %v535_v47  ;;  %v37_v9 = vld [vmem:[%s9238_s0 + $0x40] sm:$0xff]  ;;  %v591_v44 = vld [vmem:[%s9239_s1 + $0x1110] sm:$0xff] }
  0xe8   :  { %5289 = vmatprep.subr.bf16.mxu1 %v5288_v60  ;;  %2465 = vmatprep.mubr.f32.mxu0 %v1219_v0  ;;  %v537_v60 = vld [vmem:[%s9239_s1 + $0xf60] sm:$0xff]  ;;  %v5308_v62 = vpack.c.bf16 %v554_v55, %v553_v54  ;;  %v523_v0 = vld [vmem:[%s9239_s1 + $0xef0] sm:$0xff]  ;;  %v1221_v24 = vcombine.high %v37_v9, %v37_v9  ;;  %v5352_v46 = vpack.c.bf16 %v608_v52, %v607_v36  ;;  %v592_v47 = vld [vmem:[%s9239_s1 + $0x1118] sm:$0xff] }
  0xe9   :  { %2535 = vmatprep.mubr.f32.mxu1 %v1220_v3  ;;  %v5310_v10 = vpack.c.bf16 %v538_v63, %v537_v60  ;;  %v5280_v12 = vpack.c.bf16 %v524_v1, %v523_v0  ;;  %v578_v49 = vld [vmem:[%s9239_s1 + $0x10a8] sm:$0xff]  ;;  %v611_v63 = vld [vmem:[%s9239_s1 + $0x11b0] sm:$0xff]  ;;  %v612_v0 = vld [vmem:[%s9239_s1 + $0x11b8] sm:$0xff] }
  0xea   :  { %5259 = vmatpush3.bf16.msra.mxu0 %v5258_v4  ;;  %v555_v4 = vld [vmem:[%s9239_s1 + $0xff0] sm:$0xff]  ;;  %v7583_v37 = vrot.slane %v1221_v24, %v6042_v13  ;;  %v610_v54 = vld [vmem:[%s9239_s1 + $0x11a8] sm:$0xff] }
  0xeb   :  { %5291 = vmatpush3.bf16.msra.mxu1 %v5290_v5  ;;  %5261 = vmatprep.subr.bf16.mxu0 %v5260_v6  ;;  %v556_v5 = vld [vmem:[%s9239_s1 + $0xff8] sm:$0xff]  ;;  %v562_v58 = vld [vmem:[%s9239_s1 + $0x1028] sm:$0xff]  ;;  %v5356_v60 = vpack.c.bf16 %v610_v54, %v609_v53 }
  0xec   :  { %5293 = vmatprep.subr.bf16.mxu1 %v5292_v11  ;;  %v1237_v55 = vcombine.high %v7583_v37, %v7583_v37 }
  0xee   :  { %5263 = vmatpush3.bf16.msra.mxu0 %v5262_v17  ;;  %v5312_v17 = vpack.c.bf16 %v556_v5, %v555_v4  ;;  %v563_v4 = vld [vmem:[%s9239_s1 + $0x1030] sm:$0xff]  ;;  %v564_v5 = vld [vmem:[%s9239_s1 + $0x1038] sm:$0xff] }
  0xef   :  { %5295 = vmatpush3.bf16.msra.mxu1 %v5294_v18  ;;  %5265 = vmatprep.subr.bf16.mxu0 %v5264_v19  ;;  %v540_v18 = vld [vmem:[%s9239_s1 + $0xf78] sm:$0xff]  ;;  %v573_v19 = vld [vmem:[%s9239_s1 + $0x1080] sm:$0xff]  ;;  %v5330_v14 = vpack.c.bf16 %v564_v5, %v563_v4 }
  0xf0   :  { %5297 = vmatprep.subr.bf16.mxu1 %v5296_v23  ;;  %v606_v23 = vld [vmem:[%s9239_s1 + $0x1188] sm:$0xff]  ;;  %v5314_v26 = vpack.c.bf16 %v540_v18, %v539_v16  ;;  %v5316_v27 = vpack.c.bf16 %v574_v20, %v573_v19 }
  0xf2   :  { %5267 = vmatpush3.bf16.msra.mxu0 %v5266_v29  ;;  %v558_v29 = vld [vmem:[%s9239_s1 + $0x1008] sm:$0xff] }
  0xf3   :  { %5299 = vmatpush3.bf16.msra.mxu1 %v5298_v31  ;;  %5269 = vmatprep.subr.bf16.mxu0 %v5268_v30  ;;  %v589_v31 = vld [vmem:[%s9239_s1 + $0x1100] sm:$0xff]  ;;  %v5348_v30 = vpack.c.bf16 %v606_v23, %v605_v22  ;;  %v5318_v38 = vpack.c.bf16 %v558_v29, %v557_v28 }
  0xf4   :  { %5301 = vmatprep.subr.bf16.mxu1 %v5300_v35  ;;  %v7574_v35 = vrot.slane %v37_v9, %v6042_v13  ;;  %v5350_v39 = vpack.c.bf16 %v590_v32, %v589_v31  ;;  %v581_v9 = vld [vmem:[%s9239_s1 + $0x10c0] sm:$0xff] }
  0xf6   :  { %5271 = vmatpush3.bf16.msra.mxu0 %v5270_v40  ;;  %v5320_v40 = vpack.c.bf16 %v576_v34, %v575_v42  ;;  %v1236_v50 = vcombine.high %v7574_v35, %v7574_v35 }
  0xf7   :  { %5303 = vmatpush3.bf16.msra.mxu1 %v5302_v41  ;;  %5273 = vmatprep.subr.bf16.mxu0 %v5272_v43  ;;  %v559_v41 = vld [vmem:[%s9239_s1 + $0x1010] sm:$0xff]  ;;  %v560_v43 = vld [vmem:[%s9239_s1 + $0x1018] sm:$0xff] }
  0xf8   :  { %v3716_v61 = vpop.f32.mrb[0].mxu0  ;;  %5305 = vmatprep.subr.bf16.mxu1 %v5304_v48  ;;  %v577_v48 = vld [vmem:[%s9239_s1 + $0x10a0] sm:$0xff] }
  0xf9   :  { %v3751_v2 = vpop.f32.mrb[0].mxu1  ;;  %v3717_v3 = vpop.f32.mrb[1].mxu0 }
  0xfa   :  { %v3718_v6 = vadd.f32 %v3717_v3, %v3716_v61  ;;  %v3752_v8 = vpop.f32.mrb[1].mxu1  ;;  %5275 = vmatpush3.bf16.msra.mxu0 %v5274_v56  ;;  %v5322_v56 = vpack.c.bf16 %v560_v43, %v559_v41  ;;  %v579_v61 = vld [vmem:[%s9239_s1 + $0x10b0] sm:$0xff] }
  0xfb   :  { %v3753_v11 = vadd.f32 %v3752_v8, %v3751_v2  ;;  %5307 = vmatpush3.bf16.msra.mxu1 %v5306_v57  ;;  %5277 = vmatprep.subr.bf16.mxu0 %v5276_v45  ;;  %v5354_v57 = vpack.c.bf16 %v592_v47, %v591_v44  ;;  %v5324_v45 = vpack.c.bf16 %v578_v49, %v577_v48 }
  0xfc   :  { %5309 = vmatprep.subr.bf16.mxu1 %v5308_v62  ;;  %v580_v62 = vld [vmem:[%s9239_s1 + $0x10b8] sm:$0xff]  ;;  %v5360_v8 = vpack.c.bf16 %v612_v0, %v611_v63 }
  0xfd   :  { %v7547_v21 = vadd.f32 %v3753_v11, %v3718_v6  ;;  %v5328_v3 = vpack.c.bf16 %v580_v62, %v579_v61  ;;  %v595_v6 = vld [vmem:[%s9239_s1 + $0x1130] sm:$0xff]  ;;  %v582_v11 = vld [vmem:[%s9239_s1 + $0x10c8] sm:$0xff] }
  0xfe   :  { %5279 = vmatpush3.bf16.msra.mxu0 %v5278_v7  ;;  %v596_v7 = vld [vmem:[%s9239_s1 + $0x1138] sm:$0xff] }
  0xff   :  { %5311 = vmatpush3.bf16.msra.mxu1 %v5310_v10  ;;  %5281 = vmatprep.subr.bf16.mxu0 %v5280_v12  ;;  %v613_v10 = vld [vmem:[%s9239_s1 + $0x11c0] sm:$0xff]  ;;  %v614_v12 = vld [vmem:[%s9239_s1 + $0x11c8] sm:$0xff] }
 0x100   :  { %5313 = vmatprep.subr.bf16.mxu1 %v5312_v17 }
 0x102   :  { %5283 = vmatpush3.bf16.msra.mxu0 %v5282_v25 }
 0x103   :  { %5315 = vmatpush3.bf16.msra.mxu1 %v5314_v26  ;;  %5317 = vmatprep.subr.bf16.mxu0 %v5316_v27 }
 0x104   :  { %5349 = vmatprep.subr.bf16.mxu1 %v5348_v30 }
 0x105   :  { %2466 = vmatmul.mubr.f32.vlgmr.msra.gmra.mrb[14].mxu0 %v7365_v51  ;;  %v561_v51 = vld [vmem:[%s9239_s1 + $0x1020] sm:$0xff] }
 0x106   :  { %5319 = vmatpush3.bf16.msra.mxu0 %v5318_v38  ;;  %2536 = vmatmul.mubr.f32.vlgmr.msra.gmra.mrb[14].mxu1 %v7374_v33  ;;  %v594_v33 = vld [vmem:[%s9239_s1 + $0x1128] sm:$0xff]  ;;  %v5326_v1 = vpack.c.bf16 %v562_v58, %v561_v51 }
 0x107   :  { %5351 = vmatpush3.bf16.msra.mxu1 %v5350_v39  ;;  %5321 = vmatprep.subr.bf16.mxu0 %v5320_v40  ;;  %v5358_v2 = vpack.c.bf16 %v594_v33, %v593_v59 }
 0x108   :  { %5353 = vmatprep.subr.bf16.mxu1 %v5352_v46  ;;  %2605 = vmatprep.mubr.f32.mxu0 %v1236_v50 }
 0x109   :  { %2675 = vmatprep.mubr.f32.mxu1 %v1237_v55 }
 0x10a   :  { %5323 = vmatpush3.bf16.msra.mxu0 %v5322_v56 }
 0x10b   :  { %5355 = vmatpush3.bf16.msra.mxu1 %v5354_v57  ;;  %5325 = vmatprep.subr.bf16.mxu0 %v5324_v45 }
 0x10c   :  { %5357 = vmatprep.subr.bf16.mxu1 %v5356_v60 }
 0x10e   :  { %5327 = vmatpush3.bf16.msra.mxu0 %v5326_v1 }
 0x10f   :  { %8 = vsyncpa [#allocation4], 0  ;;  %5359 = vmatpush3.bf16.msra.mxu1 %v5358_v2  ;;  %5329 = vmatprep.subr.bf16.mxu0 %v5328_v3  ;;  %v5362_v15 = vpack.c.bf16 %v596_v7, %v595_v6  ;;  %v5332_v16 = vpack.c.bf16 %v582_v11, %v581_v9  ;;  %v565_v17 = vld [vmem:[%s9239_s1 + $0x1040] sm:$0xff]  ;;  %v566_v18 = vld [vmem:[%s9239_s1 + $0x1048] sm:$0xff]  ;;  %v5364_v20 = vpack.c.bf16 %v614_v12, %v613_v10  ;;  %vm26_vm0 = vcmask 17408  }
 0x110   :  { %v597_v19 = vld [vmem:[%s9239_s1 + $0x1140] sm:$0xff]  ;;  %5361 = vmatprep.subr.bf16.mxu1 %v5360_v8  ;;  %v598_v22 = vld [vmem:[%s9239_s1 + $0x1148] sm:$0xff]  ;;  %v583_v23 = vld [vmem:[%s9239_s1 + $0x10d0] sm:$0xff]  ;;  %v5334_v27 = vpack.c.bf16 %v566_v18, %v565_v17 }
 0x111   :  { %v584_v24 = vld [vmem:[%s9239_s1 + $0x10d8] sm:$0xff]  ;;  %v615_v25 = vld [vmem:[%s9239_s1 + $0x11d0] sm:$0xff]  ;;  %v5366_v28 = vpack.c.bf16 %v598_v22, %v597_v19  ;;  %v585_v36 = vld [vmem:[%s9239_s1 + $0x10e0] sm:$0xff] }
 0x112   :  { %v616_v26 = vld [vmem:[%s9239_s1 + $0x11d8] sm:$0xff]  ;;  %5331 = vmatpush3.bf16.msra.mxu0 %v5330_v14  ;;  %v5336_v29 = vpack.c.bf16 %v584_v24, %v583_v23  ;;  %v567_v31 = vld [vmem:[%s9239_s1 + $0x1050] sm:$0xff]  ;;  %v586_v52 = vld [vmem:[%s9239_s1 + $0x10e8] sm:$0xff] }
 0x113   :  { %5363 = vmatpush3.bf16.msra.mxu1 %v5362_v15  ;;  %5333 = vmatprep.subr.bf16.mxu0 %v5332_v16  ;;  %v568_v30 = vld [vmem:[%s9239_s1 + $0x1058] sm:$0xff]  ;;  %v599_v32 = vld [vmem:[%s9239_s1 + $0x1150] sm:$0xff]  ;;  %v5368_v42 = vpack.c.bf16 %v616_v26, %v615_v25  ;;  %v617_v38 = vld [vmem:[%s9239_s1 + $0x11e0] sm:$0xff]  ;;  %v5340_v43 = vpack.c.bf16 %v586_v52, %v585_v36 }
 0x114   :  { %5365 = vmatprep.subr.bf16.mxu1 %v5364_v20  ;;  %v600_v34 = vld [vmem:[%s9239_s1 + $0x1158] sm:$0xff]  ;;  %v618_v39 = vld [vmem:[%s9239_s1 + $0x11e8] sm:$0xff]  ;;  %v5338_v40 = vpack.c.bf16 %v568_v30, %v567_v31  ;;  %v569_v44 = vld [vmem:[%s9239_s1 + $0x1060] sm:$0xff] }
 0x115   :  { %v5370_v41 = vpack.c.bf16 %v600_v34, %v599_v32  ;;  %v570_v46 = vld [vmem:[%s9239_s1 + $0x1068] sm:$0xff]  ;;  %v601_v47 = vld [vmem:[%s9239_s1 + $0x1160] sm:$0xff]  ;;  %v5372_v49 = vpack.c.bf16 %v618_v39, %v617_v38  ;;  %v587_v53 = vld [vmem:[%s9239_s1 + $0x10f0] sm:$0xff] }
 0x116   :  { %5335 = vmatpush3.bf16.msra.mxu0 %v5334_v27  ;;  %v602_v50 = vld [vmem:[%s9239_s1 + $0x1168] sm:$0xff]  ;;  %v588_v54 = vld [vmem:[%s9239_s1 + $0x10f8] sm:$0xff]  ;;  %v619_v57 = vld [vmem:[%s9239_s1 + $0x11f0] sm:$0xff]  ;;  %v5342_v59 = vpack.c.bf16 %v570_v46, %v569_v44 }
 0x117   :  { %5367 = vmatpush3.bf16.msra.mxu1 %v5366_v28  ;;  %5337 = vmatprep.subr.bf16.mxu0 %v5336_v29  ;;  %v620_v45 = vld [vmem:[%s9239_s1 + $0x11f8] sm:$0xff]  ;;  %v38_v60 = vld [vmem:[%s9238_s0 + $0x48] sm:$0xff]  ;;  %v5374_v61 = vpack.c.bf16 %v602_v50, %v601_v47  ;;  %v5344_v62 = vpack.c.bf16 %v588_v54, %v587_v53  ;;  %v571_v63 = vld [vmem:[%s9239_s1 + $0x1070] sm:$0xff] }
 0x118   :  { %v3786_v48 = vpop.f32.mrb[2].mxu0  ;;  %5369 = vmatprep.subr.bf16.mxu1 %v5368_v42  ;;  %v572_v0 = vld [vmem:[%s9239_s1 + $0x1078] sm:$0xff]  ;;  %v603_v1 = vld [vmem:[%s9239_s1 + $0x1170] sm:$0xff]  ;;  %v5376_v3 = vpack.c.bf16 %v620_v45, %v619_v57  ;;  %v637_v5 = vld [vmem:[%s9239_s1 + $0x1280] sm:$0xff]  ;;  %v1238_v7 = vcombine.high %v38_v60, %v38_v60  ;;  %v7784_v22 = vrot.slane %v38_v60, %v6042_v13 }
 0x119   :  { %v3787_v55 = vpop.f32.mrb[3].mxu0  ;;  %v3821_v56 = vpop.f32.mrb[2].mxu1  ;;  %v604_v4 = vld [vmem:[%s9239_s1 + $0x1178] sm:$0xff]  ;;  %v638_v6 = vld [vmem:[%s9239_s1 + $0x1288] sm:$0xff]  ;;  %v669_v8 = vld [vmem:[%s9239_s1 + $0x1380] sm:$0xff]  ;;  %v5346_v11 = vpack.c.bf16 %v572_v0, %v571_v63 }
 0x11a   :  { %v3788_v51 = vadd.f32 %v3787_v55, %v3786_v48  ;;  %5339 = vmatpush3.bf16.msra.mxu0 %v5338_v40  ;;  %v3822_v58 = vpop.f32.mrb[3].mxu1  ;;  %v5378_v10 = vpack.c.bf16 %v604_v4, %v603_v1  ;;  %v5380_v12 = vpack.c.bf16 %v638_v6, %v637_v5  ;;  %v621_v14 = vld [vmem:[%s9239_s1 + $0x1200] sm:$0xff]  ;;  %v622_v15 = vld [vmem:[%s9239_s1 + $0x1208] sm:$0xff]  ;;  %v639_v19 = vld [vmem:[%s9239_s1 + $0x1290] sm:$0xff]  ;;  %v7793_v25 = vrot.slane %v1238_v7, %v6042_v13 }
 0x11b   :  { %v3823_v33 = vadd.f32 %v3822_v58, %v3821_v56  ;;  %5371 = vmatpush3.bf16.msra.mxu1 %v5370_v41  ;;  %5341 = vmatprep.subr.bf16.mxu0 %v5340_v43  ;;  %v653_v16 = vld [vmem:[%s9239_s1 + $0x1300] sm:$0xff]  ;;  %v654_v18 = vld [vmem:[%s9239_s1 + $0x1308] sm:$0xff]  ;;  %v640_v20 = vld [vmem:[%s9239_s1 + $0x1298] sm:$0xff]  ;;  %v5382_v26 = vpack.c.bf16 %v622_v15, %v621_v14  ;;  %v1253_v52 = vcombine.high %v7784_v22, %v7784_v22 }
 0x11c   :  { %v1628_v2 = vadd.f32 %v3788_v51, %v7547_v21  ;;  %5373 = vmatprep.subr.bf16.mxu1 %v5372_v49  ;;  %v670_v21 = vld [vmem:[%s9239_s1 + $0x1388] sm:$0xff]  ;;  %v671_v23 = vld [vmem:[%s9239_s1 + $0x1390] sm:$0xff]  ;;  %v672_v24 = vld [vmem:[%s9239_s1 + $0x1398] sm:$0xff]  ;;  %v5414_v27 = vpack.c.bf16 %v654_v18, %v653_v16  ;;  %v5384_v28 = vpack.c.bf16 %v640_v20, %v639_v19  ;;  %v1254_v40 = vcombine.high %v7793_v25, %v7793_v25 }
 0x11d   :  { %v5412_v17 = vpack.c.bf16 %v670_v21, %v669_v8  ;;  %v623_v29 = vld [vmem:[%s9239_s1 + $0x1210] sm:$0xff]  ;;  %v624_v31 = vld [vmem:[%s9239_s1 + $0x1218] sm:$0xff]  ;;  %v5416_v32 = vpack.c.bf16 %v672_v24, %v671_v23  ;;  %v641_v34 = vld [vmem:[%s9239_s1 + $0x12a0] sm:$0xff] }
 0x11e   :  { %v7763_v9 = vadd.f32 %v3823_v33, %v1628_v2  ;;  %5343 = vmatpush3.bf16.msra.mxu0 %v5342_v59  ;;  %v655_v30 = vld [vmem:[%s9239_s1 + $0x1310] sm:$0xff]  ;;  %v656_v42 = vld [vmem:[%s9239_s1 + $0x1318] sm:$0xff]  ;;  %v642_v36 = vld [vmem:[%s9239_s1 + $0x12a8] sm:$0xff]  ;;  %v5386_v41 = vpack.c.bf16 %v624_v31, %v623_v29 }
 0x11f   :  { %5375 = vmatpush3.bf16.msra.mxu1 %v5374_v61  ;;  %5345 = vmatprep.subr.bf16.mxu0 %v5344_v62  ;;  %v673_v38 = vld [vmem:[%s9239_s1 + $0x13a0] sm:$0xff]  ;;  %v674_v39 = vld [vmem:[%s9239_s1 + $0x13a8] sm:$0xff]  ;;  %v5418_v43 = vpack.c.bf16 %v656_v42, %v655_v30  ;;  %v5388_v44 = vpack.c.bf16 %v642_v36, %v641_v34  ;;  %v643_v49 = vld [vmem:[%s9239_s1 + $0x12b0] sm:$0xff] }
 0x120   :  { %5377 = vmatprep.subr.bf16.mxu1 %v5376_v3  ;;  %v626_v46 = vld [vmem:[%s9239_s1 + $0x1228] sm:$0xff]  ;;  %v657_v47 = vld [vmem:[%s9239_s1 + $0x1320] sm:$0xff]  ;;  %v5420_v48 = vpack.c.bf16 %v674_v39, %v673_v38  ;;  %v644_v50 = vld [vmem:[%s9239_s1 + $0x12b8] sm:$0xff] }
 0x121   :  { %v675_v53 = vld [vmem:[%s9239_s1 + $0x13b0] sm:$0xff]  ;;  %v676_v54 = vld [vmem:[%s9239_s1 + $0x13b8] sm:$0xff]  ;;  %v5392_v57 = vpack.c.bf16 %v644_v50, %v643_v49  ;;  %v645_v33 = vld [vmem:[%s9239_s1 + $0x12c0] sm:$0xff] }
 0x122   :  { %5347 = vmatpush3.bf16.msra.mxu0 %v5346_v11  ;;  %v627_v45 = vld [vmem:[%s9239_s1 + $0x1230] sm:$0xff]  ;;  %v628_v51 = vld [vmem:[%s9239_s1 + $0x1238] sm:$0xff]  ;;  %v5424_v59 = vpack.c.bf16 %v676_v54, %v675_v53  ;;  %v646_v61 = vld [vmem:[%s9239_s1 + $0x12c8] sm:$0xff] }
 0x123   :  { %5379 = vmatpush3.bf16.msra.mxu1 %v5378_v10  ;;  %5381 = vmatprep.subr.bf16.mxu0 %v5380_v12  ;;  %v659_v58 = vld [vmem:[%s9239_s1 + $0x1330] sm:$0xff]  ;;  %v660_v60 = vld [vmem:[%s9239_s1 + $0x1338] sm:$0xff]  ;;  %v677_v62 = vld [vmem:[%s9239_s1 + $0x13c0] sm:$0xff]  ;;  %v5394_v0 = vpack.c.bf16 %v628_v51, %v627_v45  ;;  %v5396_v2 = vpack.c.bf16 %v646_v61, %v645_v33 }
 0x124   :  { %5413 = vmatprep.subr.bf16.mxu1 %v5412_v17  ;;  %v678_v63 = vld [vmem:[%s9239_s1 + $0x13c8] sm:$0xff]  ;;  %v5426_v1 = vpack.c.bf16 %v660_v60, %v659_v58  ;;  %v629_v3 = vld [vmem:[%s9239_s1 + $0x1240] sm:$0xff]  ;;  %v647_v21 = vld [vmem:[%s9239_s1 + $0x12d0] sm:$0xff] }
 0x125   :  { %2606 = vmatmul.mubr.f32.vlgmr.msra.gmra.mrb[16].mxu0 %v7574_v35  ;;  %v625_v35 = vld [vmem:[%s9239_s1 + $0x1220] sm:$0xff]  ;;  %v630_v4 = vld [vmem:[%s9239_s1 + $0x1248] sm:$0xff]  ;;  %v5428_v6 = vpack.c.bf16 %v678_v63, %v677_v62  ;;  %v648_v7 = vld [vmem:[%s9239_s1 + $0x12d8] sm:$0xff] }
 0x126   :  { %5383 = vmatpush3.bf16.msra.mxu0 %v5382_v26  ;;  %2676 = vmatmul.mubr.f32.vlgmr.msra.gmra.mrb[16].mxu1 %v7583_v37  ;;  %v658_v37 = vld [vmem:[%s9239_s1 + $0x1328] sm:$0xff]  ;;  %v5390_v55 = vpack.c.bf16 %v626_v46, %v625_v35  ;;  %v661_v5 = vld [vmem:[%s9239_s1 + $0x1340] sm:$0xff]  ;;  %v679_v11 = vld [vmem:[%s9239_s1 + $0x13d0] sm:$0xff]  ;;  %v5398_v12 = vpack.c.bf16 %v630_v4, %v629_v3  ;;  %v5400_v15 = vpack.c.bf16 %v648_v7, %v647_v21 }
 0x127   :  { %5415 = vmatpush3.bf16.msra.mxu1 %v5414_v27  ;;  %5385 = vmatprep.subr.bf16.mxu0 %v5384_v28  ;;  %v5422_v56 = vpack.c.bf16 %v658_v37, %v657_v47  ;;  %v662_v8 = vld [vmem:[%s9239_s1 + $0x1348] sm:$0xff]  ;;  %v680_v10 = vld [vmem:[%s9239_s1 + $0x13d8] sm:$0xff]  ;;  %v631_v16 = vld [vmem:[%s9239_s1 + $0x1250] sm:$0xff] }
 0x128   :  { %5417 = vmatprep.subr.bf16.mxu1 %v5416_v32  ;;  %2745 = vmatprep.mubr.f32.mxu0 %v1253_v52  ;;  %v5430_v14 = vpack.c.bf16 %v662_v8, %v661_v5  ;;  %v632_v17 = vld [vmem:[%s9239_s1 + $0x1258] sm:$0xff]  ;;  %v663_v18 = vld [vmem:[%s9239_s1 + $0x1350] sm:$0xff]  ;;  %v5432_v19 = vpack.c.bf16 %v680_v10, %v679_v11  ;;  %v649_v23 = vld [vmem:[%s9239_s1 + $0x12e0] sm:$0xff] }
 0x129   :  { %2815 = vmatprep.mubr.f32.mxu1 %v1254_v40  ;;  %v664_v20 = vld [vmem:[%s9239_s1 + $0x1358] sm:$0xff]  ;;  %v650_v24 = vld [vmem:[%s9239_s1 + $0x12e8] sm:$0xff]  ;;  %v681_v26 = vld [vmem:[%s9239_s1 + $0x13e0] sm:$0xff]  ;;  %v5402_v28 = vpack.c.bf16 %v632_v17, %v631_v16 }
 0x12a   :  { %5387 = vmatpush3.bf16.msra.mxu0 %v5386_v41  ;;  %v682_v27 = vld [vmem:[%s9239_s1 + $0x13e8] sm:$0xff]  ;;  %v5434_v29 = vpack.c.bf16 %v664_v20, %v663_v18  ;;  %v5404_v31 = vpack.c.bf16 %v650_v24, %v649_v23  ;;  %v633_v30 = vld [vmem:[%s9239_s1 + $0x1260] sm:$0xff]  ;;  %v651_v38 = vld [vmem:[%s9239_s1 + $0x12f0] sm:$0xff] }
 0x12b   :  { %5419 = vmatpush3.bf16.msra.mxu1 %v5418_v43  ;;  %5389 = vmatprep.subr.bf16.mxu0 %v5388_v44  ;;  %v634_v32 = vld [vmem:[%s9239_s1 + $0x1268] sm:$0xff]  ;;  %v665_v42 = vld [vmem:[%s9239_s1 + $0x1360] sm:$0xff]  ;;  %v5436_v36 = vpack.c.bf16 %v682_v27, %v681_v26  ;;  %v652_v39 = vld [vmem:[%s9239_s1 + $0x12f8] sm:$0xff] }
 0x12c   :  { %5421 = vmatprep.subr.bf16.mxu1 %v5420_v48  ;;  %v666_v52 = vld [vmem:[%s9239_s1 + $0x1368] sm:$0xff]  ;;  %v683_v43 = vld [vmem:[%s9239_s1 + $0x13f0] sm:$0xff]  ;;  %v684_v44 = vld [vmem:[%s9239_s1 + $0x13f8] sm:$0xff]  ;;  %v5406_v47 = vpack.c.bf16 %v634_v32, %v633_v30  ;;  %v5408_v50 = vpack.c.bf16 %v652_v39, %v651_v38 }
 0x12d   :  { %v39_v48 = vld [vmem:[%s9238_s0 + $0x50] sm:$0xff]  ;;  %v5438_v49 = vpack.c.bf16 %v666_v52, %v665_v42  ;;  %v636_v54 = vld [vmem:[%s9239_s1 + $0x1278] sm:$0xff]  ;;  %v701_v51 = vld [vmem:[%s9239_s1 + $0x1480] sm:$0xff] }
 0x12e   :  { %5391 = vmatpush3.bf16.msra.mxu0 %v5390_v55  ;;  %v635_v53 = vld [vmem:[%s9239_s1 + $0x1270] sm:$0xff]  ;;  %v668_v45 = vld [vmem:[%s9239_s1 + $0x1378] sm:$0xff]  ;;  %v702_v58 = vld [vmem:[%s9239_s1 + $0x1488] sm:$0xff]  ;;  %v1255_v60 = vcombine.high %v39_v48, %v39_v48  ;;  %v7994_v8 = vrot.slane %v39_v48, %v6042_v13 }
 0x12f   :  { %5423 = vmatpush3.bf16.msra.mxu1 %v5422_v56  ;;  %5393 = vmatprep.subr.bf16.mxu0 %v5392_v57  ;;  %v667_v55 = vld [vmem:[%s9239_s1 + $0x1370] sm:$0xff]  ;;  %v5440_v57 = vpack.c.bf16 %v684_v44, %v683_v43  ;;  %v5410_v61 = vpack.c.bf16 %v636_v54, %v635_v53  ;;  %v5444_v63 = vpack.c.bf16 %v702_v58, %v701_v51  ;;  %v718_v4 = vld [vmem:[%s9239_s1 + $0x1508] sm:$0xff]  ;;  %v736_v7 = vld [vmem:[%s9239_s1 + $0x1598] sm:$0xff] }
 0x130   :  { %5425 = vmatprep.subr.bf16.mxu1 %v5424_v59  ;;  %v733_v59 = vld [vmem:[%s9239_s1 + $0x1580] sm:$0xff]  ;;  %v5442_v62 = vpack.c.bf16 %v668_v45, %v667_v55  ;;  %v703_v5 = vld [vmem:[%s9239_s1 + $0x1490] sm:$0xff]  ;;  %v8003_v11 = vrot.slane %v1255_v60, %v6042_v13  ;;  %v688_v16 = vld [vmem:[%s9239_s1 + $0x1418] sm:$0xff]  ;;  %v1270_v24 = vcombine.high %v7994_v8, %v7994_v8 }
 0x131   :  { %v735_v21 = vld [vmem:[%s9239_s1 + $0x1590] sm:$0xff]  ;;  %v705_v20 = vld [vmem:[%s9239_s1 + $0x14a0] sm:$0xff]  ;;  %v706_v23 = vld [vmem:[%s9239_s1 + $0x14a8] sm:$0xff] }
 0x132   :  { %5395 = vmatpush3.bf16.msra.mxu0 %v5394_v0  ;;  %v685_v0 = vld [vmem:[%s9239_s1 + $0x1400] sm:$0xff]  ;;  %v719_v17 = vld [vmem:[%s9239_s1 + $0x1510] sm:$0xff]  ;;  %v5480_v18 = vpack.c.bf16 %v736_v7, %v735_v21  ;;  %v738_v27 = vld [vmem:[%s9239_s1 + $0x15a8] sm:$0xff]  ;;  %v5452_v30 = vpack.c.bf16 %v706_v23, %v705_v20 }
 0x133   :  { %5427 = vmatpush3.bf16.msra.mxu1 %v5426_v1  ;;  %5397 = vmatprep.subr.bf16.mxu0 %v5396_v2  ;;  %v686_v1 = vld [vmem:[%s9239_s1 + $0x1408] sm:$0xff]  ;;  %v717_v2 = vld [vmem:[%s9239_s1 + $0x1500] sm:$0xff]  ;;  %v708_v52 = vld [vmem:[%s9239_s1 + $0x14b8] sm:$0xff] }
 0x134   :  { %5429 = vmatprep.subr.bf16.mxu1 %v5428_v6  ;;  %v704_v6 = vld [vmem:[%s9239_s1 + $0x1498] sm:$0xff]  ;;  %v5446_v10 = vpack.c.bf16 %v686_v1, %v685_v0  ;;  %v737_v26 = vld [vmem:[%s9239_s1 + $0x15a0] sm:$0xff]  ;;  %v690_v32 = vld [vmem:[%s9239_s1 + $0x1428] sm:$0xff] }
 0x135   :  { %v721_v42 = vld [vmem:[%s9239_s1 + $0x1520] sm:$0xff]  ;;  %v739_v38 = vld [vmem:[%s9239_s1 + $0x15b0] sm:$0xff]  ;;  %v740_v39 = vld [vmem:[%s9239_s1 + $0x15b8] sm:$0xff] }
 0x136   :  { %5399 = vmatpush3.bf16.msra.mxu0 %v5398_v12  ;;  %v5478_v12 = vpack.c.bf16 %v718_v4, %v717_v2  ;;  %v691_v44 = vld [vmem:[%s9239_s1 + $0x1430] sm:$0xff]  ;;  %v724_v48 = vld [vmem:[%s9239_s1 + $0x1538] sm:$0xff]  ;;  %v742_v53 = vld [vmem:[%s9239_s1 + $0x15c8] sm:$0xff] }
 0x137   :  { %5431 = vmatpush3.bf16.msra.mxu1 %v5430_v14  ;;  %5401 = vmatprep.subr.bf16.mxu0 %v5400_v15  ;;  %v5448_v14 = vpack.c.bf16 %v704_v6, %v703_v5  ;;  %v687_v15 = vld [vmem:[%s9239_s1 + $0x1410] sm:$0xff]  ;;  %v694_v45 = vld [vmem:[%s9239_s1 + $0x1448] sm:$0xff]  ;;  %v725_v51 = vld [vmem:[%s9239_s1 + $0x1540] sm:$0xff] }
 0x138   :  { %v3856_v34 = vpop.f32.mrb[4].mxu0  ;;  %5433 = vmatprep.subr.bf16.mxu1 %v5432_v19  ;;  %v720_v19 = vld [vmem:[%s9239_s1 + $0x1518] sm:$0xff]  ;;  %v695_v2 = vld [vmem:[%s9239_s1 + $0x1450] sm:$0xff]  ;;  %v713_v21 = vld [vmem:[%s9239_s1 + $0x14e0] sm:$0xff] }
 0x139   :  { %v3857_v40 = vpop.f32.mrb[5].mxu0  ;;  %v3891_v41 = vpop.f32.mrb[4].mxu1  ;;  %v712_v60 = vld [vmem:[%s9239_s1 + $0x14d8] sm:$0xff]  ;;  %v727_v4 = vld [vmem:[%s9239_s1 + $0x1550] sm:$0xff]  ;;  %v714_v7 = vld [vmem:[%s9239_s1 + $0x14e8] sm:$0xff] }
 0x13a   :  { %v3858_v35 = vadd.f32 %v3857_v40, %v3856_v34  ;;  %5403 = vmatpush3.bf16.msra.mxu0 %v5402_v28  ;;  %v3892_v46 = vpop.f32.mrb[5].mxu1  ;;  %v1271_v28 = vcombine.high %v8003_v11, %v8003_v11  ;;  %v5484_v34 = vpack.c.bf16 %v738_v27, %v737_v26  ;;  %v728_v6 = vld [vmem:[%s9239_s1 + $0x1558] sm:$0xff]  ;;  %v715_v26 = vld [vmem:[%s9239_s1 + $0x14f0] sm:$0xff] }
 0x13b   :  { %v3893_v37 = vadd.f32 %v3892_v46, %v3891_v41  ;;  %5435 = vmatpush3.bf16.msra.mxu1 %v5434_v29  ;;  %5405 = vmatprep.subr.bf16.mxu0 %v5404_v31  ;;  %v5450_v29 = vpack.c.bf16 %v688_v16, %v687_v15  ;;  %v5482_v31 = vpack.c.bf16 %v720_v19, %v719_v17  ;;  %v723_v46 = vld [vmem:[%s9239_s1 + $0x1530] sm:$0xff]  ;;  %v697_v17 = vld [vmem:[%s9239_s1 + $0x1460] sm:$0xff]  ;;  %v716_v27 = vld [vmem:[%s9239_s1 + $0x14f8] sm:$0xff] }
 0x13c   :  { %v1768_v56 = vadd.f32 %v3858_v35, %v7763_v9  ;;  %5437 = vmatprep.subr.bf16.mxu1 %v5436_v36  ;;  %v734_v9 = vld [vmem:[%s9239_s1 + $0x1588] sm:$0xff]  ;;  %v707_v36 = vld [vmem:[%s9239_s1 + $0x14b0] sm:$0xff]  ;;  %v692_v35 = vld [vmem:[%s9239_s1 + $0x1438] sm:$0xff]  ;;  %v5490_v55 = vpack.c.bf16 %v724_v48, %v723_v46  ;;  %v5498_v15 = vpack.c.bf16 %v728_v6, %v727_v4  ;;  %v5468_v16 = vpack.c.bf16 %v714_v7, %v713_v21 }
 0x13d   :  { %v5476_v3 = vpack.c.bf16 %v734_v9, %v733_v59  ;;  %v5456_v43 = vpack.c.bf16 %v708_v52, %v707_v36  ;;  %v5458_v54 = vpack.c.bf16 %v692_v35, %v691_v44  ;;  %v726_v59 = vld [vmem:[%s9239_s1 + $0x1548] sm:$0xff]  ;;  %v711_v9 = vld [vmem:[%s9239_s1 + $0x14d0] sm:$0xff]  ;;  %v729_v19 = vld [vmem:[%s9239_s1 + $0x1560] sm:$0xff]  ;;  %v5472_v52 = vpack.c.bf16 %v716_v27, %v715_v26 }
 0x13e   :  { %v7973_v33 = vadd.f32 %v3893_v37, %v1768_v56  ;;  %5407 = vmatpush3.bf16.msra.mxu0 %v5406_v47  ;;  %v5488_v47 = vpack.c.bf16 %v740_v39, %v739_v38  ;;  %v709_v37 = vld [vmem:[%s9239_s1 + $0x14c0] sm:$0xff]  ;;  %v5494_v0 = vpack.c.bf16 %v726_v59, %v725_v51  ;;  %v5464_v1 = vpack.c.bf16 %v712_v60, %v711_v9  ;;  %v699_v38 = vld [vmem:[%s9239_s1 + $0x1470] sm:$0xff]  ;;  %v700_v39 = vld [vmem:[%s9239_s1 + $0x1478] sm:$0xff] }
 0x13f   :  { %5439 = vmatpush3.bf16.msra.mxu1 %v5438_v49  ;;  %5409 = vmatprep.subr.bf16.mxu0 %v5408_v50  ;;  %v710_v49 = vld [vmem:[%s9239_s1 + $0x14c8] sm:$0xff]  ;;  %v741_v50 = vld [vmem:[%s9239_s1 + $0x15c0] sm:$0xff]  ;;  %v732_v44 = vld [vmem:[%s9239_s1 + $0x1578] sm:$0xff] }
 0x140   :  { %5441 = vmatprep.subr.bf16.mxu1 %v5440_v57  ;;  %v5460_v56 = vpack.c.bf16 %v710_v49, %v709_v37  ;;  %v693_v57 = vld [vmem:[%s9239_s1 + $0x1440] sm:$0xff]  ;;  %v5492_v58 = vpack.c.bf16 %v742_v53, %v741_v50  ;;  %v766_v46 = vld [vmem:[%s9239_s1 + $0x1688] sm:$0xff]  ;;  %v5474_v49 = vpack.c.bf16 %v700_v39, %v699_v38  ;;  %v767_v51 = vld [vmem:[%s9239_s1 + $0x1690] sm:$0xff] }
 0x141   :  { %v765_v35 = vld [vmem:[%s9239_s1 + $0x1680] sm:$0xff]  ;;  %v799_v9 = vld [vmem:[%s9239_s1 + $0x1790] sm:$0xff]  ;;  %v800_v60 = vld [vmem:[%s9239_s1 + $0x1798] sm:$0xff] }
 0x142   :  { %5411 = vmatpush3.bf16.msra.mxu0 %v5410_v61  ;;  %v743_v61 = vld [vmem:[%s9239_s1 + $0x15d0] sm:$0xff]  ;;  %v5508_v53 = vpack.c.bf16 %v766_v46, %v765_v35  ;;  %v5544_v4 = vpack.c.bf16 %v800_v60, %v799_v9  ;;  %v769_v6 = vld [vmem:[%s9239_s1 + $0x16a0] sm:$0xff]  ;;  %v770_v21 = vld [vmem:[%s9239_s1 + $0x16a8] sm:$0xff] }
 0x143   :  { %5443 = vmatpush3.bf16.msra.mxu1 %v5442_v62  ;;  %5445 = vmatprep.subr.bf16.mxu0 %v5444_v63  ;;  %v744_v62 = vld [vmem:[%s9239_s1 + $0x15d8] sm:$0xff]  ;;  %v5462_v63 = vpack.c.bf16 %v694_v45, %v693_v57  ;;  %v782_v45 = vld [vmem:[%s9239_s1 + $0x1708] sm:$0xff]  ;;  %v803_v26 = vld [vmem:[%s9239_s1 + $0x17b0] sm:$0xff] }
 0x144   :  { %5477 = vmatprep.subr.bf16.mxu1 %v5476_v3  ;;  %v696_v3 = vld [vmem:[%s9239_s1 + $0x1458] sm:$0xff]  ;;  %v5496_v5 = vpack.c.bf16 %v744_v62, %v743_v61  ;;  %v806_v38 = vld [vmem:[%s9239_s1 + $0x17c8] sm:$0xff]  ;;  %v789_v35 = vld [vmem:[%s9239_s1 + $0x1740] sm:$0xff] }
 0x145   :  { %2746 = vmatmul.mubr.f32.vlgmr.msra.gmra.mrb[18].mxu0 %v7784_v22  ;;  %v689_v22 = vld [vmem:[%s9239_s1 + $0x1420] sm:$0xff]  ;;  %v804_v27 = vld [vmem:[%s9239_s1 + $0x17b8] sm:$0xff]  ;;  %v778_v60 = vld [vmem:[%s9239_s1 + $0x16e8] sm:$0xff] }
 0x146   :  { %5447 = vmatpush3.bf16.msra.mxu0 %v5446_v10  ;;  %2816 = vmatmul.mubr.f32.vlgmr.msra.gmra.mrb[18].mxu1 %v7793_v25  ;;  %v722_v25 = vld [vmem:[%s9239_s1 + $0x1528] sm:$0xff]  ;;  %v5454_v40 = vpack.c.bf16 %v690_v32, %v689_v22  ;;  %v745_v10 = vld [vmem:[%s9239_s1 + $0x15e0] sm:$0xff] }
 0x147   :  { %5479 = vmatpush3.bf16.msra.mxu1 %v5478_v12  ;;  %5449 = vmatprep.subr.bf16.mxu0 %v5448_v14  ;;  %v5486_v41 = vpack.c.bf16 %v722_v25, %v721_v42  ;;  %v746_v12 = vld [vmem:[%s9239_s1 + $0x15e8] sm:$0xff]  ;;  %v5466_v14 = vpack.c.bf16 %v696_v3, %v695_v2  ;;  %v752_v2 = vld [vmem:[%s9239_s1 + $0x1618] sm:$0xff]  ;;  %v783_v3 = vld [vmem:[%s9239_s1 + $0x1710] sm:$0xff] }
 0x148   :  { %5481 = vmatprep.subr.bf16.mxu1 %v5480_v18  ;;  %2885 = vmatprep.mubr.f32.mxu0 %v1270_v24  ;;  %v698_v18 = vld [vmem:[%s9239_s1 + $0x1468] sm:$0xff]  ;;  %v5500_v23 = vpack.c.bf16 %v746_v12, %v745_v10  ;;  %v801_v10 = vld [vmem:[%s9239_s1 + $0x17a0] sm:$0xff] }
 0x149   :  { %2955 = vmatprep.mubr.f32.mxu1 %v1271_v28  ;;  %v730_v24 = vld [vmem:[%s9239_s1 + $0x1568] sm:$0xff]  ;;  %v5470_v42 = vpack.c.bf16 %v698_v18, %v697_v17  ;;  %v5516_v17 = vpack.c.bf16 %v770_v21, %v769_v6  ;;  %v777_v9 = vld [vmem:[%s9239_s1 + $0x16e0] sm:$0xff] }
 0x14a   :  { %5451 = vmatpush3.bf16.msra.mxu0 %v5450_v29  ;;  %v5502_v36 = vpack.c.bf16 %v730_v24, %v729_v19  ;;  %v802_v12 = vld [vmem:[%s9239_s1 + $0x17a8] sm:$0xff]  ;;  %v785_v19 = vld [vmem:[%s9239_s1 + $0x1720] sm:$0xff]  ;;  %v772_v24 = vld [vmem:[%s9239_s1 + $0x16b8] sm:$0xff] }
 0x14b   :  { %5483 = vmatpush3.bf16.msra.mxu1 %v5482_v31  ;;  %5453 = vmatprep.subr.bf16.mxu0 %v5452_v30  ;;  %v747_v31 = vld [vmem:[%s9239_s1 + $0x15f0] sm:$0xff]  ;;  %v748_v30 = vld [vmem:[%s9239_s1 + $0x15f8] sm:$0xff]  ;;  %v754_v18 = vld [vmem:[%s9239_s1 + $0x1628] sm:$0xff] }
 0x14c   :  { %5485 = vmatprep.subr.bf16.mxu1 %v5484_v34  ;;  %v40_v34 = vld [vmem:[%s9238_s0 + $0x58] sm:$0xff] }
 0x14d   :  { %v1272_v48 = vcombine.high %v40_v34, %v40_v34  ;;  %v8204_v59 = vrot.slane %v40_v34, %v6042_v13  ;;  %v788_v34 = vld [vmem:[%s9239_s1 + $0x1738] sm:$0xff] }
 0x14e   :  { %5455 = vmatpush3.bf16.msra.mxu0 %v5454_v40  ;;  %v731_v40 = vld [vmem:[%s9239_s1 + $0x1570] sm:$0xff] }
 0x14f   :  { %5487 = vmatpush3.bf16.msra.mxu1 %v5486_v41  ;;  %5457 = vmatprep.subr.bf16.mxu0 %v5456_v43  ;;  %v5504_v43 = vpack.c.bf16 %v748_v30, %v747_v31  ;;  %v5506_v50 = vpack.c.bf16 %v732_v44, %v731_v40  ;;  %v8213_v61 = vrot.slane %v1272_v48, %v6042_v13  ;;  %v755_v30 = vld [vmem:[%s9239_s1 + $0x1630] sm:$0xff]  ;;  %v758_v44 = vld [vmem:[%s9239_s1 + $0x1648] sm:$0xff]  ;;  %v776_v48 = vld [vmem:[%s9239_s1 + $0x16d8] sm:$0xff] }
 0x150   :  { %5489 = vmatprep.subr.bf16.mxu1 %v5488_v47  ;;  %v797_v47 = vld [vmem:[%s9239_s1 + $0x1780] sm:$0xff]  ;;  %v1287_v7 = vcombine.high %v8204_v59, %v8204_v59 }
 0x152   :  { %5459 = vmatpush3.bf16.msra.mxu0 %v5458_v54  ;;  %v749_v54 = vld [vmem:[%s9239_s1 + $0x1600] sm:$0xff] }
 0x153   :  { %5491 = vmatpush3.bf16.msra.mxu1 %v5490_v55  ;;  %5461 = vmatprep.subr.bf16.mxu0 %v5460_v56  ;;  %v750_v55 = vld [vmem:[%s9239_s1 + $0x1608] sm:$0xff]  ;;  %v781_v56 = vld [vmem:[%s9239_s1 + $0x1700] sm:$0xff] }
 0x154   :  { %5493 = vmatprep.subr.bf16.mxu1 %v5492_v58  ;;  %v768_v58 = vld [vmem:[%s9239_s1 + $0x1698] sm:$0xff]  ;;  %v5510_v62 = vpack.c.bf16 %v750_v55, %v749_v54 }
 0x156   :  { %5463 = vmatpush3.bf16.msra.mxu0 %v5462_v63  ;;  %v5542_v63 = vpack.c.bf16 %v782_v45, %v781_v56  ;;  %v759_v56 = vld [vmem:[%s9239_s1 + $0x1650] sm:$0xff] }
 0x157   :  { %5495 = vmatpush3.bf16.msra.mxu1 %v5494_v0  ;;  %5465 = vmatprep.subr.bf16.mxu0 %v5464_v1  ;;  %v5512_v0 = vpack.c.bf16 %v768_v58, %v767_v51  ;;  %v751_v1 = vld [vmem:[%s9239_s1 + $0x1610] sm:$0xff]  ;;  %v792_v58 = vld [vmem:[%s9239_s1 + $0x1758] sm:$0xff] }
 0x158   :  { %v3926_v20 = vpop.f32.mrb[6].mxu0  ;;  %5497 = vmatprep.subr.bf16.mxu1 %v5496_v5  ;;  %v784_v5 = vld [vmem:[%s9239_s1 + $0x1718] sm:$0xff]  ;;  %v791_v45 = vld [vmem:[%s9239_s1 + $0x1750] sm:$0xff] }
 0x159   :  { %v3927_v28 = vpop.f32.mrb[7].mxu0  ;;  %v3961_v29 = vpop.f32.mrb[6].mxu1 }
 0x15a   :  { %v3928_v22 = vadd.f32 %v3927_v28, %v3926_v20  ;;  %5467 = vmatpush3.bf16.msra.mxu0 %v5466_v14  ;;  %v3962_v32 = vpop.f32.mrb[7].mxu1  ;;  %v1288_v14 = vcombine.high %v8213_v61, %v8213_v61  ;;  %v5548_v20 = vpack.c.bf16 %v802_v12, %v801_v10  ;;  %v779_v10 = vld [vmem:[%s9239_s1 + $0x16f0] sm:$0xff]  ;;  %v780_v12 = vld [vmem:[%s9239_s1 + $0x16f8] sm:$0xff] }
 0x15b   :  { %v3963_v25 = vadd.f32 %v3962_v32, %v3961_v29  ;;  %5499 = vmatpush3.bf16.msra.mxu1 %v5498_v15  ;;  %5469 = vmatprep.subr.bf16.mxu0 %v5468_v16  ;;  %v5514_v15 = vpack.c.bf16 %v752_v2, %v751_v1  ;;  %v5546_v16 = vpack.c.bf16 %v784_v5, %v783_v3  ;;  %v787_v32 = vld [vmem:[%s9239_s1 + $0x1730] sm:$0xff]  ;;  %v761_v3 = vld [vmem:[%s9239_s1 + $0x1660] sm:$0xff] }
 0x15c   :  { %v1908_v41 = vadd.f32 %v3928_v22, %v7973_v33  ;;  %5501 = vmatprep.subr.bf16.mxu1 %v5500_v23  ;;  %v798_v33 = vld [vmem:[%s9239_s1 + $0x1788] sm:$0xff]  ;;  %v771_v23 = vld [vmem:[%s9239_s1 + $0x16b0] sm:$0xff]  ;;  %v756_v22 = vld [vmem:[%s9239_s1 + $0x1638] sm:$0xff]  ;;  %v5554_v40 = vpack.c.bf16 %v788_v34, %v787_v32  ;;  %v5562_v1 = vpack.c.bf16 %v792_v58, %v791_v45  ;;  %v5532_v2 = vpack.c.bf16 %v778_v60, %v777_v9 }
 0x15d   :  { %v5540_v57 = vpack.c.bf16 %v798_v33, %v797_v47  ;;  %v5520_v31 = vpack.c.bf16 %v772_v24, %v771_v23  ;;  %v5522_v39 = vpack.c.bf16 %v756_v22, %v755_v30  ;;  %v790_v47 = vld [vmem:[%s9239_s1 + $0x1748] sm:$0xff]  ;;  %v775_v33 = vld [vmem:[%s9239_s1 + $0x16d0] sm:$0xff]  ;;  %v793_v5 = vld [vmem:[%s9239_s1 + $0x1760] sm:$0xff]  ;;  %v5536_v24 = vpack.c.bf16 %v780_v12, %v779_v10 }
 0x15e   :  { %v8183_v37 = vadd.f32 %v3963_v25, %v1908_v41  ;;  %5471 = vmatpush3.bf16.msra.mxu0 %v5470_v42  ;;  %v5552_v42 = vpack.c.bf16 %v804_v27, %v803_v26  ;;  %v773_v25 = vld [vmem:[%s9239_s1 + $0x16c0] sm:$0xff]  ;;  %v5558_v54 = vpack.c.bf16 %v790_v47, %v789_v35  ;;  %v5528_v55 = vpack.c.bf16 %v776_v48, %v775_v33  ;;  %v763_v26 = vld [vmem:[%s9239_s1 + $0x1670] sm:$0xff]  ;;  %v764_v27 = vld [vmem:[%s9239_s1 + $0x1678] sm:$0xff] }
 0x15f   :  { %5503 = vmatpush3.bf16.msra.mxu1 %v5502_v36  ;;  %5473 = vmatprep.subr.bf16.mxu0 %v5472_v52  ;;  %v774_v36 = vld [vmem:[%s9239_s1 + $0x16c8] sm:$0xff]  ;;  %v805_v52 = vld [vmem:[%s9239_s1 + $0x17c0] sm:$0xff]  ;;  %v796_v30 = vld [vmem:[%s9239_s1 + $0x1778] sm:$0xff] }
 0x160   :  { %5505 = vmatprep.subr.bf16.mxu1 %v5504_v43  ;;  %v5524_v41 = vpack.c.bf16 %v774_v36, %v773_v25  ;;  %v757_v43 = vld [vmem:[%s9239_s1 + $0x1640] sm:$0xff]  ;;  %v5556_v46 = vpack.c.bf16 %v806_v38, %v805_v52  ;;  %v830_v32 = vld [vmem:[%s9239_s1 + $0x1888] sm:$0xff]  ;;  %v5538_v36 = vpack.c.bf16 %v764_v27, %v763_v26  ;;  %v831_v35 = vld [vmem:[%s9239_s1 + $0x1890] sm:$0xff] }
 0x161   :  { %v829_v22 = vld [vmem:[%s9239_s1 + $0x1880] sm:$0xff]  ;;  %v863_v33 = vld [vmem:[%s9239_s1 + $0x1990] sm:$0xff]  ;;  %v864_v48 = vld [vmem:[%s9239_s1 + $0x1998] sm:$0xff] }
 0x162   :  { %5475 = vmatpush3.bf16.msra.mxu0 %v5474_v49  ;;  %v807_v49 = vld [vmem:[%s9239_s1 + $0x17d0] sm:$0xff]  ;;  %v5572_v38 = vpack.c.bf16 %v830_v32, %v829_v22  ;;  %v5608_v45 = vpack.c.bf16 %v864_v48, %v863_v33  ;;  %v833_v58 = vld [vmem:[%s9239_s1 + $0x18a0] sm:$0xff]  ;;  %v834_v9 = vld [vmem:[%s9239_s1 + $0x18a8] sm:$0xff] }
 0x163   :  { %5507 = vmatpush3.bf16.msra.mxu1 %v5506_v50  ;;  %5509 = vmatprep.subr.bf16.mxu0 %v5508_v53  ;;  %v808_v50 = vld [vmem:[%s9239_s1 + $0x17d8] sm:$0xff]  ;;  %v5526_v53 = vpack.c.bf16 %v758_v44, %v757_v43  ;;  %v846_v44 = vld [vmem:[%s9239_s1 + $0x1908] sm:$0xff]  ;;  %v867_v10 = vld [vmem:[%s9239_s1 + $0x19b0] sm:$0xff] }
 0x164   :  { %5541 = vmatprep.subr.bf16.mxu1 %v5540_v57  ;;  %v760_v57 = vld [vmem:[%s9239_s1 + $0x1658] sm:$0xff]  ;;  %v5560_v51 = vpack.c.bf16 %v808_v50, %v807_v49  ;;  %v870_v26 = vld [vmem:[%s9239_s1 + $0x19c8] sm:$0xff]  ;;  %v853_v22 = vld [vmem:[%s9239_s1 + $0x1940] sm:$0xff] }
 0x165   :  { %2886 = vmatmul.mubr.f32.vlgmr.msra.gmra.mrb[20].mxu0 %v7994_v8  ;;  %v753_v8 = vld [vmem:[%s9239_s1 + $0x1620] sm:$0xff]  ;;  %v868_v12 = vld [vmem:[%s9239_s1 + $0x19b8] sm:$0xff]  ;;  %v842_v48 = vld [vmem:[%s9239_s1 + $0x18e8] sm:$0xff] }
 0x166   :  { %5511 = vmatpush3.bf16.msra.mxu0 %v5510_v62  ;;  %2956 = vmatmul.mubr.f32.vlgmr.msra.gmra.mrb[20].mxu1 %v8003_v11  ;;  %v786_v11 = vld [vmem:[%s9239_s1 + $0x1728] sm:$0xff]  ;;  %v5518_v28 = vpack.c.bf16 %v754_v18, %v753_v8  ;;  %v809_v62 = vld [vmem:[%s9239_s1 + $0x17e0] sm:$0xff] }
 0x167   :  { %5543 = vmatpush3.bf16.msra.mxu1 %v5542_v63  ;;  %5513 = vmatprep.subr.bf16.mxu0 %v5512_v0  ;;  %v5550_v29 = vpack.c.bf16 %v786_v11, %v785_v19  ;;  %v810_v63 = vld [vmem:[%s9239_s1 + $0x17e8] sm:$0xff]  ;;  %v5530_v0 = vpack.c.bf16 %v760_v57, %v759_v56  ;;  %v816_v56 = vld [vmem:[%s9239_s1 + $0x1818] sm:$0xff]  ;;  %v847_v57 = vld [vmem:[%s9239_s1 + $0x1910] sm:$0xff] }
 0x168   :  { %5545 = vmatprep.subr.bf16.mxu1 %v5544_v4  ;;  %3025 = vmatprep.mubr.f32.mxu0 %v1287_v7  ;;  %v762_v4 = vld [vmem:[%s9239_s1 + $0x1668] sm:$0xff]  ;;  %v5564_v21 = vpack.c.bf16 %v810_v63, %v809_v62  ;;  %v865_v62 = vld [vmem:[%s9239_s1 + $0x19a0] sm:$0xff] }
 0x169   :  { %3095 = vmatprep.mubr.f32.mxu1 %v1288_v14  ;;  %v794_v7 = vld [vmem:[%s9239_s1 + $0x1768] sm:$0xff]  ;;  %v5534_v19 = vpack.c.bf16 %v762_v4, %v761_v3  ;;  %v5580_v3 = vpack.c.bf16 %v834_v9, %v833_v58  ;;  %v841_v33 = vld [vmem:[%s9239_s1 + $0x18e0] sm:$0xff] }
 0x16a   :  { %5515 = vmatpush3.bf16.msra.mxu0 %v5514_v15  ;;  %v5566_v23 = vpack.c.bf16 %v794_v7, %v793_v5  ;;  %v866_v63 = vld [vmem:[%s9239_s1 + $0x19a8] sm:$0xff]  ;;  %v849_v5 = vld [vmem:[%s9239_s1 + $0x1920] sm:$0xff]  ;;  %v836_v7 = vld [vmem:[%s9239_s1 + $0x18b8] sm:$0xff] }
 0x16b   :  { %5547 = vmatpush3.bf16.msra.mxu1 %v5546_v16  ;;  %5517 = vmatprep.subr.bf16.mxu0 %v5516_v17  ;;  %v811_v16 = vld [vmem:[%s9239_s1 + $0x17f0] sm:$0xff]  ;;  %v812_v17 = vld [vmem:[%s9239_s1 + $0x17f8] sm:$0xff]  ;;  %v818_v4 = vld [vmem:[%s9239_s1 + $0x1828] sm:$0xff] }
 0x16c   :  { %5549 = vmatprep.subr.bf16.mxu1 %v5548_v20  ;;  %v41_v20 = vld [vmem:[%s9238_s0 + $0x60] sm:$0xff] }
 0x16d   :  { %v1289_v34 = vcombine.high %v41_v20, %v41_v20  ;;  %v8414_v47 = vrot.slane %v41_v20, %v6042_v13  ;;  %v852_v20 = vld [vmem:[%s9239_s1 + $0x1938] sm:$0xff] }
 0x16e   :  { %5519 = vmatpush3.bf16.msra.mxu0 %v5518_v28  ;;  %v795_v28 = vld [vmem:[%s9239_s1 + $0x1770] sm:$0xff] }
 0x16f   :  { %5551 = vmatpush3.bf16.msra.mxu1 %v5550_v29  ;;  %5521 = vmatprep.subr.bf16.mxu0 %v5520_v31  ;;  %v5568_v31 = vpack.c.bf16 %v812_v17, %v811_v16  ;;  %v5570_v52 = vpack.c.bf16 %v796_v30, %v795_v28  ;;  %v8423_v49 = vrot.slane %v1289_v34, %v6042_v13  ;;  %v819_v17 = vld [vmem:[%s9239_s1 + $0x1830] sm:$0xff]  ;;  %v822_v30 = vld [vmem:[%s9239_s1 + $0x1848] sm:$0xff]  ;;  %v840_v34 = vld [vmem:[%s9239_s1 + $0x18d8] sm:$0xff] }
 0x170   :  { %5553 = vmatprep.subr.bf16.mxu1 %v5552_v42  ;;  %v861_v42 = vld [vmem:[%s9239_s1 + $0x1980] sm:$0xff]  ;;  %v1304_v60 = vcombine.high %v8414_v47, %v8414_v47 }
 0x172   :  { %5523 = vmatpush3.bf16.msra.mxu0 %v5522_v39  ;;  %v813_v39 = vld [vmem:[%s9239_s1 + $0x1800] sm:$0xff] }
 0x173   :  { %5555 = vmatpush3.bf16.msra.mxu1 %v5554_v40  ;;  %5525 = vmatprep.subr.bf16.mxu0 %v5524_v41  ;;  %v814_v40 = vld [vmem:[%s9239_s1 + $0x1808] sm:$0xff]  ;;  %v845_v41 = vld [vmem:[%s9239_s1 + $0x1900] sm:$0xff] }
 0x174   :  { %5557 = vmatprep.subr.bf16.mxu1 %v5556_v46  ;;  %v832_v46 = vld [vmem:[%s9239_s1 + $0x1898] sm:$0xff]  ;;  %v5574_v50 = vpack.c.bf16 %v814_v40, %v813_v39 }
 0x176   :  { %5527 = vmatpush3.bf16.msra.mxu0 %v5526_v53  ;;  %v5606_v53 = vpack.c.bf16 %v846_v44, %v845_v41  ;;  %v823_v41 = vld [vmem:[%s9239_s1 + $0x1850] sm:$0xff] }
 0x177   :  { %5559 = vmatpush3.bf16.msra.mxu1 %v5558_v54  ;;  %5529 = vmatprep.subr.bf16.mxu0 %v5528_v55  ;;  %v5576_v54 = vpack.c.bf16 %v832_v46, %v831_v35  ;;  %v815_v55 = vld [vmem:[%s9239_s1 + $0x1810] sm:$0xff]  ;;  %v856_v46 = vld [vmem:[%s9239_s1 + $0x1958] sm:$0xff] }
 0x178   :  { %v3996_v6 = vpop.f32.mrb[8].mxu0  ;;  %5561 = vmatprep.subr.bf16.mxu1 %v5560_v51  ;;  %v848_v51 = vld [vmem:[%s9239_s1 + $0x1918] sm:$0xff]  ;;  %v855_v44 = vld [vmem:[%s9239_s1 + $0x1950] sm:$0xff] }
 0x179   :  { %v3997_v14 = vpop.f32.mrb[9].mxu0  ;;  %v4031_v15 = vpop.f32.mrb[8].mxu1 }
 0x17a   :  { %v3998_v8 = vadd.f32 %v3997_v14, %v3996_v6  ;;  %5531 = vmatpush3.bf16.msra.mxu0 %v5530_v0  ;;  %v4032_v18 = vpop.f32.mrb[9].mxu1  ;;  %v1305_v0 = vcombine.high %v8423_v49, %v8423_v49  ;;  %v5612_v6 = vpack.c.bf16 %v866_v63, %v865_v62  ;;  %v843_v62 = vld [vmem:[%s9239_s1 + $0x18f0] sm:$0xff]  ;;  %v844_v63 = vld [vmem:[%s9239_s1 + $0x18f8] sm:$0xff] }
 0x17b   :  { %v4033_v11 = vadd.f32 %v4032_v18, %v4031_v15  ;;  %5563 = vmatpush3.bf16.msra.mxu1 %v5562_v1  ;;  %5533 = vmatprep.subr.bf16.mxu0 %v5532_v2  ;;  %v5578_v1 = vpack.c.bf16 %v816_v56, %v815_v55  ;;  %v5610_v2 = vpack.c.bf16 %v848_v51, %v847_v57  ;;  %v851_v18 = vld [vmem:[%s9239_s1 + $0x1930] sm:$0xff]  ;;  %v825_v57 = vld [vmem:[%s9239_s1 + $0x1860] sm:$0xff] }
 0x17c   :  { %v2048_v29 = vadd.f32 %v3998_v8, %v8183_v37  ;;  %5565 = vmatprep.subr.bf16.mxu1 %v5564_v21  ;;  %v862_v37 = vld [vmem:[%s9239_s1 + $0x1988] sm:$0xff]  ;;  %v835_v21 = vld [vmem:[%s9239_s1 + $0x18b0] sm:$0xff]  ;;  %v820_v8 = vld [vmem:[%s9239_s1 + $0x1838] sm:$0xff]  ;;  %v5618_v28 = vpack.c.bf16 %v852_v20, %v851_v18  ;;  %v5626_v55 = vpack.c.bf16 %v856_v46, %v855_v44  ;;  %v5596_v56 = vpack.c.bf16 %v842_v48, %v841_v33 }
 0x17d   :  { %v5604_v43 = vpack.c.bf16 %v862_v37, %v861_v42  ;;  %v5584_v16 = vpack.c.bf16 %v836_v7, %v835_v21  ;;  %v5586_v27 = vpack.c.bf16 %v820_v8, %v819_v17  ;;  %v854_v42 = vld [vmem:[%s9239_s1 + $0x1948] sm:$0xff]  ;;  %v839_v37 = vld [vmem:[%s9239_s1 + $0x18d0] sm:$0xff]  ;;  %v857_v51 = vld [vmem:[%s9239_s1 + $0x1960] sm:$0xff]  ;;  %v5600_v7 = vpack.c.bf16 %v844_v63, %v843_v62 }
 0x17e   :  { %v8393_v25 = vadd.f32 %v4033_v11, %v2048_v29  ;;  %5535 = vmatpush3.bf16.msra.mxu0 %v5534_v19  ;;  %v5616_v19 = vpack.c.bf16 %v868_v12, %v867_v10  ;;  %v837_v11 = vld [vmem:[%s9239_s1 + $0x18c0] sm:$0xff]  ;;  %v5622_v39 = vpack.c.bf16 %v854_v42, %v853_v22  ;;  %v5592_v40 = vpack.c.bf16 %v840_v34, %v839_v37  ;;  %v827_v10 = vld [vmem:[%s9239_s1 + $0x1870] sm:$0xff]  ;;  %v828_v12 = vld [vmem:[%s9239_s1 + $0x1878] sm:$0xff] }
 0x17f   :  { %5567 = vmatpush3.bf16.msra.mxu1 %v5566_v23  ;;  %5537 = vmatprep.subr.bf16.mxu0 %v5536_v24  ;;  %v838_v23 = vld [vmem:[%s9239_s1 + $0x18c8] sm:$0xff]  ;;  %v869_v24 = vld [vmem:[%s9239_s1 + $0x19c0] sm:$0xff]  ;;  %v860_v17 = vld [vmem:[%s9239_s1 + $0x1978] sm:$0xff] }
 0x180   :  { %5569 = vmatprep.subr.bf16.mxu1 %v5568_v31  ;;  %v5588_v29 = vpack.c.bf16 %v838_v23, %v837_v11  ;;  %v821_v31 = vld [vmem:[%s9239_s1 + $0x1840] sm:$0xff]  ;;  %v5620_v32 = vpack.c.bf16 %v870_v26, %v869_v24  ;;  %v894_v18 = vld [vmem:[%s9239_s1 + $0x1a88] sm:$0xff]  ;;  %v5602_v23 = vpack.c.bf16 %v828_v12, %v827_v10  ;;  %v895_v22 = vld [vmem:[%s9239_s1 + $0x1a90] sm:$0xff] }
 0x181   :  { %v893_v8 = vld [vmem:[%s9239_s1 + $0x1a80] sm:$0xff]  ;;  %v927_v37 = vld [vmem:[%s9239_s1 + $0x1b90] sm:$0xff]  ;;  %v928_v34 = vld [vmem:[%s9239_s1 + $0x1b98] sm:$0xff] }
 0x182   :  { %5539 = vmatpush3.bf16.msra.mxu0 %v5538_v36  ;;  %v871_v36 = vld [vmem:[%s9239_s1 + $0x19d0] sm:$0xff]  ;;  %v5636_v26 = vpack.c.bf16 %v894_v18, %v893_v8  ;;  %v5672_v44 = vpack.c.bf16 %v928_v34, %v927_v37  ;;  %v897_v46 = vld [vmem:[%s9239_s1 + $0x1aa0] sm:$0xff]  ;;  %v898_v33 = vld [vmem:[%s9239_s1 + $0x1aa8] sm:$0xff] }
 0x183   :  { %5571 = vmatpush3.bf16.msra.mxu1 %v5570_v52  ;;  %5573 = vmatprep.subr.bf16.mxu0 %v5572_v38  ;;  %v872_v52 = vld [vmem:[%s9239_s1 + $0x19d8] sm:$0xff]  ;;  %v5590_v38 = vpack.c.bf16 %v822_v30, %v821_v31  ;;  %v910_v30 = vld [vmem:[%s9239_s1 + $0x1b08] sm:$0xff]  ;;  %v931_v62 = vld [vmem:[%s9239_s1 + $0x1bb0] sm:$0xff] }
 0x184   :  { %5605 = vmatprep.subr.bf16.mxu1 %v5604_v43  ;;  %v824_v43 = vld [vmem:[%s9239_s1 + $0x1858] sm:$0xff]  ;;  %v5624_v35 = vpack.c.bf16 %v872_v52, %v871_v36  ;;  %v934_v10 = vld [vmem:[%s9239_s1 + $0x1bc8] sm:$0xff]  ;;  %v917_v8 = vld [vmem:[%s9239_s1 + $0x1b40] sm:$0xff] }
 0x185   :  { %3026 = vmatmul.mubr.f32.vlgmr.msra.gmra.mrb[22].mxu0 %v8204_v59  ;;  %v817_v59 = vld [vmem:[%s9239_s1 + $0x1820] sm:$0xff]  ;;  %v932_v63 = vld [vmem:[%s9239_s1 + $0x1bb8] sm:$0xff]  ;;  %v906_v34 = vld [vmem:[%s9239_s1 + $0x1ae8] sm:$0xff] }
 0x186   :  { %5575 = vmatpush3.bf16.msra.mxu0 %v5574_v50  ;;  %3096 = vmatmul.mubr.f32.vlgmr.msra.gmra.mrb[22].mxu1 %v8213_v61  ;;  %v850_v61 = vld [vmem:[%s9239_s1 + $0x1928] sm:$0xff]  ;;  %v5582_v14 = vpack.c.bf16 %v818_v4, %v817_v59  ;;  %v873_v50 = vld [vmem:[%s9239_s1 + $0x19e0] sm:$0xff] }
 0x187   :  { %5607 = vmatpush3.bf16.msra.mxu1 %v5606_v53  ;;  %5577 = vmatprep.subr.bf16.mxu0 %v5576_v54  ;;  %v5614_v15 = vpack.c.bf16 %v850_v61, %v849_v5  ;;  %v874_v53 = vld [vmem:[%s9239_s1 + $0x19e8] sm:$0xff]  ;;  %v5594_v54 = vpack.c.bf16 %v824_v43, %v823_v41  ;;  %v880_v41 = vld [vmem:[%s9239_s1 + $0x1a18] sm:$0xff]  ;;  %v911_v43 = vld [vmem:[%s9239_s1 + $0x1b10] sm:$0xff] }
 0x188   :  { %5609 = vmatprep.subr.bf16.mxu1 %v5608_v45  ;;  %3165 = vmatprep.mubr.f32.mxu0 %v1304_v60  ;;  %v826_v45 = vld [vmem:[%s9239_s1 + $0x1868] sm:$0xff]  ;;  %v5628_v9 = vpack.c.bf16 %v874_v53, %v873_v50  ;;  %v929_v50 = vld [vmem:[%s9239_s1 + $0x1ba0] sm:$0xff] }
 0x189   :  { %3235 = vmatprep.mubr.f32.mxu1 %v1305_v0  ;;  %v858_v60 = vld [vmem:[%s9239_s1 + $0x1968] sm:$0xff]  ;;  %v5598_v5 = vpack.c.bf16 %v826_v45, %v825_v57  ;;  %v5644_v57 = vpack.c.bf16 %v898_v33, %v897_v46  ;;  %v905_v37 = vld [vmem:[%s9239_s1 + $0x1ae0] sm:$0xff] }
 0x18a   :  { %5579 = vmatpush3.bf16.msra.mxu0 %v5578_v1  ;;  %v5630_v21 = vpack.c.bf16 %v858_v60, %v857_v51  ;;  %v930_v53 = vld [vmem:[%s9239_s1 + $0x1ba8] sm:$0xff]  ;;  %v913_v51 = vld [vmem:[%s9239_s1 + $0x1b20] sm:$0xff]  ;;  %v900_v60 = vld [vmem:[%s9239_s1 + $0x1ab8] sm:$0xff] }
 0x18b   :  { %5611 = vmatpush3.bf16.msra.mxu1 %v5610_v2  ;;  %5581 = vmatprep.subr.bf16.mxu0 %v5580_v3  ;;  %v875_v2 = vld [vmem:[%s9239_s1 + $0x19f0] sm:$0xff]  ;;  %v876_v3 = vld [vmem:[%s9239_s1 + $0x19f8] sm:$0xff]  ;;  %v882_v45 = vld [vmem:[%s9239_s1 + $0x1a28] sm:$0xff] }
 0x18c   :  { %5613 = vmatprep.subr.bf16.mxu1 %v5612_v6  ;;  %v42_v6 = vld [vmem:[%s9238_s0 + $0x68] sm:$0xff] }
 0x18d   :  { %v1306_v20 = vcombine.high %v42_v6, %v42_v6  ;;  %v8624_v42 = vrot.slane %v42_v6, %v6042_v13  ;;  %v916_v6 = vld [vmem:[%s9239_s1 + $0x1b38] sm:$0xff] }
 0x18e   :  { %5583 = vmatpush3.bf16.msra.mxu0 %v5582_v14  ;;  %v859_v14 = vld [vmem:[%s9239_s1 + $0x1970] sm:$0xff] }
 0x18f   :  { %5615 = vmatpush3.bf16.msra.mxu1 %v5614_v15  ;;  %5585 = vmatprep.subr.bf16.mxu0 %v5584_v16  ;;  %v5632_v16 = vpack.c.bf16 %v876_v3, %v875_v2  ;;  %v5634_v24 = vpack.c.bf16 %v860_v17, %v859_v14  ;;  %v8633_v36 = vrot.slane %v1306_v20, %v6042_v13  ;;  %v883_v3 = vld [vmem:[%s9239_s1 + $0x1a30] sm:$0xff]  ;;  %v886_v17 = vld [vmem:[%s9239_s1 + $0x1a48] sm:$0xff]  ;;  %v904_v20 = vld [vmem:[%s9239_s1 + $0x1ad8] sm:$0xff] }
 0x190   :  { %5617 = vmatprep.subr.bf16.mxu1 %v5616_v19  ;;  %v925_v19 = vld [vmem:[%s9239_s1 + $0x1b80] sm:$0xff]  ;;  %v1321_v48 = vcombine.high %v8624_v42, %v8624_v42 }
 0x192   :  { %5587 = vmatpush3.bf16.msra.mxu0 %v5586_v27  ;;  %v877_v27 = vld [vmem:[%s9239_s1 + $0x1a00] sm:$0xff] }
 0x193   :  { %5619 = vmatpush3.bf16.msra.mxu1 %v5618_v28  ;;  %5589 = vmatprep.subr.bf16.mxu0 %v5588_v29  ;;  %v878_v28 = vld [vmem:[%s9239_s1 + $0x1a08] sm:$0xff]  ;;  %v909_v29 = vld [vmem:[%s9239_s1 + $0x1b00] sm:$0xff] }
 0x194   :  { %5621 = vmatprep.subr.bf16.mxu1 %v5620_v32  ;;  %v896_v32 = vld [vmem:[%s9239_s1 + $0x1a98] sm:$0xff]  ;;  %v5638_v52 = vpack.c.bf16 %v878_v28, %v877_v27 }
 0x196   :  { %5591 = vmatpush3.bf16.msra.mxu0 %v5590_v38  ;;  %v5670_v38 = vpack.c.bf16 %v910_v30, %v909_v29  ;;  %v887_v29 = vld [vmem:[%s9239_s1 + $0x1a50] sm:$0xff] }
 0x197   :  { %5623 = vmatpush3.bf16.msra.mxu1 %v5622_v39  ;;  %5593 = vmatprep.subr.bf16.mxu0 %v5592_v40  ;;  %v5640_v39 = vpack.c.bf16 %v896_v32, %v895_v22  ;;  %v879_v40 = vld [vmem:[%s9239_s1 + $0x1a10] sm:$0xff]  ;;  %v920_v32 = vld [vmem:[%s9239_s1 + $0x1b58] sm:$0xff] }
 0x198   :  { %v4066_v58 = vpop.f32.mrb[10].mxu0  ;;  %5625 = vmatprep.subr.bf16.mxu1 %v5624_v35  ;;  %v912_v35 = vld [vmem:[%s9239_s1 + $0x1b18] sm:$0xff]  ;;  %v919_v30 = vld [vmem:[%s9239_s1 + $0x1b50] sm:$0xff] }
 0x199   :  { %v4067_v0 = vpop.f32.mrb[11].mxu0  ;;  %v4101_v1 = vpop.f32.mrb[10].mxu1 }
 0x19a   :  { %v4068_v59 = vadd.f32 %v4067_v0, %v4066_v58  ;;  %5595 = vmatpush3.bf16.msra.mxu0 %v5594_v54  ;;  %v4102_v4 = vpop.f32.mrb[11].mxu1  ;;  %v1322_v54 = vcombine.high %v8633_v36, %v8633_v36  ;;  %v5676_v58 = vpack.c.bf16 %v930_v53, %v929_v50  ;;  %v907_v50 = vld [vmem:[%s9239_s1 + $0x1af0] sm:$0xff]  ;;  %v908_v53 = vld [vmem:[%s9239_s1 + $0x1af8] sm:$0xff] }
 0x19b   :  { %v4103_v61 = vadd.f32 %v4102_v4, %v4101_v1  ;;  %5627 = vmatpush3.bf16.msra.mxu1 %v5626_v55  ;;  %5597 = vmatprep.subr.bf16.mxu0 %v5596_v56  ;;  %v5642_v55 = vpack.c.bf16 %v880_v41, %v879_v40  ;;  %v5674_v56 = vpack.c.bf16 %v912_v35, %v911_v43  ;;  %v915_v4 = vld [vmem:[%s9239_s1 + $0x1b30] sm:$0xff]  ;;  %v889_v43 = vld [vmem:[%s9239_s1 + $0x1a60] sm:$0xff] }
 0x19c   :  { %v2188_v15 = vadd.f32 %v4068_v59, %v8393_v25  ;;  %5629 = vmatprep.subr.bf16.mxu1 %v5628_v9  ;;  %v926_v25 = vld [vmem:[%s9239_s1 + $0x1b88] sm:$0xff]  ;;  %v899_v9 = vld [vmem:[%s9239_s1 + $0x1ab0] sm:$0xff]  ;;  %v884_v59 = vld [vmem:[%s9239_s1 + $0x1a38] sm:$0xff]  ;;  %v5682_v14 = vpack.c.bf16 %v916_v6, %v915_v4  ;;  %v5690_v40 = vpack.c.bf16 %v920_v32, %v919_v30  ;;  %v5660_v41 = vpack.c.bf16 %v906_v34, %v905_v37 }
 0x19d   :  { %v5668_v31 = vpack.c.bf16 %v926_v25, %v925_v19  ;;  %v5648_v2 = vpack.c.bf16 %v900_v60, %v899_v9  ;;  %v5650_v12 = vpack.c.bf16 %v884_v59, %v883_v3  ;;  %v918_v19 = vld [vmem:[%s9239_s1 + $0x1b48] sm:$0xff]  ;;  %v903_v25 = vld [vmem:[%s9239_s1 + $0x1ad0] sm:$0xff]  ;;  %v921_v35 = vld [vmem:[%s9239_s1 + $0x1b60] sm:$0xff]  ;;  %v5664_v60 = vpack.c.bf16 %v908_v53, %v907_v50 }
 0x19e   :  { %v8603_v11 = vadd.f32 %v4103_v61, %v2188_v15  ;;  %5599 = vmatpush3.bf16.msra.mxu0 %v5598_v5  ;;  %v5680_v5 = vpack.c.bf16 %v932_v63, %v931_v62  ;;  %v901_v61 = vld [vmem:[%s9239_s1 + $0x1ac0] sm:$0xff]  ;;  %v5686_v27 = vpack.c.bf16 %v918_v19, %v917_v8  ;;  %v5656_v28 = vpack.c.bf16 %v904_v20, %v903_v25  ;;  %v891_v62 = vld [vmem:[%s9239_s1 + $0x1a70] sm:$0xff]  ;;  %v892_v63 = vld [vmem:[%s9239_s1 + $0x1a78] sm:$0xff] }
 0x19f   :  { %5631 = vmatpush3.bf16.msra.mxu1 %v5630_v21  ;;  %5601 = vmatprep.subr.bf16.mxu0 %v5600_v7  ;;  %v902_v21 = vld [vmem:[%s9239_s1 + $0x1ac8] sm:$0xff]  ;;  %v933_v7 = vld [vmem:[%s9239_s1 + $0x1bc0] sm:$0xff]  ;;  %v924_v3 = vld [vmem:[%s9239_s1 + $0x1b78] sm:$0xff] }
 0x1a0   :  { %5633 = vmatprep.subr.bf16.mxu1 %v5632_v16  ;;  %v5652_v15 = vpack.c.bf16 %v902_v21, %v901_v61  ;;  %v885_v16 = vld [vmem:[%s9239_s1 + $0x1a40] sm:$0xff]  ;;  %v5684_v18 = vpack.c.bf16 %v934_v10, %v933_v7  ;;  %v958_v4 = vld [vmem:[%s9239_s1 + $0x1c88] sm:$0xff]  ;;  %v5666_v21 = vpack.c.bf16 %v892_v63, %v891_v62  ;;  %v959_v8 = vld [vmem:[%s9239_s1 + $0x1c90] sm:$0xff] }
 0x1a1   :  { %v957_v59 = vld [vmem:[%s9239_s1 + $0x1c80] sm:$0xff]  ;;  %v991_v25 = vld [vmem:[%s9239_s1 + $0x1d90] sm:$0xff]  ;;  %v992_v20 = vld [vmem:[%s9239_s1 + $0x1d98] sm:$0xff] }
 0x1a2   :  { %5603 = vmatpush3.bf16.msra.mxu0 %v5602_v23  ;;  %v935_v23 = vld [vmem:[%s9239_s1 + $0x1bd0] sm:$0xff]  ;;  %v5700_v10 = vpack.c.bf16 %v958_v4, %v957_v59  ;;  %v5736_v30 = vpack.c.bf16 %v992_v20, %v991_v25  ;;  %v961_v32 = vld [vmem:[%s9239_s1 + $0x1ca0] sm:$0xff]  ;;  %v962_v37 = vld [vmem:[%s9239_s1 + $0x1ca8] sm:$0xff] }
 0x1a3   :  { %5635 = vmatpush3.bf16.msra.mxu1 %v5634_v24  ;;  %5637 = vmatprep.subr.bf16.mxu0 %v5636_v26  ;;  %v936_v24 = vld [vmem:[%s9239_s1 + $0x1bd8] sm:$0xff]  ;;  %v5654_v26 = vpack.c.bf16 %v886_v17, %v885_v16  ;;  %v974_v17 = vld [vmem:[%s9239_s1 + $0x1d08] sm:$0xff]  ;;  %v995_v50 = vld [vmem:[%s9239_s1 + $0x1db0] sm:$0xff] }
 0x1a4   :  { %5669 = vmatprep.subr.bf16.mxu1 %v5668_v31  ;;  %v888_v31 = vld [vmem:[%s9239_s1 + $0x1a58] sm:$0xff]  ;;  %v5688_v22 = vpack.c.bf16 %v936_v24, %v935_v23  ;;  %v998_v62 = vld [vmem:[%s9239_s1 + $0x1dc8] sm:$0xff]  ;;  %v981_v59 = vld [vmem:[%s9239_s1 + $0x1d40] sm:$0xff] }
 0x1a5   :  { %3166 = vmatmul.mubr.f32.vlgmr.msra.gmra.mrb[24].mxu0 %v8414_v47  ;;  %v881_v47 = vld [vmem:[%s9239_s1 + $0x1a20] sm:$0xff]  ;;  %v996_v53 = vld [vmem:[%s9239_s1 + $0x1db8] sm:$0xff]  ;;  %v970_v20 = vld [vmem:[%s9239_s1 + $0x1ce8] sm:$0xff] }
 0x1a6   :  { %5639 = vmatpush3.bf16.msra.mxu0 %v5638_v52  ;;  %3236 = vmatmul.mubr.f32.vlgmr.msra.gmra.mrb[24].mxu1 %v8423_v49  ;;  %v914_v49 = vld [vmem:[%s9239_s1 + $0x1b28] sm:$0xff]  ;;  %v5646_v0 = vpack.c.bf16 %v882_v45, %v881_v47  ;;  %v937_v52 = vld [vmem:[%s9239_s1 + $0x1be0] sm:$0xff] }
 0x1a7   :  { %5671 = vmatpush3.bf16.msra.mxu1 %v5670_v38  ;;  %5641 = vmatprep.subr.bf16.mxu0 %v5640_v39  ;;  %v5678_v1 = vpack.c.bf16 %v914_v49, %v913_v51  ;;  %v938_v38 = vld [vmem:[%s9239_s1 + $0x1be8] sm:$0xff]  ;;  %v5658_v39 = vpack.c.bf16 %v888_v31, %v887_v29  ;;  %v944_v29 = vld [vmem:[%s9239_s1 + $0x1c18] sm:$0xff]  ;;  %v975_v31 = vld [vmem:[%s9239_s1 + $0x1d10] sm:$0xff] }
 0x1a8   :  { %5673 = vmatprep.subr.bf16.mxu1 %v5672_v44  ;;  %3305 = vmatprep.mubr.f32.mxu0 %v1321_v48  ;;  %v890_v44 = vld [vmem:[%s9239_s1 + $0x1a68] sm:$0xff]  ;;  %v5692_v33 = vpack.c.bf16 %v938_v38, %v937_v52  ;;  %v993_v52 = vld [vmem:[%s9239_s1 + $0x1da0] sm:$0xff] }
 0x1a9   :  { %3375 = vmatprep.mubr.f32.mxu1 %v1322_v54  ;;  %v922_v48 = vld [vmem:[%s9239_s1 + $0x1b68] sm:$0xff]  ;;  %v5662_v51 = vpack.c.bf16 %v890_v44, %v889_v43  ;;  %v5708_v43 = vpack.c.bf16 %v962_v37, %v961_v32  ;;  %v969_v25 = vld [vmem:[%s9239_s1 + $0x1ce0] sm:$0xff] }
 0x1aa   :  { %5643 = vmatpush3.bf16.msra.mxu0 %v5642_v55  ;;  %v5694_v9 = vpack.c.bf16 %v922_v48, %v921_v35  ;;  %v994_v38 = vld [vmem:[%s9239_s1 + $0x1da8] sm:$0xff]  ;;  %v977_v35 = vld [vmem:[%s9239_s1 + $0x1d20] sm:$0xff]  ;;  %v964_v48 = vld [vmem:[%s9239_s1 + $0x1cb8] sm:$0xff] }
 0x1ab   :  { %5675 = vmatpush3.bf16.msra.mxu1 %v5674_v56  ;;  %5645 = vmatprep.subr.bf16.mxu0 %v5644_v57  ;;  %v939_v56 = vld [vmem:[%s9239_s1 + $0x1bf0] sm:$0xff]  ;;  %v940_v57 = vld [vmem:[%s9239_s1 + $0x1bf8] sm:$0xff]  ;;  %v946_v44 = vld [vmem:[%s9239_s1 + $0x1c28] sm:$0xff] }
 0x1ac   :  { %5677 = vmatprep.subr.bf16.mxu1 %v5676_v58  ;;  %v43_v58 = vld [vmem:[%s9238_s0 + $0x70] sm:$0xff] }
 0x1ad   :  { %v1323_v6 = vcombine.high %v43_v58, %v43_v58  ;;  %v8834_v19 = vrot.slane %v43_v58, %v6042_v13  ;;  %v980_v58 = vld [vmem:[%s9239_s1 + $0x1d38] sm:$0xff] }
 0x1ae   :  { %5647 = vmatpush3.bf16.msra.mxu0 %v5646_v0  ;;  %v923_v0 = vld [vmem:[%s9239_s1 + $0x1b70] sm:$0xff] }
 0x1af   :  { %5679 = vmatpush3.bf16.msra.mxu1 %v5678_v1  ;;  %5649 = vmatprep.subr.bf16.mxu0 %v5648_v2  ;;  %v5696_v2 = vpack.c.bf16 %v940_v57, %v939_v56  ;;  %v5698_v7 = vpack.c.bf16 %v924_v3, %v923_v0  ;;  %v8843_v23 = vrot.slane %v1323_v6, %v6042_v13  ;;  %v947_v57 = vld [vmem:[%s9239_s1 + $0x1c30] sm:$0xff]  ;;  %v950_v3 = vld [vmem:[%s9239_s1 + $0x1c48] sm:$0xff]  ;;  %v968_v6 = vld [vmem:[%s9239_s1 + $0x1cd8] sm:$0xff] }
 0x1b0   :  { %5681 = vmatprep.subr.bf16.mxu1 %v5680_v5  ;;  %v989_v5 = vld [vmem:[%s9239_s1 + $0x1d80] sm:$0xff]  ;;  %v1338_v34 = vcombine.high %v8834_v19, %v8834_v19 }
 0x1b2   :  { %5651 = vmatpush3.bf16.msra.mxu0 %v5650_v12  ;;  %v941_v12 = vld [vmem:[%s9239_s1 + $0x1c00] sm:$0xff] }
 0x1b3   :  { %5683 = vmatpush3.bf16.msra.mxu1 %v5682_v14  ;;  %5653 = vmatprep.subr.bf16.mxu0 %v5652_v15  ;;  %v942_v14 = vld [vmem:[%s9239_s1 + $0x1c08] sm:$0xff]  ;;  %v973_v15 = vld [vmem:[%s9239_s1 + $0x1d00] sm:$0xff] }
 0x1b4   :  { %5685 = vmatprep.subr.bf16.mxu1 %v5684_v18  ;;  %v960_v18 = vld [vmem:[%s9239_s1 + $0x1c98] sm:$0xff]  ;;  %v5702_v24 = vpack.c.bf16 %v942_v14, %v941_v12 }
 0x1b6   :  { %5655 = vmatpush3.bf16.msra.mxu0 %v5654_v26  ;;  %v5734_v26 = vpack.c.bf16 %v974_v17, %v973_v15  ;;  %v951_v15 = vld [vmem:[%s9239_s1 + $0x1c50] sm:$0xff] }
 0x1b7   :  { %5687 = vmatpush3.bf16.msra.mxu1 %v5686_v27  ;;  %5657 = vmatprep.subr.bf16.mxu0 %v5656_v28  ;;  %v5704_v27 = vpack.c.bf16 %v960_v18, %v959_v8  ;;  %v943_v28 = vld [vmem:[%s9239_s1 + $0x1c10] sm:$0xff]  ;;  %v984_v18 = vld [vmem:[%s9239_s1 + $0x1d58] sm:$0xff] }
 0x1b8   :  { %v4136_v46 = vpop.f32.mrb[12].mxu0  ;;  %5689 = vmatprep.subr.bf16.mxu1 %v5688_v22  ;;  %v976_v22 = vld [vmem:[%s9239_s1 + $0x1d18] sm:$0xff]  ;;  %v983_v17 = vld [vmem:[%s9239_s1 + $0x1d50] sm:$0xff] }
 0x1b9   :  { %v4137_v54 = vpop.f32.mrb[13].mxu0  ;;  %v4171_v55 = vpop.f32.mrb[12].mxu1 }
 0x1ba   :  { %v4138_v47 = vadd.f32 %v4137_v54, %v4136_v46  ;;  %5659 = vmatpush3.bf16.msra.mxu0 %v5658_v39  ;;  %v4172_v45 = vpop.f32.mrb[13].mxu1  ;;  %v1339_v39 = vcombine.high %v8843_v23, %v8843_v23  ;;  %v5740_v46 = vpack.c.bf16 %v994_v38, %v993_v52  ;;  %v971_v52 = vld [vmem:[%s9239_s1 + $0x1cf0] sm:$0xff]  ;;  %v972_v38 = vld [vmem:[%s9239_s1 + $0x1cf8] sm:$0xff] }
 0x1bb   :  { %v4173_v49 = vadd.f32 %v4172_v45, %v4171_v55  ;;  %5691 = vmatpush3.bf16.msra.mxu1 %v5690_v40  ;;  %5661 = vmatprep.subr.bf16.mxu0 %v5660_v41  ;;  %v5706_v40 = vpack.c.bf16 %v944_v29, %v943_v28  ;;  %v5738_v41 = vpack.c.bf16 %v976_v22, %v975_v31  ;;  %v979_v45 = vld [vmem:[%s9239_s1 + $0x1d30] sm:$0xff]  ;;  %v953_v31 = vld [vmem:[%s9239_s1 + $0x1c60] sm:$0xff] }
 0x1bc   :  { %v2328_v1 = vadd.f32 %v4138_v47, %v8603_v11  ;;  %5693 = vmatprep.subr.bf16.mxu1 %v5692_v33  ;;  %v990_v11 = vld [vmem:[%s9239_s1 + $0x1d88] sm:$0xff]  ;;  %v963_v33 = vld [vmem:[%s9239_s1 + $0x1cb0] sm:$0xff]  ;;  %v948_v47 = vld [vmem:[%s9239_s1 + $0x1c38] sm:$0xff]  ;;  %v5746_v0 = vpack.c.bf16 %v980_v58, %v979_v45  ;;  %v5754_v28 = vpack.c.bf16 %v984_v18, %v983_v17  ;;  %v5724_v29 = vpack.c.bf16 %v970_v20, %v969_v25 }
 0x1bd   :  { %v5732_v16 = vpack.c.bf16 %v990_v11, %v989_v5  ;;  %v5712_v56 = vpack.c.bf16 %v964_v48, %v963_v33  ;;  %v5714_v63 = vpack.c.bf16 %v948_v47, %v947_v57  ;;  %v982_v5 = vld [vmem:[%s9239_s1 + $0x1d48] sm:$0xff]  ;;  %v967_v11 = vld [vmem:[%s9239_s1 + $0x1cd0] sm:$0xff]  ;;  %v985_v22 = vld [vmem:[%s9239_s1 + $0x1d60] sm:$0xff]  ;;  %v5728_v48 = vpack.c.bf16 %v972_v38, %v971_v52 }
 0x1be   :  { %v8813_v61 = vadd.f32 %v4173_v49, %v2328_v1  ;;  %5663 = vmatpush3.bf16.msra.mxu0 %v5662_v51  ;;  %v5744_v51 = vpack.c.bf16 %v996_v53, %v995_v50  ;;  %v965_v49 = vld [vmem:[%s9239_s1 + $0x1cc0] sm:$0xff]  ;;  %v5750_v12 = vpack.c.bf16 %v982_v5, %v981_v59  ;;  %v5720_v14 = vpack.c.bf16 %v968_v6, %v967_v11  ;;  %v955_v50 = vld [vmem:[%s9239_s1 + $0x1c70] sm:$0xff]  ;;  %v956_v53 = vld [vmem:[%s9239_s1 + $0x1c78] sm:$0xff] }
 0x1bf   :  { %5695 = vmatpush3.bf16.msra.mxu1 %v5694_v9  ;;  %5665 = vmatprep.subr.bf16.mxu0 %v5664_v60  ;;  %v966_v9 = vld [vmem:[%s9239_s1 + $0x1cc8] sm:$0xff]  ;;  %v997_v60 = vld [vmem:[%s9239_s1 + $0x1dc0] sm:$0xff]  ;;  %v988_v57 = vld [vmem:[%s9239_s1 + $0x1d78] sm:$0xff] }
 0x1c0   :  { %5697 = vmatprep.subr.bf16.mxu1 %v5696_v2  ;;  %v5716_v1 = vpack.c.bf16 %v966_v9, %v965_v49  ;;  %v949_v2 = vld [vmem:[%s9239_s1 + $0x1c40] sm:$0xff]  ;;  %v5748_v4 = vpack.c.bf16 %v998_v62, %v997_v60  ;;  %v1022_v45 = vld [vmem:[%s9239_s1 + $0x1e88] sm:$0xff]  ;;  %v5730_v9 = vpack.c.bf16 %v956_v53, %v955_v50  ;;  %v1023_v59 = vld [vmem:[%s9239_s1 + $0x1e90] sm:$0xff] }
 0x1c1   :  { %v1021_v47 = vld [vmem:[%s9239_s1 + $0x1e80] sm:$0xff]  ;;  %v1055_v11 = vld [vmem:[%s9239_s1 + $0x1f90] sm:$0xff]  ;;  %v1056_v6 = vld [vmem:[%s9239_s1 + $0x1f98] sm:$0xff] }
 0x1c2   :  { %5667 = vmatpush3.bf16.msra.mxu0 %v5666_v21  ;;  %v999_v21 = vld [vmem:[%s9239_s1 + $0x1dd0] sm:$0xff]  ;;  %v5764_v62 = vpack.c.bf16 %v1022_v45, %v1021_v47  ;;  %v1040_v17 = vld [vmem:[%s9239_s1 + $0x1f18] sm:$0xff]  ;;  %v1026_v18 = vld [vmem:[%s9239_s1 + $0x1ea8] sm:$0xff] }
 0x1c3   :  { %5699 = vmatpush3.bf16.msra.mxu1 %v5698_v7  ;;  %5701 = vmatprep.subr.bf16.mxu0 %v5700_v10  ;;  %v1000_v7 = vld [vmem:[%s9239_s1 + $0x1dd8] sm:$0xff]  ;;  %v5718_v10 = vpack.c.bf16 %v950_v3, %v949_v2  ;;  %v1038_v3 = vld [vmem:[%s9239_s1 + $0x1f08] sm:$0xff]  ;;  %v1057_v20 = vld [vmem:[%s9239_s1 + $0x1fa0] sm:$0xff] }
 0x1c4   :  { %5733 = vmatprep.subr.bf16.mxu1 %v5732_v16  ;;  %v952_v16 = vld [vmem:[%s9239_s1 + $0x1c58] sm:$0xff]  ;;  %v5752_v8 = vpack.c.bf16 %v1000_v7, %v999_v21  ;;  %v1046_v45 = vld [vmem:[%s9239_s1 + $0x1f48] sm:$0xff] }
 0x1c5   :  { %3306 = vmatmul.mubr.f32.vlgmr.msra.gmra.mrb[26].mxu0 %v8624_v42  ;;  %v945_v42 = vld [vmem:[%s9239_s1 + $0x1c20] sm:$0xff]  ;;  %v1060_v52 = vld [vmem:[%s9239_s1 + $0x1fb8] sm:$0xff] }
 0x1c6   :  { %5703 = vmatpush3.bf16.msra.mxu0 %v5702_v24  ;;  %3376 = vmatmul.mubr.f32.vlgmr.msra.gmra.mrb[26].mxu1 %v8633_v36  ;;  %v978_v36 = vld [vmem:[%s9239_s1 + $0x1d28] sm:$0xff]  ;;  %v5710_v54 = vpack.c.bf16 %v946_v44, %v945_v42  ;;  %v1001_v24 = vld [vmem:[%s9239_s1 + $0x1de0] sm:$0xff] }
 0x1c7   :  { %5735 = vmatpush3.bf16.msra.mxu1 %v5734_v26  ;;  %5705 = vmatprep.subr.bf16.mxu0 %v5704_v27  ;;  %v5742_v55 = vpack.c.bf16 %v978_v36, %v977_v35  ;;  %v1002_v26 = vld [vmem:[%s9239_s1 + $0x1de8] sm:$0xff]  ;;  %v5722_v27 = vpack.c.bf16 %v952_v16, %v951_v15  ;;  %v1008_v15 = vld [vmem:[%s9239_s1 + $0x1e18] sm:$0xff]  ;;  %v1039_v16 = vld [vmem:[%s9239_s1 + $0x1f10] sm:$0xff] }
 0x1c8   :  { %5737 = vmatprep.subr.bf16.mxu1 %v5736_v30  ;;  %3445 = vmatprep.mubr.f32.mxu0 %v1338_v34  ;;  %v954_v30 = vld [vmem:[%s9239_s1 + $0x1c68] sm:$0xff]  ;;  %v5756_v37 = vpack.c.bf16 %v1002_v26, %v1001_v24 }
 0x1c9   :  { %3515 = vmatprep.mubr.f32.mxu1 %v1339_v39  ;;  %v986_v34 = vld [vmem:[%s9239_s1 + $0x1d68] sm:$0xff]  ;;  %v5726_v35 = vpack.c.bf16 %v954_v30, %v953_v31  ;;  %v1041_v30 = vld [vmem:[%s9239_s1 + $0x1f20] sm:$0xff] }
 0x1ca   :  { %5707 = vmatpush3.bf16.msra.mxu0 %v5706_v40  ;;  %v5758_v33 = vpack.c.bf16 %v986_v34, %v985_v22  ;;  %v1058_v24 = vld [vmem:[%s9239_s1 + $0x1fa8] sm:$0xff]  ;;  %v1059_v34 = vld [vmem:[%s9239_s1 + $0x1fb0] sm:$0xff] }
 0x1cb   :  { %5739 = vmatpush3.bf16.msra.mxu1 %v5738_v41  ;;  %5709 = vmatprep.subr.bf16.mxu0 %v5708_v43  ;;  %v1003_v41 = vld [vmem:[%s9239_s1 + $0x1df0] sm:$0xff]  ;;  %v1004_v43 = vld [vmem:[%s9239_s1 + $0x1df8] sm:$0xff]  ;;  %v1010_v31 = vld [vmem:[%s9239_s1 + $0x1e28] sm:$0xff]  ;;  %v5804_v22 = vpack.c.bf16 %v1058_v24, %v1057_v20 }
 0x1cc   :  { %5741 = vmatprep.subr.bf16.mxu1 %v5740_v46  ;;  %v44_v46 = vld [vmem:[%s9238_s0 + $0x78] sm:$0xff] }
 0x1cd   :  { %v1340_v58 = vcombine.high %v44_v46, %v44_v46  ;;  %v9044_v5 = vrot.slane %v44_v46, %v6042_v13  ;;  %v1029_v46 = vld [vmem:[%s9239_s1 + $0x1ec0] sm:$0xff]  ;;  %v1036_v20 = vld [vmem:[%s9239_s1 + $0x1ef8] sm:$0xff] }
 0x1ce   :  { %5711 = vmatpush3.bf16.msra.mxu0 %v5710_v54  ;;  %v987_v54 = vld [vmem:[%s9239_s1 + $0x1d70] sm:$0xff] }
 0x1cf   :  { %5743 = vmatpush3.bf16.msra.mxu1 %v5742_v55  ;;  %5713 = vmatprep.subr.bf16.mxu0 %v5712_v56  ;;  %v5760_v56 = vpack.c.bf16 %v1004_v43, %v1003_v41  ;;  %v5762_v60 = vpack.c.bf16 %v988_v57, %v987_v54  ;;  %v9053_v21 = vrot.slane %v1340_v58, %v6042_v13  ;;  %v1011_v41 = vld [vmem:[%s9239_s1 + $0x1e30] sm:$0xff]  ;;  %v1012_v43 = vld [vmem:[%s9239_s1 + $0x1e38] sm:$0xff]  ;;  %v1045_v57 = vld [vmem:[%s9239_s1 + $0x1f40] sm:$0xff] }
 0x1d0   :  { %5745 = vmatprep.subr.bf16.mxu1 %v5744_v51  ;;  %v1053_v51 = vld [vmem:[%s9239_s1 + $0x1f80] sm:$0xff]  ;;  %v5800_v13 = vpack.c.bf16 %v1056_v6, %v1055_v11  ;;  %v1355_v25 = vcombine.high %v9044_v5, %v9044_v5  ;;  %v5778_v50 = vpack.c.bf16 %v1012_v43, %v1011_v41  ;;  %v1063_v58 = vld [vmem:[%s9239_s1 + $0x1fd0] sm:$0xff]  ;;  %v1034_v11 = vld [vmem:[%s9239_s1 + $0x1ee8] sm:$0xff] }
 0x1d1   :  { %v1356_v26 = vcombine.high %v9053_v21, %v9053_v21  ;;  %v1065_v6 = vld [vmem:[%s9239_s1 + $0x1fe0] sm:$0xff] }
 0x1d2   :  { %5715 = vmatpush3.bf16.msra.mxu0 %v5714_v63  ;;  %v1005_v63 = vld [vmem:[%s9239_s1 + $0x1e00] sm:$0xff] }
 0x1d3   :  { %5747 = vmatpush3.bf16.msra.mxu1 %v5746_v0  ;;  %5717 = vmatprep.subr.bf16.mxu0 %v5716_v1  ;;  %v1006_v0 = vld [vmem:[%s9239_s1 + $0x1e08] sm:$0xff]  ;;  %v1037_v1 = vld [vmem:[%s9239_s1 + $0x1f00] sm:$0xff] }
 0x1d4   :  { %5749 = vmatprep.subr.bf16.mxu1 %v5748_v4  ;;  %v1024_v4 = vld [vmem:[%s9239_s1 + $0x1e98] sm:$0xff]  ;;  %v5766_v7 = vpack.c.bf16 %v1006_v0, %v1005_v63  ;;  %v1015_v0 = vld [vmem:[%s9239_s1 + $0x1e50] sm:$0xff] }
 0x1d6   :  { %5719 = vmatpush3.bf16.msra.mxu0 %v5718_v10  ;;  %v5798_v10 = vpack.c.bf16 %v1038_v3, %v1037_v1  ;;  %v1016_v1 = vld [vmem:[%s9239_s1 + $0x1e58] sm:$0xff] }
 0x1d7   :  { %5751 = vmatpush3.bf16.msra.mxu1 %v5750_v12  ;;  %5721 = vmatprep.subr.bf16.mxu0 %v5720_v14  ;;  %v5768_v12 = vpack.c.bf16 %v1024_v4, %v1023_v59  ;;  %v1007_v14 = vld [vmem:[%s9239_s1 + $0x1e10] sm:$0xff]  ;;  %v1048_v59 = vld [vmem:[%s9239_s1 + $0x1f58] sm:$0xff]  ;;  %v1033_v4 = vld [vmem:[%s9239_s1 + $0x1ee0] sm:$0xff] }
 0x1d8   :  { %v4206_v32 = vpop.f32.mrb[14].mxu0  ;;  %5753 = vmatprep.subr.bf16.mxu1 %v5752_v8  ;;  %v1025_v8 = vld [vmem:[%s9239_s1 + $0x1ea0] sm:$0xff] }
 0x1d9   :  { %v4207_v39 = vpop.f32.mrb[15].mxu0  ;;  %v4241_v40 = vpop.f32.mrb[14].mxu1 }
 0x1da   :  { %v4208_v42 = vadd.f32 %v4207_v39, %v4206_v32  ;;  %5723 = vmatpush3.bf16.msra.mxu0 %v5722_v27  ;;  %v4242_v44 = vpop.f32.mrb[15].mxu1  ;;  %v5770_v27 = vpack.c.bf16 %v1008_v15, %v1007_v14  ;;  %v1027_v32 = vld [vmem:[%s9239_s1 + $0x1eb0] sm:$0xff]  ;;  %v5788_v14 = vpack.c.bf16 %v1034_v11, %v1033_v4  ;;  %v1017_v15 = vld [vmem:[%s9239_s1 + $0x1e60] sm:$0xff] }
 0x1db   :  { %v4243_v36 = vadd.f32 %v4242_v44, %v4241_v40  ;;  %5755 = vmatpush3.bf16.msra.mxu1 %v5754_v28  ;;  %5725 = vmatprep.subr.bf16.mxu0 %v5724_v29  ;;  %v5802_v28 = vpack.c.bf16 %v1040_v17, %v1039_v16  ;;  %v5772_v29 = vpack.c.bf16 %v1026_v18, %v1025_v8  ;;  %v1018_v16 = vld [vmem:[%s9239_s1 + $0x1e68] sm:$0xff] }
 0x1dc   :  { %v2468_v55 = vadd.f32 %v4208_v42, %v8813_v61  ;;  %5757 = vmatprep.subr.bf16.mxu1 %v5756_v37  ;;  %v1054_v61 = vld [vmem:[%s9239_s1 + $0x1f88] sm:$0xff]  ;;  %v1028_v37 = vld [vmem:[%s9239_s1 + $0x1eb8] sm:$0xff]  ;;  %v1043_v42 = vld [vmem:[%s9239_s1 + $0x1f30] sm:$0xff]  ;;  %v5808_v44 = vpack.c.bf16 %v1060_v52, %v1059_v34 }
 0x1dd   :  { %v5796_v2 = vpack.c.bf16 %v1054_v61, %v1053_v51  ;;  %v5776_v40 = vpack.c.bf16 %v1028_v37, %v1027_v32  ;;  %v1031_v51 = vld [vmem:[%s9239_s1 + $0x1ed0] sm:$0xff]  ;;  %v1032_v61 = vld [vmem:[%s9239_s1 + $0x1ed8] sm:$0xff]  ;;  %v1050_v18 = vld [vmem:[%s9239_s1 + $0x1f68] sm:$0xff] }
 0x1de   :  { %v9023_v49 = vadd.f32 %v4243_v36, %v2468_v55  ;;  %5727 = vmatpush3.bf16.msra.mxu0 %v5726_v35  ;;  %v1044_v35 = vld [vmem:[%s9239_s1 + $0x1f38] sm:$0xff]  ;;  %v1030_v36 = vld [vmem:[%s9239_s1 + $0x1ec8] sm:$0xff]  ;;  %v1013_v55 = vld [vmem:[%s9239_s1 + $0x1e40] sm:$0xff]  ;;  %v5784_v63 = vpack.c.bf16 %v1032_v61, %v1031_v51 }
 0x1df   :  { %5759 = vmatpush3.bf16.msra.mxu1 %v5758_v33  ;;  %5729 = vmatprep.subr.bf16.mxu0 %v5728_v48  ;;  %v1061_v33 = vld [vmem:[%s9239_s1 + $0x1fc0] sm:$0xff]  ;;  %v1062_v48 = vld [vmem:[%s9239_s1 + $0x1fc8] sm:$0xff]  ;;  %v5810_v53 = vpack.c.bf16 %v1044_v35, %v1043_v42  ;;  %v5780_v54 = vpack.c.bf16 %v1030_v36, %v1029_v46  ;;  %v1019_v32 = vld [vmem:[%s9239_s1 + $0x1e70] sm:$0xff] }
 0x1e0   :  { %5761 = vmatprep.subr.bf16.mxu1 %v5760_v56  ;;  %v1014_v56 = vld [vmem:[%s9239_s1 + $0x1e48] sm:$0xff]  ;;  %v5812_v47 = vpack.c.bf16 %v1062_v48, %v1061_v33  ;;  %v1020_v37 = vld [vmem:[%s9239_s1 + $0x1e78] sm:$0xff] }
 0x1e1   :  { %v5794_v41 = vpack.c.bf16 %v1020_v37, %v1019_v32 }
 0x1e2   :  { %5731 = vmatpush3.bf16.msra.mxu0 %v5730_v9  ;;  %v1064_v9 = vld [vmem:[%s9239_s1 + $0x1fd8] sm:$0xff] }
 0x1e3   :  { %5763 = vmatpush3.bf16.msra.mxu1 %v5762_v60  ;;  %5765 = vmatprep.subr.bf16.mxu0 %v5764_v62  ;;  %v5782_v60 = vpack.c.bf16 %v1014_v56, %v1013_v55  ;;  %v5814_v62 = vpack.c.bf16 %v1046_v45, %v1045_v57  ;;  %v5816_v3 = vpack.c.bf16 %v1064_v9, %v1063_v58 }
 0x1e4   :  { %5797 = vmatprep.subr.bf16.mxu1 %v5796_v2  ;;  %v1047_v2 = vld [vmem:[%s9239_s1 + $0x1f50] sm:$0xff] }
 0x1e5   :  { %3446 = vmatmul.mubr.f32.vlgmr.msra.gmra.mrb[28].mxu0 %v8834_v19  ;;  %v1009_v19 = vld [vmem:[%s9239_s1 + $0x1e20] sm:$0xff] }
 0x1e6   :  { %5767 = vmatpush3.bf16.msra.mxu0 %v5766_v7  ;;  %3516 = vmatmul.mubr.f32.vlgmr.msra.gmra.mrb[28].mxu1 %v8843_v23  ;;  %v1042_v23 = vld [vmem:[%s9239_s1 + $0x1f28] sm:$0xff]  ;;  %v5774_v38 = vpack.c.bf16 %v1010_v31, %v1009_v19  ;;  %v5790_v31 = vpack.c.bf16 %v1018_v16, %v1017_v15 }
 0x1e7   :  { %5799 = vmatpush3.bf16.msra.mxu1 %v5798_v10  ;;  %5769 = vmatprep.subr.bf16.mxu0 %v5768_v12  ;;  %v5806_v39 = vpack.c.bf16 %v1042_v23, %v1041_v30  ;;  %v1066_v7 = vld [vmem:[%s9239_s1 + $0x1fe8] sm:$0xff]  ;;  %v5786_v10 = vpack.c.bf16 %v1016_v1, %v1015_v0  ;;  %v5818_v12 = vpack.c.bf16 %v1048_v59, %v1047_v2 }
 0x1e8   :  { %5801 = vmatprep.subr.bf16.mxu1 %v5800_v13  ;;  %3585 = vmatprep.mubr.f32.mxu0 %v1355_v25  ;;  %v1049_v13 = vld [vmem:[%s9239_s1 + $0x1f60] sm:$0xff]  ;;  %v5820_v8 = vpack.c.bf16 %v1066_v7, %v1065_v6  ;;  %v1035_v25 = vld [vmem:[%s9239_s1 + $0x1ef0] sm:$0xff] }
 0x1e9   :  { %3655 = vmatprep.mubr.f32.mxu1 %v1356_v26  ;;  %v5792_v23 = vpack.c.bf16 %v1036_v20, %v1035_v25 }
 0x1ea   :  { %5771 = vmatpush3.bf16.msra.mxu0 %v5770_v27  ;;  %v1067_v27 = vld [vmem:[%s9239_s1 + $0x1ff0] sm:$0xff] }
 0x1eb   :  { %5803 = vmatpush3.bf16.msra.mxu1 %v5802_v28  ;;  %5773 = vmatprep.subr.bf16.mxu0 %v5772_v29  ;;  %v1068_v28 = vld [vmem:[%s9239_s1 + $0x1ff8] sm:$0xff] }
 0x1ec   :  { %5805 = vmatprep.subr.bf16.mxu1 %v5804_v22  ;;  %v5822_v22 = vpack.c.bf16 %v1050_v18, %v1049_v13  ;;  %v5824_v52 = vpack.c.bf16 %v1068_v28, %v1067_v27 }
 0x1ee   :  { %5775 = vmatpush3.bf16.msra.mxu0 %v5774_v38  ;;  %v1051_v38 = vld [vmem:[%s9239_s1 + $0x1f70] sm:$0xff] }
 0x1ef   :  { %5807 = vmatpush3.bf16.msra.mxu1 %v5806_v39  ;;  %5777 = vmatprep.subr.bf16.mxu0 %v5776_v40  ;;  %v1052_v39 = vld [vmem:[%s9239_s1 + $0x1f78] sm:$0xff] }
 0x1f0   :  { %5809 = vmatprep.subr.bf16.mxu1 %v5808_v44  ;;  %v5826_v43 = vpack.c.bf16 %v1052_v39, %v1051_v38 }
 0x1f2   :  { %5779 = vmatpush3.bf16.msra.mxu0 %v5778_v50 }
 0x1f3   :  { %5811 = vmatpush3.bf16.msra.mxu1 %v5810_v53  ;;  %5781 = vmatprep.subr.bf16.mxu0 %v5780_v54 }
 0x1f4   :  { %5813 = vmatprep.subr.bf16.mxu1 %v5812_v47 }
 0x1f6   :  { %5783 = vmatpush3.bf16.msra.mxu0 %v5782_v60 }
 0x1f7   :  { %5815 = vmatpush3.bf16.msra.mxu1 %v5814_v62  ;;  %5785 = vmatprep.subr.bf16.mxu0 %v5784_v63 }
 0x1f8   :  { %v4276_v17 = vpop.f32.mrb[16].mxu0  ;;  %5817 = vmatprep.subr.bf16.mxu1 %v5816_v3 }
 0x1f9   :  { %v4277_v24 = vpop.f32.mrb[17].mxu0  ;;  %v4311_v26 = vpop.f32.mrb[16].mxu1 }
 0x1fa   :  { %v4278_v29 = vadd.f32 %v4277_v24, %v4276_v17  ;;  %5787 = vmatpush3.bf16.msra.mxu0 %v5786_v10  ;;  %v4312_v19 = vpop.f32.mrb[17].mxu1 }
 0x1fb   :  { %v4313_v30 = vadd.f32 %v4312_v19, %v4311_v26  ;;  %5819 = vmatpush3.bf16.msra.mxu1 %v5818_v12  ;;  %5789 = vmatprep.subr.bf16.mxu0 %v5788_v14 }
 0x1fc   :  { %v2608_v34 = vadd.f32 %v4278_v29, %v9023_v49  ;;  %5821 = vmatprep.subr.bf16.mxu1 %v5820_v8 }
 0x1fe   :  { %v2678_v40 = vadd.f32 %v4313_v30, %v2608_v34  ;;  %5791 = vmatpush3.bf16.msra.mxu0 %v5790_v31 }
 0x1ff   :  { %5823 = vmatpush3.bf16.msra.mxu1 %v5822_v22  ;;  %5793 = vmatprep.subr.bf16.mxu0 %v5792_v23 }
 0x200   :  { %5825 = vmatprep.subr.bf16.mxu1 %v5824_v52 }
 0x202   :  { %5795 = vmatpush3.bf16.msra.mxu0 %v5794_v41 }
 0x203   :  { %5827 = vmatpush3.bf16.msra.mxu1 %v5826_v43 }
 0x205   :  { %3586 = vmatmul.mubr.f32.vlgmr.msra.gmra.mrb[30].mxu0 %v9044_v5  ;;  %v3683_v5 = vld [vmem:[%s9240_s2] ss:$0 sm:$0xff]  ;;  %s5871_s2 = smov [#allocation3]  }
 0x206   :  { %3656 = vmatmul.mubr.f32.vlgmr.msra.gmra.mrb[30].mxu1 %v9053_v21  ;;  %27 = vst.msk [vmem:[#allocation2] sm:$0x3] %vm26_vm0, %v3683_v5  ;;  %s3675_s9 = sshll.u32 %s5871_s2, 4  ;;  %s3676_s9 = int_to_ptr.vmem [resolvable:$true] %s3675_s9 }
 0x207   :  { %s5846_s10 = scalar_lea.vmem %s3676_s9, 32  ;;  %p5851_p1 = scmp.lt.s32.totalorder %s3676_s9, %s3676_s9 }
 0x208   :  { %p5847_p0 = scmp.ne.s32.totalorder %s3676_s9, %s5846_s10  ;;  %p5852_p2 = scmp.lt.s32.totalorder %s5846_s10, %s5846_s10 }
 0x20a   :  { %p5853_p3 = por %p5852_p2, %p5851_p1 }
 0x20c   :  { %p5854_p4 = pnand %p5853_p3, %p5847_p0 }
 0x20d   :  { %v28_v37 = vld [vmem:[#allocation2] sm:$0x3] }
 0x218   :  { %v4346_v49 = vpop.f32.mrb[18].mxu0 }
 0x219   :  { %v4347_v42 = vpop.f32.mrb[19].mxu0  ;;  %v4381_v44 = vpop.f32.mrb[18].mxu1 }
 0x21a   :  { %v4348_v35 = vadd.f32 %v4347_v42, %v4346_v49  ;;  %v4382_v46 = vpop.f32.mrb[19].mxu1 }
 0x21b   :  { %v4383_v36 = vadd.f32 %v4382_v46, %v4381_v44 }
 0x21c   :  { %v2748_v33 = vadd.f32 %v4348_v35, %v2678_v40 }
 0x21e   :  { %v2818_v48 = vadd.f32 %v4383_v36, %v2748_v33 }
 0x238   :  { %v4416_v50 = vpop.f32.mrb[20].mxu0 }
 0x239   :  { %v4417_v53 = vpop.f32.mrb[21].mxu0  ;;  %v4451_v54 = vpop.f32.mrb[20].mxu1 }
 0x23a   :  { %v4418_v55 = vadd.f32 %v4417_v53, %v4416_v50  ;;  %v4452_v56 = vpop.f32.mrb[21].mxu1 }
 0x23b   :  { %v4453_v57 = vadd.f32 %v4452_v56, %v4451_v54 }
 0x23c   :  { %v2888_v47 = vadd.f32 %v4418_v55, %v2818_v48 }
 0x23e   :  { %v2958_v45 = vadd.f32 %v4453_v57, %v2888_v47 }
 0x258   :  { %v4486_v51 = vpop.f32.mrb[22].mxu0 }
 0x259   :  { %v4487_v21 = vpop.f32.mrb[23].mxu0  ;;  %v4521_v61 = vpop.f32.mrb[22].mxu1 }
 0x25a   :  { %v4488_v58 = vadd.f32 %v4487_v21, %v4486_v51  ;;  %v4522_v9 = vpop.f32.mrb[23].mxu1 }
 0x25b   :  { %v4523_v60 = vadd.f32 %v4522_v9, %v4521_v61 }
 0x25c   :  { %v3028_v62 = vadd.f32 %v4488_v58, %v2958_v45 }
 0x25e   :  { %v3098_v63 = vadd.f32 %v4523_v60, %v3028_v62 }
 0x278   :  { %v4556_v0 = vpop.f32.mrb[24].mxu0 }
 0x279   :  { %v4557_v1 = vpop.f32.mrb[25].mxu0  ;;  %v4591_v2 = vpop.f32.mrb[24].mxu1 }
 0x27a   :  { %v4558_v3 = vadd.f32 %v4557_v1, %v4556_v0  ;;  %v4592_v59 = vpop.f32.mrb[25].mxu1 }
 0x27b   :  { %v4593_v4 = vadd.f32 %v4592_v59, %v4591_v2 }
 0x27c   :  { %v3168_v11 = vadd.f32 %v4558_v3, %v3098_v63 }
 0x27e   :  { %v3238_v6 = vadd.f32 %v4593_v4, %v3168_v11 }
 0x298   :  { %v4626_v7 = vpop.f32.mrb[26].mxu0 }
 0x299   :  { %v4627_v10 = vpop.f32.mrb[27].mxu0  ;;  %v4661_v12 = vpop.f32.mrb[26].mxu1 }
 0x29a   :  { %v4628_v14 = vadd.f32 %v4627_v10, %v4626_v7  ;;  %v4662_v15 = vpop.f32.mrb[27].mxu1 }
 0x29b   :  { %v4663_v16 = vadd.f32 %v4662_v15, %v4661_v12 }
 0x29c   :  { %v3308_v13 = vadd.f32 %v4628_v14, %v3238_v6 }
 0x29e   :  { %v3378_v17 = vadd.f32 %v4663_v16, %v3308_v13 }
 0x2b8   :  { %v4696_v8 = vpop.f32.mrb[28].mxu0 }
 0x2b9   :  { %v4697_v18 = vpop.f32.mrb[29].mxu0  ;;  %v4731_v25 = vpop.f32.mrb[28].mxu1 }
 0x2ba   :  { %v4698_v20 = vadd.f32 %v4697_v18, %v4696_v8  ;;  %v4732_v24 = vpop.f32.mrb[29].mxu1 }
 0x2bb   :  { %v4733_v26 = vadd.f32 %v4732_v24, %v4731_v25 }
 0x2bc   :  { %v3448_v27 = vadd.f32 %v4698_v20, %v3378_v17 }
 0x2be   :  { %v3518_v28 = vadd.f32 %v4733_v26, %v3448_v27 }
 0x2d8   :  { %v4766_v29 = vpop.f32.mrb[30].mxu0 }
 0x2d9   :  { %v4767_v19 = vpop.f32.mrb[31].mxu0  ;;  %v4801_v31 = vpop.f32.mrb[30].mxu1 }
 0x2da   :  { %v4768_v30 = vadd.f32 %v4767_v19, %v4766_v29  ;;  %v4802_v22 = vpop.f32.mrb[31].mxu1 }
 0x2db   :  { %v4803_v23 = vadd.f32 %v4802_v22, %v4801_v31 }
 0x2dc   :  { %v3588_v32 = vadd.f32 %v4768_v30, %v3518_v28 }
 0x2de   :  { %v3658_v34 = vadd.f32 %v4803_v23, %v3588_v32 }
 0x2e0   :  { %v3661_v52 = vadd.f32 %v3658_v34, %v28_v37 }
 0x2e2   :  { %3663 = vst.msk [vmem:[#allocation2] sm:$0x3] %vm26_vm0, %v3661_v52 }
 0x2e9   :  { %v3667_v38 = vld [vmem:[#allocation2] sm:$0x3] }
 0x2ea   :  { %3668 = vst.msk [vmem:[#allocation3] sm:$0x3] %vm26_vm0, %v3667_v38 }
 0x2eb   :  { %5857 = shalt.err (!%p5854_p4)
}
 0x2ec   :  { %s5858_s13 = scalar_lea.hbm %s9241_s3, 32 }
 0x2ed   :  { %p5859_p5 = scmp.ne.s32.totalorder %s9241_s3, %s5858_s13  ;;  %p5862_p6 = scmp.lt.u32.totalorder %s5858_s13, %s9241_s3 }
 0x2ef   :  { %p5864_p7 = pnand %p5862_p6, %p5859_p5 }
 0x2f1   :  { %5867 = shalt.err (!%p5864_p7)
}
 0x2f2   :  { %3678 = dma.vmem_to_hbm [thread:$0]  %s3676_s9, 32, %s9241_s3, [#allocation4]  }
 0x2f3   :  { %5868 = dma.done.wait [#allocation4], 32  }
 0x2f4   :  { %5869 = vsyncadd [#allocation4], 4294967264 }
 0x2f5   :  { %3682 = vsyncpa [#allocation4], 1 }

</bundles_post_ra>
